<compile_context>
chip_gen: v7x
topology: tpu7x:2x2x1
jax: 0.10.0
libtpu: 0.0.40
codegen_flags: <defaults>
</compile_context>

<pallas_src>
import functools
import math

import numpy as np

import jax
import jax.numpy as jnp
from jax.experimental import pallas as pl
from jax.experimental.pallas import tpu as pltpu


# ----------------------------------------------------------------------------
# Kernel 1: matmul + bias (+ optional ReLU)  -- conv-subsampling front-end
# ----------------------------------------------------------------------------

def _mm_bias_kernel(x_ref, w_ref, b_ref, o_ref, *, act):
    y = jnp.dot(x_ref[...], w_ref[...], preferred_element_type=jnp.float32) + b_ref[...]
    if act == "relu":
        y = jnp.maximum(y, 0.0)
    o_ref[...] = y


def matmul_bias(x2d, w, b2d, act="none"):
    """x2d: [M, K] (bf16), w: [K, N] (bf16), b2d: [1, N] (f32) -> [M, N] f32."""
    M, K = x2d.shape
    N = w.shape[1]
    tm = M if M <= 256 else 256          # tile rows so DMA/compute pipeline at scale
    grid = (pl.cdiv(M, tm),)
    return pl.pallas_call(
        functools.partial(_mm_bias_kernel, act=act),
        grid=grid,
        in_specs=[pl.BlockSpec((tm, K), lambda i: (i, 0)),
                  pl.BlockSpec((K, N), lambda i: (0, 0)),
                  pl.BlockSpec((1, N), lambda i: (0, 0))],
        out_specs=pl.BlockSpec((tm, N), lambda i: (i, 0)),
        out_shape=jax.ShapeDtypeStruct((M, N), jnp.float32),
        compiler_params=pltpu.CompilerParams(dimension_semantics=("parallel",)),
    )(x2d, w, b2d)


# ----------------------------------------------------------------------------
# Kernel 2: fused input Linear + n_blocks Conformer blocks (shared weights)
#           activation slab [B*T, D] carried in VMEM across the block axis
# ----------------------------------------------------------------------------

def _conformer_stack_kernel(
        x_ref,
        lin_w, lin_b,
        ff_g, ff_b, ff_w1, ff_b1, ff_w2, ff_b2,
        mh_g, mh_b, w_qkv, b_qkv, w_o, b_o,
        cv_g, cv_b, w_glu, b_glu, d_w, d_b, bn_s, bn_sh, p2_w, p2_b,
        bk_g, bk_b,
        attn_mask, dw_mask,
        o_ref,
        act,
        *, num_heads, ksize, eps):
    blk = pl.program_id(0)
    BT, D = act.shape
    pad = (ksize - 1) // 2

    # First block iteration: apply the input Linear (encoder_dim*L -> encoder_dim)
    # and park the activation slab in VMEM.
    @pl.when(blk == 0)
    def _():
        act[...] = (jnp.dot(x_ref[...].astype(jnp.bfloat16), lin_w[...],
                            preferred_element_type=jnp.float32) + lin_b[...])

    a = act[...]                                           # [BT, D] f32

    def layer_norm(v, g_ref, b_ref):
        mu = jnp.mean(v, axis=-1, keepdims=True)
        vc = v - mu
        var = jnp.mean(vc * vc, axis=-1, keepdims=True)
        return vc * jax.lax.rsqrt(var + eps) * g_ref[...] + b_ref[...]

    def feed_forward(v):
        h = layer_norm(v, ff_g, ff_b).astype(jnp.bfloat16)
        h = jnp.dot(h, ff_w1[...], preferred_element_type=jnp.float32) + ff_b1[...]
        h = h * jax.nn.sigmoid(h)                          # swish (f32)
        return jnp.dot(h.astype(jnp.bfloat16), ff_w2[...],
                       preferred_element_type=jnp.float32) + ff_b2[...]

    # ---- feed-forward #1 ; torch.div(x, 0.5) == 2 * x  (reproduced exactly)
    y1 = 2.0 * feed_forward(a) + a

    # ---- MHSA: packed QKV matmul; per-head scores over the whole [BT] slab
    # with an additive block-diagonal batch mask; single output projection.
    h = layer_norm(y1, mh_g, mh_b).astype(jnp.bfloat16)
    qkv = jnp.dot(h, w_qkv[...], preferred_element_type=jnp.float32) + b_qkv[...]
    dh = D // num_heads
    scale = 1.0 / math.sqrt(dh)
    amask = attn_mask[...]                                 # [BT, BT], 0 / -1e30
    ctx = []
    for hd in range(num_heads):                            # static, small
        lo = hd * dh
        q = qkv[:, lo:lo + dh].astype(jnp.bfloat16)
        k = qkv[:, D + lo:D + lo + dh].astype(jnp.bfloat16)
        v = qkv[:, 2 * D + lo:2 * D + lo + dh].astype(jnp.bfloat16)
        s = jax.lax.dot_general(q, k, (((1,), (1,)), ((), ())),
                                preferred_element_type=jnp.float32) * scale + amask
        s = s - jnp.max(s, axis=-1, keepdims=True)
        p = jnp.exp(s)
        p = p * pl.reciprocal(jnp.sum(p, axis=-1, keepdims=True), approx=True)
        ctx.append(jnp.dot(p.astype(jnp.bfloat16), v,
                           preferred_element_type=jnp.float32))       # [BT, dh]
    ctx = jnp.concatenate(ctx, axis=-1)                    # [BT, D]
    attn = jnp.dot(ctx.astype(jnp.bfloat16), w_o[...],
                   preferred_element_type=jnp.float32) + b_o[...]
    y2 = attn + y1

    # ---- convolution module: LN -> (1x1 conv + GLU) -> depthwise conv ->
    #      BatchNorm(eval) -> swish -> 1x1 conv, all fused
    h = layer_norm(y2, cv_g, cv_b).astype(jnp.bfloat16)
    ag = jnp.dot(h, w_glu[...], preferred_element_type=jnp.float32) + b_glu[...]
    glu = ag[:, :D] * jax.nn.sigmoid(ag[:, D:])            # [BT, D] f32

    # depthwise 'same' conv: pad once, k shifted windows, per-row validity mask
    # (mask also prevents bleed across batch boundaries of the folded slab).
    if pad > 0:
        zpad = jnp.zeros((pad, D), jnp.float32)
        gpad = jnp.concatenate([zpad, glu, zpad], axis=0)  # [BT + 2*pad, D]
    else:
        gpad = glu
    dwv = d_w[...]                                         # [k, D] (f32)
    dwm = dw_mask[...]                                     # [BT, k] (f32, 0/1)
    conv = jnp.zeros((BT, D), jnp.float32)
    for j in range(ksize):                                 # static, tiny k
        win = gpad[j:j + BT, :]
        conv = conv + win * dwm[:, j:j + 1] * dwv[j:j + 1, :]
    yb = (conv + d_b[...]) * bn_s[...] + bn_sh[...]        # eval-mode BatchNorm
    yb = yb * jax.nn.sigmoid(yb)                           # swish
    hc = jnp.dot(yb.astype(jnp.bfloat16), p2_w[...],
                 preferred_element_type=jnp.float32) + p2_b[...]
    # conv module's internal residual (+y2) plus the block residual (+y2)
    y3 = hc + y2 + y2

    # ---- feed-forward #2 (shared weights).  NOTE: the residual adds the
    # *pre-conv* tensor y2 (reference quirk: org_x is not updated after conv).
    y4 = 2.0 * feed_forward(y3) + y2

    out = layer_norm(y4, bk_g, bk_b)
    act[...] = out

    @pl.when(blk == pl.num_programs(0) - 1)
    def _():
        o_ref[...] = out


def conformer_encoder(pp, feat2d, attn_mask, dw_mask, cfg, B, T):
    BT, DL = feat2d.shape
    D = cfg["encoder_dim"]

    weights = [
        pp["lin_w"], pp["lin_b"],
        pp["ff_ln_g"], pp["ff_ln_b"], pp["ff_w1"], pp["ff_b1"], pp["ff_w2"], pp["ff_b2"],
        pp["mh_ln_g"], pp["mh_ln_b"], pp["w_qkv"], pp["b_qkv"], pp["w_o"], pp["b_o"],
        pp["cv_ln_g"], pp["cv_ln_b"], pp["w_glu"], pp["b_glu"], pp["d_w"], pp["d_b"],
        pp["bn_scale"], pp["bn_shift"], pp["p2_w"], pp["p2_b"],
        pp["bk_ln_g"], pp["bk_ln_b"],
        attn_mask, dw_mask,
    ]
    # constant index_map -> weights/masks are DMA'd once and stay resident in VMEM
    wspecs = [pl.BlockSpec(w.shape, lambda j: (0, 0)) for w in weights]

    return pl.pallas_call(
        functools.partial(_conformer_stack_kernel,
                          num_heads=cfg["heads"], ksize=cfg["kernel_size"], eps=1e-5),
        grid=(cfg["n_blocks"],),
        in_specs=[pl.BlockSpec((BT, DL), lambda j: (0, 0))] + wspecs,
        out_specs=pl.BlockSpec((BT, D), lambda j: (0, 0)),
        out_shape=jax.ShapeDtypeStruct((BT, D), jnp.float32),
        scratch_shapes=[pltpu.VMEM((BT, D), jnp.float32)],
        compiler_params=pltpu.CompilerParams(
            dimension_semantics=("arbitrary",),
            # re-budgeted so the (double-buffered) resident weight set also fits
            # v7x's 64 MiB VMEM at realistic dims; bf16 packing halves it again.
            vmem_limit_bytes=48 * 1024 * 1024),
    )(feat2d, *weights)


# ----------------------------------------------------------------------------
# Kernel 3: fused 3-layer LSTM decoder + log_softmax (batch padded to 8 rows)
# ----------------------------------------------------------------------------

def _lstm_logsm_kernel(x_ref,
                       wih0, whh0, b0, wih1, whh1, b1, wih2, whh2, b2,
                       y_ref, *, T, Bp):
    H = whh0.shape[0]

    def run_layer(xv, wih_ref, whh_ref, b_ref):
        # input projection for ALL timesteps hoisted out of the recurrence
        xw = jnp.dot(xv.astype(jnp.bfloat16), wih_ref[...],
                     preferred_element_type=jnp.float32) + b_ref[...]   # [T*Bp, 4H]
        whh = whh_ref[...]
        h = jnp.zeros((Bp, H), jnp.float32)
        c = jnp.zeros((Bp, H), jnp.float32)
        hs = []
        for t in range(T):                                 # static small T: unrolled
            g = xw[t * Bp:(t + 1) * Bp, :] + jnp.dot(      # 8-row aligned slice
                h.astype(jnp.bfloat16), whh, preferred_element_type=jnp.float32)
            i = jax.nn.sigmoid(g[:, 0:H])
            f = jax.nn.sigmoid(g[:, H:2 * H])
            gg = jnp.tanh(g[:, 2 * H:3 * H])
            o = jax.nn.sigmoid(g[:, 3 * H:4 * H])
            c = f * c + i * gg
            h = o * jnp.tanh(c)
            hs.append(h)
        return jnp.concatenate(hs, axis=0)                 # [T*Bp, H]

    h1 = run_layer(x_ref[...], wih0, whh0, b0)
    h2 = run_layer(h1, wih1, whh1, b1)
    h3 = run_layer(h2, wih2, whh2, b2)

    # log_softmax vectorized once over the whole block, single dense store
    m = jnp.max(h3, axis=-1, keepdims=True)
    s = h3 - m
    y_ref[...] = s - jnp.log(jnp.sum(jnp.exp(s), axis=-1, keepdims=True))


def lstm_decoder_logsoftmax(pp, x_pad2d, T, Bp):
    # x_pad2d: [T*Bp, D] time-major, batch padded to Bp (multiple of 8) rows.
    H = pp["lstm"][0]["whh"].shape[0]
    args = [x_pad2d]
    specs = [pl.BlockSpec(x_pad2d.shape, lambda i: (0, 0))]
    for lp in pp["lstm"]:
        for nm in ("wih", "whh", "b"):
            a = lp[nm]
            args.append(a)
            specs.append(pl.BlockSpec(a.shape, lambda i: (0, 0)))
    return pl.pallas_call(
        functools.partial(_lstm_logsm_kernel, T=T, Bp=Bp),
        grid=(1,),
        in_specs=specs,
        out_specs=pl.BlockSpec((T * Bp, H), lambda i: (0, 0)),
        out_shape=jax.ShapeDtypeStruct((T * Bp, H), jnp.float32),
    )(*args)


# ----------------------------------------------------------------------------
# Glue (im2col for the one-time subsampling front-end, composition)
# ----------------------------------------------------------------------------

def im2col(x_nchw, k, s):
    """x: [B, C, H, W] -> patches [B, Ho*Wo, C*k*k] (c-major, (kh,kw)-minor)."""
    B, C, H, W = x_nchw.shape
    Ho = (H - k) // s + 1
    Wo = (W - k) // s + 1
    cols = []
    for kh in range(k):
        for kw in range(k):
            cols.append(x_nchw[:, :,
                               kh:kh + s * (Ho - 1) + 1:s,
                               kw:kw + s * (Wo - 1) + 1:s])      # [B, C, Ho, Wo]
    patches = jnp.stack(cols, axis=2)                             # [B, C, k*k, Ho, Wo]
    patches = patches.reshape(B, C * k * k, Ho * Wo).transpose(0, 2, 1)
    return patches, Ho, Wo


def conformer_forward(pp, x, input_length, cfg):
    B, n_mels, frames = x.shape
    D = cfg["encoder_dim"]
    k = cfg["kernel_size"]

    # --- convolution subsampling: two (k=3, s=2) conv2d + ReLU via im2col + MXU
    x4 = x[:, None, :, :]                                         # [B, 1, n_mels, frames]
    p1, H1, W1 = im2col(x4, 3, 2)
    y1 = matmul_bias(p1.reshape(B * H1 * W1, -1).astype(jnp.bfloat16),
                     pp["sub_w1"], pp["sub_b1"], act="relu")
    y1 = y1.reshape(B, H1, W1, D).transpose(0, 3, 1, 2)           # NCHW for next conv

    p2, H2, W2 = im2col(y1, 3, 2)
    y2 = matmul_bias(p2.reshape(B * H2 * W2, -1).astype(jnp.bfloat16),
                     pp["sub_w2"], pp["sub_b2"], act="relu")
    y2 = y2.reshape(B, H2, W2, D)

    # torch: view(B, C*L, T).permute(0,2,1) -> feature index = c*L + l
    feat = y2.transpose(0, 2, 3, 1).reshape(B, W2, D * H2)        # [B, T, C*L]
    T = W2
    feat2d = feat.reshape(B * T, D * H2)                          # [B*T, C*L] slab

    # grid-invariant constant masks for the fused encoder kernel (built once)
    row_b = np.repeat(np.arange(B), T)
    attn_mask = jnp.asarray(
        np.where(row_b[:, None] == row_b[None, :], 0.0, -1e30).astype(np.float32))
    t_of_row = np.arange(B * T) % T
    offs = np.arange(k) - (k - 1) // 2
    dw_mask = jnp.asarray(
        ((t_of_row[:, None] + offs[None, :] >= 0) &
         (t_of_row[:, None] + offs[None, :] < T)).astype(np.float32))

    # --- fused: input Linear + n_blocks shared-weight Conformer blocks
    h = conformer_encoder(pp, feat2d, attn_mask, dw_mask, cfg, B, T)   # [B*T, D]

    # --- fused: 3-layer LSTM decoder + log_softmax (time-major, batch padded to 8)
    Bp = max(8, ((B + 7) // 8) * 8)
    h_tbd = h.reshape(B, T, D).transpose(1, 0, 2)                 # [T, B, D]
    x_pad = jnp.zeros((T, Bp, D), jnp.float32).at[:, :B, :].set(h_tbd)
    y = lstm_decoder_logsoftmax(pp, x_pad.reshape(T * Bp, D), T, Bp)   # [T*Bp, n_class]
    logp = y.reshape(T, Bp, -1)[:, :B, :].transpose(1, 0, 2)      # [B, T, n_class]

    out_len = (input_length >> 2) - 1                             # matches reference
    return logp, out_len


# ----------------------------------------------------------------------------
# Parameters: torch-like init + one-time packing for the fused kernels
# ----------------------------------------------------------------------------

def _randn(key, shape, scale):
    return scale * jax.random.normal(key, shape, dtype=jnp.float32)


def init_params(key, cfg):
    D = cfg["encoder_dim"]
    e = cfg["expansion"]
    k = cfg["kernel_size"]
    n_mels = cfg["n_mels"]
    n_class = cfg["n_class"]
    L_mel = ((n_mels - 3) // 2 + 1 - 3) // 2 + 1

    keys = iter(jax.random.split(key, 128))
    nk = lambda: next(keys)

    p = {
        "sub_w1": _randn(nk(), (D, 1, 3, 3), 0.2),
        "sub_b1": _randn(nk(), (D,), 0.05),
        "sub_w2": _randn(nk(), (D, D, 3, 3), 0.08),
        "sub_b2": _randn(nk(), (D,), 0.05),
        "lin_w": _randn(nk(), (D * L_mel, D), 0.1),
        "lin_b": _randn(nk(), (D,), 0.05),
    }

    def ln_pair():
        return 1.0 + _randn(nk(), (D,), 0.05), _randn(nk(), (D,), 0.02)

    ff_g, ff_b = ln_pair()
    blk = {
        "ff": dict(ln_g=ff_g, ln_b=ff_b,
                   w1=_randn(nk(), (D, D * e), 0.1), b1=_randn(nk(), (D * e,), 0.05),
                   w2=_randn(nk(), (D * e, D), 0.1), b2=_randn(nk(), (D,), 0.05)),
    }
    mh_g, mh_b = ln_pair()
    blk["mhsa"] = dict(ln_g=mh_g, ln_b=mh_b,
                       wq=_randn(nk(), (D, D), 0.1), bq=_randn(nk(), (D,), 0.02),
                       wk=_randn(nk(), (D, D), 0.1), bk=_randn(nk(), (D,), 0.02),
                       wv=_randn(nk(), (D, D), 0.1), bv=_randn(nk(), (D,), 0.02),
                       wo=_randn(nk(), (D, D), 0.1), bo=_randn(nk(), (D,), 0.02))
    cv_g, cv_b = ln_pair()
    blk["conv"] = dict(ln_g=cv_g, ln_b=cv_b,
                       p1_wa=_randn(nk(), (D, D), 0.1), p1_ba=_randn(nk(), (D,), 0.02),
                       p1_wg=_randn(nk(), (D, D), 0.1), p1_bg=_randn(nk(), (D,), 0.02),
                       d_w=_randn(nk(), (k, D), 0.15), d_b=_randn(nk(), (D,), 0.02),
                       bn_g=1.0 + _randn(nk(), (D,), 0.05), bn_b=_randn(nk(), (D,), 0.02),
                       bn_rm=_randn(nk(), (D,), 0.05),
                       bn_rv=0.5 + jnp.abs(_randn(nk(), (D,), 0.2)),
                       p2_w=_randn(nk(), (D, D), 0.1), p2_b=_randn(nk(), (D,), 0.02))
    bl_g, bl_b = ln_pair()
    blk["ln_g"], blk["ln_b"] = bl_g, bl_b
    p["block"] = blk

    lstm = []
    in_sizes = [D, n_class, n_class]
    H = n_class
    for In in in_sizes:
        lp = {}
        for g in ("i", "f", "g", "o"):
            lp["w_i" + g] = _randn(nk(), (In, H), 0.15)
            lp["w_h" + g] = _randn(nk(), (H, H), 0.15)
            lp["b_" + g] = _randn(nk(), (H,), 0.05)        # combined bias_ih + bias_hh
        lstm.append(lp)
    p["lstm"] = lstm
    return p


def prepare_params(params, cfg):
    """One-time packing of torch-style params into the fused-kernel layout.

    Matmul weights are packed to bf16 (MXU operands); biases / LN / BN /
    depthwise weights stay f32 (VPU math stays f32 on all chip generations).
    """
    D = cfg["encoder_dim"]
    blk = params["block"]
    bn_eps = 1e-5
    r1 = lambda v: v.reshape(1, -1)
    bf = lambda v: v.astype(jnp.bfloat16)

    bn_scale = blk["conv"]["bn_g"] / jnp.sqrt(blk["conv"]["bn_rv"] + bn_eps)
    bn_shift = blk["conv"]["bn_b"] - blk["conv"]["bn_rm"] * bn_scale

    pp = dict(
        sub_w1=bf(params["sub_w1"].reshape(D, -1).T), sub_b1=r1(params["sub_b1"]),
        sub_w2=bf(params["sub_w2"].reshape(D, -1).T), sub_b2=r1(params["sub_b2"]),
        lin_w=bf(params["lin_w"]), lin_b=r1(params["lin_b"]),
        ff_ln_g=r1(blk["ff"]["ln_g"]), ff_ln_b=r1(blk["ff"]["ln_b"]),
        ff_w1=bf(blk["ff"]["w1"]), ff_b1=r1(blk["ff"]["b1"]),
        ff_w2=bf(blk["ff"]["w2"]), ff_b2=r1(blk["ff"]["b2"]),
        mh_ln_g=r1(blk["mhsa"]["ln_g"]), mh_ln_b=r1(blk["mhsa"]["ln_b"]),
        w_qkv=bf(jnp.concatenate([blk["mhsa"]["wq"], blk["mhsa"]["wk"],
                                  blk["mhsa"]["wv"]], axis=1)),
        b_qkv=r1(jnp.concatenate([blk["mhsa"]["bq"], blk["mhsa"]["bk"],
                                  blk["mhsa"]["bv"]])),
        w_o=bf(blk["mhsa"]["wo"]), b_o=r1(blk["mhsa"]["bo"]),
        cv_ln_g=r1(blk["conv"]["ln_g"]), cv_ln_b=r1(blk["conv"]["ln_b"]),
        w_glu=bf(jnp.concatenate([blk["conv"]["p1_wa"], blk["conv"]["p1_wg"]], axis=1)),
        b_glu=r1(jnp.concatenate([blk["conv"]["p1_ba"], blk["conv"]["p1_bg"]])),
        d_w=blk["conv"]["d_w"], d_b=r1(blk["conv"]["d_b"]),
        bn_scale=r1(bn_scale), bn_shift=r1(bn_shift),
        p2_w=bf(blk["conv"]["p2_w"]), p2_b=r1(blk["conv"]["p2_b"]),
        bk_ln_g=r1(blk["ln_g"]), bk_ln_b=r1(blk["ln_b"]),
    )
    lstm = []
    for lp in params["lstm"]:
        lstm.append(dict(
            wih=bf(jnp.concatenate([lp["w_ii"], lp["w_if"], lp["w_ig"], lp["w_io"]], axis=1)),
            whh=bf(jnp.concatenate([lp["w_hi"], lp["w_hf"], lp["w_hg"], lp["w_ho"]], axis=1)),
            b=r1(jnp.concatenate([lp["b_i"], lp["b_f"], lp["b_g"], lp["b_o"]])),
        ))
    pp["lstm"] = lstm
    return pp


# ----------------------------------------------------------------------------
# Main
# ----------------------------------------------------------------------------

if __name__ == "__main__":
    cfg = dict(n_mels=16, frames=31, n_class=10, encoder_dim=16,
               expansion=2, kernel_size=3, heads=4, n_blocks=2, batch=2)

    key = jax.random.PRNGKey(0)
    pkey, xkey = jax.random.split(key)
    params = init_params(pkey, cfg)
    pp = prepare_params(params, cfg)          # one-time packing, outside jit

    x = jax.random.normal(xkey, (cfg["batch"], cfg["n_mels"], cfg["frames"]),
                          dtype=jnp.float32)
    input_length = jnp.full((cfg["batch"],), cfg["frames"], dtype=jnp.int32)

    fwd = jax.jit(lambda xx, ll: conformer_forward(pp, xx, ll, cfg))
    logp, out_len = fwd(x, input_length)
    (logp, out_len) = jax.block_until_ready((logp, out_len))

    T_expect = (((cfg["frames"] - 3) // 2 + 1) - 3) // 2 + 1
    assert logp.shape == (cfg["batch"], T_expect, cfg["n_class"])
    assert bool(jnp.all(jnp.isfinite(logp)))
    print("KERNEL_OK")
</pallas_src>

<mosaic_0001>
module attributes {stable_mosaic.version = 11 : i64} {
  func.func @_mm_bias_kernel(%arg0: i32, %arg1: memref<210x9xbf16, #tpu.memory_space<vmem>>, %arg2: memref<9x16xbf16, #tpu.memory_space<vmem>>, %arg3: memref<1x16xf32, #tpu.memory_space<vmem>>, %arg4: memref<210x16xf32, #tpu.memory_space<vmem>>) attributes {dimension_semantics = [#tpu.dimension_semantics<parallel>], iteration_bounds = array<i64: 1>, scalar_prefetch = 0 : i64, scratch_operands = 0 : i64, tpu.core_type = #tpu.core_type<tc>, window_params = [{transform_indices = @transform_0, window_bounds = array<i64: 210, 9>}, {pipeline_mode = #tpu.pipeline_mode<synchronous>, transform_indices = @transform_1, window_bounds = array<i64: 9, 16>}, {pipeline_mode = #tpu.pipeline_mode<synchronous>, transform_indices = @transform_2, window_bounds = array<i64: 1, 16>}, {transform_indices = @transform_3, window_bounds = array<i64: 210, 16>}]} {
    %c0 = arith.constant 0 : index
    %c0_0 = arith.constant 0 : index
    %0 = vector.load %arg1[%c0, %c0_0] : memref<210x9xbf16, #tpu.memory_space<vmem>>, vector<210x9xbf16>
    %c0_1 = arith.constant 0 : index
    %c0_2 = arith.constant 0 : index
    %1 = vector.load %arg2[%c0_1, %c0_2] : memref<9x16xbf16, #tpu.memory_space<vmem>>, vector<9x16xbf16>
    %cst = arith.constant dense<0.000000e+00> : vector<210x16xf32>
    %2 = tpu.matmul %0, %1, %cst {dimension_numbers = #tpu.dot_dimension_numbers<[1], [0], [0], [1], [0, 0, 1, 1], [], []>} : vector<210x9xbf16>, vector<9x16xbf16>, vector<210x16xf32> -> vector<210x16xf32>
    %c0_3 = arith.constant 0 : index
    %c0_4 = arith.constant 0 : index
    %3 = vector.load %arg3[%c0_3, %c0_4] : memref<1x16xf32, #tpu.memory_space<vmem>>, vector<1x16xf32>
    %4 = vector.broadcast %3 : vector<1x16xf32> to vector<210x16xf32>
    %5 = arith.addf %2, %4 : vector<210x16xf32>
    %cst_5 = arith.constant 0.000000e+00 : f32
    %6 = vector.broadcast %cst_5 : f32 to vector<210x16xf32>
    %7 = arith.maximumf %5, %6 : vector<210x16xf32>
    %c0_6 = arith.constant 0 : index
    %c0_7 = arith.constant 0 : index
    %8 = vector.load %arg4[%c0_6, %c0_7] : memref<210x16xf32, #tpu.memory_space<vmem>>, vector<210x16xf32>
    tpu.vector_store %arg4[%c0_6, %c0_7], %7 {strides = array<i32>} : memref<210x16xf32, #tpu.memory_space<vmem>>, vector<210x16xf32>,
    return
  }
  func.func @transform_0(%arg0: i32) -> (i32, i32) {
    %c0_i32 = arith.constant 0 : i32
    %c0_i32_0 = arith.constant 0 : i32
    return %arg0, %c0_i32 : i32, i32
  }
  func.func @transform_1(%arg0: i32) -> (i32, i32) {
    %c0_i32 = arith.constant 0 : i32
    %c0_i32_0 = arith.constant 0 : i32
    %c0_i32_1 = arith.constant 0 : i32
    return %c0_i32, %c0_i32_0 : i32, i32
  }
  func.func @transform_2(%arg0: i32) -> (i32, i32) {
    %c0_i32 = arith.constant 0 : i32
    %c0_i32_0 = arith.constant 0 : i32
    %c0_i32_1 = arith.constant 0 : i32
    return %c0_i32, %c0_i32_0 : i32, i32
  }
  func.func @transform_3(%arg0: i32) -> (i32, i32) {
    %c0_i32 = arith.constant 0 : i32
    %c0_i32_0 = arith.constant 0 : i32
    return %arg0, %c0_i32 : i32, i32
  }
}

module attributes {stable_mosaic.version = 11 : i64} {
  func.func @_mm_bias_kernel(%arg0: i32, %arg1: memref<42x144xbf16, #tpu.memory_space<vmem>>, %arg2: memref<144x16xbf16, #tpu.memory_space<vmem>>, %arg3: memref<1x16xf32, #tpu.memory_space<vmem>>, %arg4: memref<42x16xf32, #tpu.memory_space<vmem>>) attributes {dimension_semantics = [#tpu.dimension_semantics<parallel>], iteration_bounds = array<i64: 1>, scalar_prefetch = 0 : i64, scratch_operands = 0 : i64, tpu.core_type = #tpu.core_type<tc>, window_params = [{transform_indices = @transform_0, window_bounds = array<i64: 42, 144>}, {pipeline_mode = #tpu.pipeline_mode<synchronous>, transform_indices = @transform_1, window_bounds = array<i64: 144, 16>}, {pipeline_mode = #tpu.pipeline_mode<synchronous>, transform_indices = @transform_2, window_bounds = array<i64: 1, 16>}, {transform_indices = @transform_3, window_bounds = array<i64: 42, 16>}]} {
    %c0 = arith.constant 0 : index
    %c0_0 = arith.constant 0 : index
    %0 = vector.load %arg1[%c0, %c0_0] : memref<42x144xbf16, #tpu.memory_space<vmem>>, vector<42x144xbf16>
    %c0_1 = arith.constant 0 : index
    %c0_2 = arith.constant 0 : index
    %1 = vector.load %arg2[%c0_1, %c0_2] : memref<144x16xbf16, #tpu.memory_space<vmem>>, vector<144x16xbf16>
    %cst = arith.constant dense<0.000000e+00> : vector<42x16xf32>
    %2 = tpu.matmul %0, %1, %cst {dimension_numbers = #tpu.dot_dimension_numbers<[1], [0], [0], [1], [0, 0, 1, 1], [], []>} : vector<42x144xbf16>, vector<144x16xbf16>, vector<42x16xf32> -> vector<42x16xf32>
    %c0_3 = arith.constant 0 : index
    %c0_4 = arith.constant 0 : index
    %3 = vector.load %arg3[%c0_3, %c0_4] : memref<1x16xf32, #tpu.memory_space<vmem>>, vector<1x16xf32>
    %4 = vector.broadcast %3 : vector<1x16xf32> to vector<42x16xf32>
    %5 = arith.addf %2, %4 : vector<42x16xf32>
    %cst_5 = arith.constant 0.000000e+00 : f32
    %6 = vector.broadcast %cst_5 : f32 to vector<42x16xf32>
    %7 = arith.maximumf %5, %6 : vector<42x16xf32>
    %c0_6 = arith.constant 0 : index
    %c0_7 = arith.constant 0 : index
    %8 = vector.load %arg4[%c0_6, %c0_7] : memref<42x16xf32, #tpu.memory_space<vmem>>, vector<42x16xf32>
    tpu.vector_store %arg4[%c0_6, %c0_7], %7 {strides = array<i32>} : memref<42x16xf32, #tpu.memory_space<vmem>>, vector<42x16xf32>,
    return
  }
  func.func @transform_0(%arg0: i32) -> (i32, i32) {
    %c0_i32 = arith.constant 0 : i32
    %c0_i32_0 = arith.constant 0 : i32
    return %arg0, %c0_i32 : i32, i32
  }
  func.func @transform_1(%arg0: i32) -> (i32, i32) {
    %c0_i32 = arith.constant 0 : i32
    %c0_i32_0 = arith.constant 0 : i32
    %c0_i32_1 = arith.constant 0 : i32
    return %c0_i32, %c0_i32_0 : i32, i32
  }
  func.func @transform_2(%arg0: i32) -> (i32, i32) {
    %c0_i32 = arith.constant 0 : i32
    %c0_i32_0 = arith.constant 0 : i32
    %c0_i32_1 = arith.constant 0 : i32
    return %c0_i32, %c0_i32_0 : i32, i32
  }
  func.func @transform_3(%arg0: i32) -> (i32, i32) {
    %c0_i32 = arith.constant 0 : i32
    %c0_i32_0 = arith.constant 0 : i32
    return %arg0, %c0_i32 : i32, i32
  }
}

module attributes {stable_mosaic.version = 11 : i64} {
  func.func @_conformer_stack_kernel(%arg0: i32, %arg1: memref<14x48xf32, #tpu.memory_space<vmem>>, %arg2: memref<48x16xbf16, #tpu.memory_space<vmem>>, %arg3: memref<1x16xf32, #tpu.memory_space<vmem>>, %arg4: memref<1x16xf32, #tpu.memory_space<vmem>>, %arg5: memref<1x16xf32, #tpu.memory_space<vmem>>, %arg6: memref<16x32xbf16, #tpu.memory_space<vmem>>, %arg7: memref<1x32xf32, #tpu.memory_space<vmem>>, %arg8: memref<32x16xbf16, #tpu.memory_space<vmem>>, %arg9: memref<1x16xf32, #tpu.memory_space<vmem>>, %arg10: memref<1x16xf32, #tpu.memory_space<vmem>>, %arg11: memref<1x16xf32, #tpu.memory_space<vmem>>, %arg12: memref<16x48xbf16, #tpu.memory_space<vmem>>, %arg13: memref<1x48xf32, #tpu.memory_space<vmem>>, %arg14: memref<16x16xbf16, #tpu.memory_space<vmem>>, %arg15: memref<1x16xf32, #tpu.memory_space<vmem>>, %arg16: memref<1x16xf32, #tpu.memory_space<vmem>>, %arg17: memref<1x16xf32, #tpu.memory_space<vmem>>, %arg18: memref<16x32xbf16, #tpu.memory_space<vmem>>, %arg19: memref<1x32xf32, #tpu.memory_space<vmem>>, %arg20: memref<3x16xf32, #tpu.memory_space<vmem>>, %arg21: memref<1x16xf32, #tpu.memory_space<vmem>>, %arg22: memref<1x16xf32, #tpu.memory_space<vmem>>, %arg23: memref<1x16xf32, #tpu.memory_space<vmem>>, %arg24: memref<16x16xbf16, #tpu.memory_space<vmem>>, %arg25: memref<1x16xf32, #tpu.memory_space<vmem>>, %arg26: memref<1x16xf32, #tpu.memory_space<vmem>>, %arg27: memref<1x16xf32, #tpu.memory_space<vmem>>, %arg28: memref<14x14xf32, #tpu.memory_space<vmem>>, %arg29: memref<14x3xf32, #tpu.memory_space<vmem>>, %arg30: memref<14x16xf32, #tpu.memory_space<vmem>>, %arg31: memref<14x16xf32, #tpu.memory_space<vmem>>) attributes {dimension_semantics = [#tpu.dimension_semantics<arbitrary>], iteration_bounds = array<i64: 2>, scalar_prefetch = 0 : i64, scratch_operands = 1 : i64, tpu.core_type = #tpu.core_type<tc>, window_params = [{pipeline_mode = #tpu.pipeline_mode<synchronous>, transform_indices = @transform_0, window_bounds = array<i64: 14, 48>}, {pipeline_mode = #tpu.pipeline_mode<synchronous>, transform_indices = @transform_1, window_bounds = array<i64: 48, 16>}, {pipeline_mode = #tpu.pipeline_mode<synchronous>, transform_indices = @transform_2, window_bounds = array<i64: 1, 16>}, {pipeline_mode = #tpu.pipeline_mode<synchronous>, transform_indices = @transform_3, window_bounds = array<i64: 1, 16>}, {pipeline_mode = #tpu.pipeline_mode<synchronous>, transform_indices = @transform_4, window_bounds = array<i64: 1, 16>}, {pipeline_mode = #tpu.pipeline_mode<synchronous>, transform_indices = @transform_5, window_bounds = array<i64: 16, 32>}, {pipeline_mode = #tpu.pipeline_mode<synchronous>, transform_indices = @transform_6, window_bounds = array<i64: 1, 32>}, {pipeline_mode = #tpu.pipeline_mode<synchronous>, transform_indices = @transform_7, window_bounds = array<i64: 32, 16>}, {pipeline_mode = #tpu.pipeline_mode<synchronous>, transform_indices = @transform_8, window_bounds = array<i64: 1, 16>}, {pipeline_mode = #tpu.pipeline_mode<synchronous>, transform_indices = @transform_9, window_bounds = array<i64: 1, 16>}, {pipeline_mode = #tpu.pipeline_mode<synchronous>, transform_indices = @transform_10, window_bounds = array<i64: 1, 16>}, {pipeline_mode = #tpu.pipeline_mode<synchronous>, transform_indices = @transform_11, window_bounds = array<i64: 16, 48>}, {pipeline_mode = #tpu.pipeline_mode<synchronous>, transform_indices = @transform_12, window_bounds = array<i64: 1, 48>}, {pipeline_mode = #tpu.pipeline_mode<synchronous>, transform_indices = @transform_13, window_bounds = array<i64: 16, 16>}, {pipeline_mode = #tpu.pipeline_mode<synchronous>, transform_indices = @transform_14, window_bounds = array<i64: 1, 16>}, {pipeline_mode = #tpu.pipeline_mode<synchronous>, transform_indices = @transform_15, window_bounds = array<i64: 1, 16>}, {pipeline_mode = #tpu.pipeline_mode<synchronous>, transform_indices = @transform_16, window_bounds = array<i64: 1, 16>}, {pipeline_mode = #tpu.pipeline_mode<synchronous>, transform_indices = @transform_17, window_bounds = array<i64: 16, 32>}, {pipeline_mode = #tpu.pipeline_mode<synchronous>, transform_indices = @transform_18, window_bounds = array<i64: 1, 32>}, {pipeline_mode = #tpu.pipeline_mode<synchronous>, transform_indices = @transform_19, window_bounds = array<i64: 3, 16>}, {pipeline_mode = #tpu.pipeline_mode<synchronous>, transform_indices = @transform_20, window_bounds = array<i64: 1, 16>}, {pipeline_mode = #tpu.pipeline_mode<synchronous>, transform_indices = @transform_21, window_bounds = array<i64: 1, 16>}, {pipeline_mode = #tpu.pipeline_mode<synchronous>, transform_indices = @transform_22, window_bounds = array<i64: 1, 16>}, {pipeline_mode = #tpu.pipeline_mode<synchronous>, transform_indices = @transform_23, window_bounds = array<i64: 16, 16>}, {pipeline_mode = #tpu.pipeline_mode<synchronous>, transform_indices = @transform_24, window_bounds = array<i64: 1, 16>}, {pipeline_mode = #tpu.pipeline_mode<synchronous>, transform_indices = @transform_25, window_bounds = array<i64: 1, 16>}, {pipeline_mode = #tpu.pipeline_mode<synchronous>, transform_indices = @transform_26, window_bounds = array<i64: 1, 16>}, {pipeline_mode = #tpu.pipeline_mode<synchronous>, transform_indices = @transform_27, window_bounds = array<i64: 14, 14>}, {pipeline_mode = #tpu.pipeline_mode<synchronous>, transform_indices = @transform_28, window_bounds = array<i64: 14, 3>}, {pipeline_mode = #tpu.pipeline_mode<synchronous>, transform_indices = @transform_29, window_bounds = array<i64: 14, 16>}]} {
    %c0_i32 = arith.constant 0 : i32
    %0 = arith.cmpi eq, %arg0, %c0_i32 : i32
    %1 = arith.extui %0 : i1 to i32
    %c0_i32_0 = arith.constant 0 : i32
    %2 = arith.cmpi ne, %1, %c0_i32_0 : i32
    scf.if %2 {
      %c0_129 = arith.constant 0 : index
      %c0_130 = arith.constant 0 : index
      %329 = vector.load %arg1[%c0_129, %c0_130] : memref<14x48xf32, #tpu.memory_space<vmem>>, vector<14x48xf32>
      %330 = arith.truncf %329 : vector<14x48xf32> to vector<14x48xbf16>
      %c0_131 = arith.constant 0 : index
      %c0_132 = arith.constant 0 : index
      %331 = vector.load %arg2[%c0_131, %c0_132] : memref<48x16xbf16, #tpu.memory_space<vmem>>, vector<48x16xbf16>
      %cst_133 = arith.constant dense<0.000000e+00> : vector<14x16xf32>
      %332 = tpu.matmul %330, %331, %cst_133 {dimension_numbers = #tpu.dot_dimension_numbers<[1], [0], [0], [1], [0, 0, 1, 1], [], []>} : vector<14x48xbf16>, vector<48x16xbf16>, vector<14x16xf32> -> vector<14x16xf32>
      %c0_134 = arith.constant 0 : index
      %c0_135 = arith.constant 0 : index
      %333 = vector.load %arg3[%c0_134, %c0_135] : memref<1x16xf32, #tpu.memory_space<vmem>>, vector<1x16xf32>
      %334 = vector.broadcast %333 : vector<1x16xf32> to vector<14x16xf32>
      %335 = arith.addf %332, %334 : vector<14x16xf32>
      %c0_136 = arith.constant 0 : index
      %c0_137 = arith.constant 0 : index
      %336 = vector.load %arg31[%c0_136, %c0_137] : memref<14x16xf32, #tpu.memory_space<vmem>>, vector<14x16xf32>
      tpu.vector_store %arg31[%c0_136, %c0_137], %335 {strides = array<i32>} : memref<14x16xf32, #tpu.memory_space<vmem>>, vector<14x16xf32>,
    } else {
    }
    %c0 = arith.constant 0 : index
    %c0_1 = arith.constant 0 : index
    %3 = vector.load %arg31[%c0, %c0_1] : memref<14x16xf32, #tpu.memory_space<vmem>>, vector<14x16xf32>
    %cst = arith.constant dense<0.000000e+00> : vector<14xf32>
    %4 = vector.multi_reduction <add>, %3, %cst [1] : vector<14x16xf32> to vector<14xf32>
    %5 = vector.shape_cast %4 : vector<14xf32> to vector<14x1xf32>
    %cst_2 = arith.constant 1.600000e+01 : f32
    %6 = vector.broadcast %cst_2 : f32 to vector<14x1xf32>
    %7 = arith.divf %5, %6 : vector<14x1xf32>
    %8 = vector.broadcast %7 : vector<14x1xf32> to vector<14x16xf32>
    %9 = arith.subf %3, %8 : vector<14x16xf32>
    %10 = arith.mulf %9, %9 : vector<14x16xf32>
    %cst_3 = arith.constant dense<0.000000e+00> : vector<14xf32>
    %11 = vector.multi_reduction <add>, %10, %cst_3 [1] : vector<14x16xf32> to vector<14xf32>
    %12 = vector.shape_cast %11 : vector<14xf32> to vector<14x1xf32>
    %cst_4 = arith.constant 1.600000e+01 : f32
    %13 = vector.broadcast %cst_4 : f32 to vector<14x1xf32>
    %14 = arith.divf %12, %13 : vector<14x1xf32>
    %cst_5 = arith.constant 9.99999974E-6 : f32
    %15 = vector.broadcast %cst_5 : f32 to vector<14x1xf32>
    %16 = arith.addf %14, %15 : vector<14x1xf32>
    %17 = math.rsqrt %16 : vector<14x1xf32>
    %18 = vector.broadcast %17 : vector<14x1xf32> to vector<14x16xf32>
    %19 = arith.mulf %9, %18 : vector<14x16xf32>
    %c0_6 = arith.constant 0 : index
    %c0_7 = arith.constant 0 : index
    %20 = vector.load %arg4[%c0_6, %c0_7] : memref<1x16xf32, #tpu.memory_space<vmem>>, vector<1x16xf32>
    %21 = vector.broadcast %20 : vector<1x16xf32> to vector<14x16xf32>
    %22 = arith.mulf %19, %21 : vector<14x16xf32>
    %c0_8 = arith.constant 0 : index
    %c0_9 = arith.constant 0 : index
    %23 = vector.load %arg5[%c0_8, %c0_9] : memref<1x16xf32, #tpu.memory_space<vmem>>, vector<1x16xf32>
    %24 = vector.broadcast %23 : vector<1x16xf32> to vector<14x16xf32>
    %25 = arith.addf %22, %24 : vector<14x16xf32>
    %26 = arith.truncf %25 : vector<14x16xf32> to vector<14x16xbf16>
    %c0_10 = arith.constant 0 : index
    %c0_11 = arith.constant 0 : index
    %27 = vector.load %arg6[%c0_10, %c0_11] : memref<16x32xbf16, #tpu.memory_space<vmem>>, vector<16x32xbf16>
    %cst_12 = arith.constant dense<0.000000e+00> : vector<14x32xf32>
    %28 = tpu.matmul %26, %27, %cst_12 {dimension_numbers = #tpu.dot_dimension_numbers<[1], [0], [0], [1], [0, 0, 1, 1], [], []>} : vector<14x16xbf16>, vector<16x32xbf16>, vector<14x32xf32> -> vector<14x32xf32>
    %c0_13 = arith.constant 0 : index
    %c0_14 = arith.constant 0 : index
    %29 = vector.load %arg7[%c0_13, %c0_14] : memref<1x32xf32, #tpu.memory_space<vmem>>, vector<1x32xf32>
    %30 = vector.broadcast %29 : vector<1x32xf32> to vector<14x32xf32>
    %31 = arith.addf %28, %30 : vector<14x32xf32>
    %32 = arith.negf %31 : vector<14x32xf32>
    %33 = math.exp %32 : vector<14x32xf32>
    %cst_15 = arith.constant 1.000000e+00 : f32
    %34 = vector.broadcast %cst_15 : f32 to vector<14x32xf32>
    %35 = arith.addf %34, %33 : vector<14x32xf32>
    %36 = arith.divf %34, %35 : vector<14x32xf32>
    %37 = arith.mulf %31, %36 : vector<14x32xf32>
    %38 = arith.truncf %37 : vector<14x32xf32> to vector<14x32xbf16>
    %c0_16 = arith.constant 0 : index
    %c0_17 = arith.constant 0 : index
    %39 = vector.load %arg8[%c0_16, %c0_17] : memref<32x16xbf16, #tpu.memory_space<vmem>>, vector<32x16xbf16>
    %cst_18 = arith.constant dense<0.000000e+00> : vector<14x16xf32>
    %40 = tpu.matmul %38, %39, %cst_18 {dimension_numbers = #tpu.dot_dimension_numbers<[1], [0], [0], [1], [0, 0, 1, 1], [], []>} : vector<14x32xbf16>, vector<32x16xbf16>, vector<14x16xf32> -> vector<14x16xf32>
    %c0_19 = arith.constant 0 : index
    %c0_20 = arith.constant 0 : index
    %41 = vector.load %arg9[%c0_19, %c0_20] : memref<1x16xf32, #tpu.memory_space<vmem>>, vector<1x16xf32>
    %42 = vector.broadcast %41 : vector<1x16xf32> to vector<14x16xf32>
    %43 = arith.addf %40, %42 : vector<14x16xf32>
    %cst_21 = arith.constant 2.000000e+00 : f32
    %44 = vector.broadcast %cst_21 : f32 to vector<14x16xf32>
    %45 = arith.mulf %44, %43 : vector<14x16xf32>
    %46 = arith.addf %45, %3 : vector<14x16xf32>
    %cst_22 = arith.constant dense<0.000000e+00> : vector<14xf32>
    %47 = vector.multi_reduction <add>, %46, %cst_22 [1] : vector<14x16xf32> to vector<14xf32>
    %48 = vector.shape_cast %47 : vector<14xf32> to vector<14x1xf32>
    %cst_23 = arith.constant 1.600000e+01 : f32
    %49 = vector.broadcast %cst_23 : f32 to vector<14x1xf32>
    %50 = arith.divf %48, %49 : vector<14x1xf32>
    %51 = vector.broadcast %50 : vector<14x1xf32> to vector<14x16xf32>
    %52 = arith.subf %46, %51 : vector<14x16xf32>
    %53 = arith.mulf %52, %52 : vector<14x16xf32>
    %cst_24 = arith.constant dense<0.000000e+00> : vector<14xf32>
    %54 = vector.multi_reduction <add>, %53, %cst_24 [1] : vector<14x16xf32> to vector<14xf32>
    %55 = vector.shape_cast %54 : vector<14xf32> to vector<14x1xf32>
    %cst_25 = arith.constant 1.600000e+01 : f32
    %56 = vector.broadcast %cst_25 : f32 to vector<14x1xf32>
    %57 = arith.divf %55, %56 : vector<14x1xf32>
    %cst_26 = arith.constant 9.99999974E-6 : f32
    %58 = vector.broadcast %cst_26 : f32 to vector<14x1xf32>
    %59 = arith.addf %57, %58 : vector<14x1xf32>
    %60 = math.rsqrt %59 : vector<14x1xf32>
    %61 = vector.broadcast %60 : vector<14x1xf32> to vector<14x16xf32>
    %62 = arith.mulf %52, %61 : vector<14x16xf32>
    %c0_27 = arith.constant 0 : index
    %c0_28 = arith.constant 0 : index
    %63 = vector.load %arg10[%c0_27, %c0_28] : memref<1x16xf32, #tpu.memory_space<vmem>>, vector<1x16xf32>
    %64 = vector.broadcast %63 : vector<1x16xf32> to vector<14x16xf32>
    %65 = arith.mulf %62, %64 : vector<14x16xf32>
    %c0_29 = arith.constant 0 : index
    %c0_30 = arith.constant 0 : index
    %66 = vector.load %arg11[%c0_29, %c0_30] : memref<1x16xf32, #tpu.memory_space<vmem>>, vector<1x16xf32>
    %67 = vector.broadcast %66 : vector<1x16xf32> to vector<14x16xf32>
    %68 = arith.addf %65, %67 : vector<14x16xf32>
    %69 = arith.truncf %68 : vector<14x16xf32> to vector<14x16xbf16>
    %c0_31 = arith.constant 0 : index
    %c0_32 = arith.constant 0 : index
    %70 = vector.load %arg12[%c0_31, %c0_32] : memref<16x48xbf16, #tpu.memory_space<vmem>>, vector<16x48xbf16>
    %cst_33 = arith.constant dense<0.000000e+00> : vector<14x48xf32>
    %71 = tpu.matmul %69, %70, %cst_33 {dimension_numbers = #tpu.dot_dimension_numbers<[1], [0], [0], [1], [0, 0, 1, 1], [], []>} : vector<14x16xbf16>, vector<16x48xbf16>, vector<14x48xf32> -> vector<14x48xf32>
    %c0_34 = arith.constant 0 : index
    %c0_35 = arith.constant 0 : index
    %72 = vector.load %arg13[%c0_34, %c0_35] : memref<1x48xf32, #tpu.memory_space<vmem>>, vector<1x48xf32>
    %73 = vector.broadcast %72 : vector<1x48xf32> to vector<14x48xf32>
    %74 = arith.addf %71, %73 : vector<14x48xf32>
    %c0_36 = arith.constant 0 : index
    %c0_37 = arith.constant 0 : index
    %75 = vector.load %arg28[%c0_36, %c0_37] : memref<14x14xf32, #tpu.memory_space<vmem>>, vector<14x14xf32>
    %76 = vector.extract_strided_slice %74 {offsets = [0, 0], sizes = [14, 4], strides = [1, 1]} : vector<14x48xf32> to vector<14x4xf32>
    %77 = arith.truncf %76 : vector<14x4xf32> to vector<14x4xbf16>
    %78 = vector.extract_strided_slice %74 {offsets = [0, 16], sizes = [14, 4], strides = [1, 1]} : vector<14x48xf32> to vector<14x4xf32>
    %79 = arith.truncf %78 : vector<14x4xf32> to vector<14x4xbf16>
    %80 = vector.extract_strided_slice %74 {offsets = [0, 32], sizes = [14, 4], strides = [1, 1]} : vector<14x48xf32> to vector<14x4xf32>
    %81 = arith.truncf %80 : vector<14x4xf32> to vector<14x4xbf16>
    %cst_38 = arith.constant dense<0.000000e+00> : vector<14x14xf32>
    %82 = tpu.matmul %77, %79, %cst_38 {dimension_numbers = #tpu.dot_dimension_numbers<[1], [1], [0], [0], [0, 0, 1, 0], [], []>} : vector<14x4xbf16>, vector<14x4xbf16>, vector<14x14xf32> -> vector<14x14xf32>
    %cst_39 = arith.constant 5.000000e-01 : f32
    %83 = vector.broadcast %cst_39 : f32 to vector<14x14xf32>
    %84 = arith.mulf %82, %83 : vector<14x14xf32>
    %85 = arith.addf %84, %75 : vector<14x14xf32>
    %cst_40 = arith.constant dense<0xFF800000> : vector<14xf32>
    %86 = vector.multi_reduction <maximumf>, %85, %cst_40 [1] : vector<14x14xf32> to vector<14xf32>
    %87 = vector.shape_cast %86 : vector<14xf32> to vector<14x1xf32>
    %88 = vector.broadcast %87 : vector<14x1xf32> to vector<14x14xf32>
    %89 = arith.subf %85, %88 : vector<14x14xf32>
    %90 = math.exp %89 : vector<14x14xf32>
    %cst_41 = arith.constant dense<0.000000e+00> : vector<14xf32>
    %91 = vector.multi_reduction <add>, %90, %cst_41 [1] : vector<14x14xf32> to vector<14xf32>
    %92 = vector.shape_cast %91 : vector<14xf32> to vector<14x1xf32>
    %93 = tpu.reciprocal %92 {approx = true} : vector<14x1xf32> -> vector<14x1xf32>
    %94 = vector.broadcast %93 : vector<14x1xf32> to vector<14x14xf32>
    %95 = arith.mulf %90, %94 : vector<14x14xf32>
    %96 = arith.truncf %95 : vector<14x14xf32> to vector<14x14xbf16>
    %cst_42 = arith.constant dense<0.000000e+00> : vector<14x4xf32>
    %97 = tpu.matmul %96, %81, %cst_42 {dimension_numbers = #tpu.dot_dimension_numbers<[1], [0], [0], [1], [0, 0, 1, 1], [], []>} : vector<14x14xbf16>, vector<14x4xbf16>, vector<14x4xf32> -> vector<14x4xf32>
    %98 = vector.extract_strided_slice %74 {offsets = [0, 4], sizes = [14, 4], strides = [1, 1]} : vector<14x48xf32> to vector<14x4xf32>
    %99 = arith.truncf %98 : vector<14x4xf32> to vector<14x4xbf16>
    %100 = vector.extract_strided_slice %74 {offsets = [0, 20], sizes = [14, 4], strides = [1, 1]} : vector<14x48xf32> to vector<14x4xf32>
    %101 = arith.truncf %100 : vector<14x4xf32> to vector<14x4xbf16>
    %102 = vector.extract_strided_slice %74 {offsets = [0, 36], sizes = [14, 4], strides = [1, 1]} : vector<14x48xf32> to vector<14x4xf32>
    %103 = arith.truncf %102 : vector<14x4xf32> to vector<14x4xbf16>
    %cst_43 = arith.constant dense<0.000000e+00> : vector<14x14xf32>
    %104 = tpu.matmul %99, %101, %cst_43 {dimension_numbers = #tpu.dot_dimension_numbers<[1], [1], [0], [0], [0, 0, 1, 0], [], []>} : vector<14x4xbf16>, vector<14x4xbf16>, vector<14x14xf32> -> vector<14x14xf32>
    %cst_44 = arith.constant 5.000000e-01 : f32
    %105 = vector.broadcast %cst_44 : f32 to vector<14x14xf32>
    %106 = arith.mulf %104, %105 : vector<14x14xf32>
    %107 = arith.addf %106, %75 : vector<14x14xf32>
    %cst_45 = arith.constant dense<0xFF800000> : vector<14xf32>
    %108 = vector.multi_reduction <maximumf>, %107, %cst_45 [1] : vector<14x14xf32> to vector<14xf32>
    %109 = vector.shape_cast %108 : vector<14xf32> to vector<14x1xf32>
    %110 = vector.broadcast %109 : vector<14x1xf32> to vector<14x14xf32>
    %111 = arith.subf %107, %110 : vector<14x14xf32>
    %112 = math.exp %111 : vector<14x14xf32>
    %cst_46 = arith.constant dense<0.000000e+00> : vector<14xf32>
    %113 = vector.multi_reduction <add>, %112, %cst_46 [1] : vector<14x14xf32> to vector<14xf32>
    %114 = vector.shape_cast %113 : vector<14xf32> to vector<14x1xf32>
    %115 = tpu.reciprocal %114 {approx = true} : vector<14x1xf32> -> vector<14x1xf32>
    %116 = vector.broadcast %115 : vector<14x1xf32> to vector<14x14xf32>
    %117 = arith.mulf %112, %116 : vector<14x14xf32>
    %118 = arith.truncf %117 : vector<14x14xf32> to vector<14x14xbf16>
    %cst_47 = arith.constant dense<0.000000e+00> : vector<14x4xf32>
    %119 = tpu.matmul %118, %103, %cst_47 {dimension_numbers = #tpu.dot_dimension_numbers<[1], [0], [0], [1], [0, 0, 1, 1], [], []>} : vector<14x14xbf16>, vector<14x4xbf16>, vector<14x4xf32> -> vector<14x4xf32>
    %120 = vector.extract_strided_slice %74 {offsets = [0, 8], sizes = [14, 4], strides = [1, 1]} : vector<14x48xf32> to vector<14x4xf32>
    %121 = arith.truncf %120 : vector<14x4xf32> to vector<14x4xbf16>
    %122 = vector.extract_strided_slice %74 {offsets = [0, 24], sizes = [14, 4], strides = [1, 1]} : vector<14x48xf32> to vector<14x4xf32>
    %123 = arith.truncf %122 : vector<14x4xf32> to vector<14x4xbf16>
    %124 = vector.extract_strided_slice %74 {offsets = [0, 40], sizes = [14, 4], strides = [1, 1]} : vector<14x48xf32> to vector<14x4xf32>
    %125 = arith.truncf %124 : vector<14x4xf32> to vector<14x4xbf16>
    %cst_48 = arith.constant dense<0.000000e+00> : vector<14x14xf32>
    %126 = tpu.matmul %121, %123, %cst_48 {dimension_numbers = #tpu.dot_dimension_numbers<[1], [1], [0], [0], [0, 0, 1, 0], [], []>} : vector<14x4xbf16>, vector<14x4xbf16>, vector<14x14xf32> -> vector<14x14xf32>
    %cst_49 = arith.constant 5.000000e-01 : f32
    %127 = vector.broadcast %cst_49 : f32 to vector<14x14xf32>
    %128 = arith.mulf %126, %127 : vector<14x14xf32>
    %129 = arith.addf %128, %75 : vector<14x14xf32>
    %cst_50 = arith.constant dense<0xFF800000> : vector<14xf32>
    %130 = vector.multi_reduction <maximumf>, %129, %cst_50 [1] : vector<14x14xf32> to vector<14xf32>
    %131 = vector.shape_cast %130 : vector<14xf32> to vector<14x1xf32>
    %132 = vector.broadcast %131 : vector<14x1xf32> to vector<14x14xf32>
    %133 = arith.subf %129, %132 : vector<14x14xf32>
    %134 = math.exp %133 : vector<14x14xf32>
    %cst_51 = arith.constant dense<0.000000e+00> : vector<14xf32>
    %135 = vector.multi_reduction <add>, %134, %cst_51 [1] : vector<14x14xf32> to vector<14xf32>
    %136 = vector.shape_cast %135 : vector<14xf32> to vector<14x1xf32>
    %137 = tpu.reciprocal %136 {approx = true} : vector<14x1xf32> -> vector<14x1xf32>
    %138 = vector.broadcast %137 : vector<14x1xf32> to vector<14x14xf32>
    %139 = arith.mulf %134, %138 : vector<14x14xf32>
    %140 = arith.truncf %139 : vector<14x14xf32> to vector<14x14xbf16>
    %cst_52 = arith.constant dense<0.000000e+00> : vector<14x4xf32>
    %141 = tpu.matmul %140, %125, %cst_52 {dimension_numbers = #tpu.dot_dimension_numbers<[1], [0], [0], [1], [0, 0, 1, 1], [], []>} : vector<14x14xbf16>, vector<14x4xbf16>, vector<14x4xf32> -> vector<14x4xf32>
    %142 = vector.extract_strided_slice %74 {offsets = [0, 12], sizes = [14, 4], strides = [1, 1]} : vector<14x48xf32> to vector<14x4xf32>
    %143 = arith.truncf %142 : vector<14x4xf32> to vector<14x4xbf16>
    %144 = vector.extract_strided_slice %74 {offsets = [0, 28], sizes = [14, 4], strides = [1, 1]} : vector<14x48xf32> to vector<14x4xf32>
    %145 = arith.truncf %144 : vector<14x4xf32> to vector<14x4xbf16>
    %146 = vector.extract_strided_slice %74 {offsets = [0, 44], sizes = [14, 4], strides = [1, 1]} : vector<14x48xf32> to vector<14x4xf32>
    %147 = arith.truncf %146 : vector<14x4xf32> to vector<14x4xbf16>
    %cst_53 = arith.constant dense<0.000000e+00> : vector<14x14xf32>
    %148 = tpu.matmul %143, %145, %cst_53 {dimension_numbers = #tpu.dot_dimension_numbers<[1], [1], [0], [0], [0, 0, 1, 0], [], []>} : vector<14x4xbf16>, vector<14x4xbf16>, vector<14x14xf32> -> vector<14x14xf32>
    %cst_54 = arith.constant 5.000000e-01 : f32
    %149 = vector.broadcast %cst_54 : f32 to vector<14x14xf32>
    %150 = arith.mulf %148, %149 : vector<14x14xf32>
    %151 = arith.addf %150, %75 : vector<14x14xf32>
    %cst_55 = arith.constant dense<0xFF800000> : vector<14xf32>
    %152 = vector.multi_reduction <maximumf>, %151, %cst_55 [1] : vector<14x14xf32> to vector<14xf32>
    %153 = vector.shape_cast %152 : vector<14xf32> to vector<14x1xf32>
    %154 = vector.broadcast %153 : vector<14x1xf32> to vector<14x14xf32>
    %155 = arith.subf %151, %154 : vector<14x14xf32>
    %156 = math.exp %155 : vector<14x14xf32>
    %cst_56 = arith.constant dense<0.000000e+00> : vector<14xf32>
    %157 = vector.multi_reduction <add>, %156, %cst_56 [1] : vector<14x14xf32> to vector<14xf32>
    %158 = vector.shape_cast %157 : vector<14xf32> to vector<14x1xf32>
    %159 = tpu.reciprocal %158 {approx = true} : vector<14x1xf32> -> vector<14x1xf32>
    %160 = vector.broadcast %159 : vector<14x1xf32> to vector<14x14xf32>
    %161 = arith.mulf %156, %160 : vector<14x14xf32>
    %162 = arith.truncf %161 : vector<14x14xf32> to vector<14x14xbf16>
    %cst_57 = arith.constant dense<0.000000e+00> : vector<14x4xf32>
    %163 = tpu.matmul %162, %147, %cst_57 {dimension_numbers = #tpu.dot_dimension_numbers<[1], [0], [0], [1], [0, 0, 1, 1], [], []>} : vector<14x14xbf16>, vector<14x4xbf16>, vector<14x4xf32> -> vector<14x4xf32>
    %164 = tpu.concatenate %97, %119, %141, %163 in 1 : vector<14x4xf32>, vector<14x4xf32>, vector<14x4xf32>, vector<14x4xf32> -> vector<14x16xf32>
    %165 = arith.truncf %164 : vector<14x16xf32> to vector<14x16xbf16>
    %c0_58 = arith.constant 0 : index
    %c0_59 = arith.constant 0 : index
    %166 = vector.load %arg14[%c0_58, %c0_59] : memref<16x16xbf16, #tpu.memory_space<vmem>>, vector<16x16xbf16>
    %cst_60 = arith.constant dense<0.000000e+00> : vector<14x16xf32>
    %167 = tpu.matmul %165, %166, %cst_60 {dimension_numbers = #tpu.dot_dimension_numbers<[1], [0], [0], [1], [0, 0, 1, 1], [], []>} : vector<14x16xbf16>, vector<16x16xbf16>, vector<14x16xf32> -> vector<14x16xf32>
    %c0_61 = arith.constant 0 : index
    %c0_62 = arith.constant 0 : index
    %168 = vector.load %arg15[%c0_61, %c0_62] : memref<1x16xf32, #tpu.memory_space<vmem>>, vector<1x16xf32>
    %169 = vector.broadcast %168 : vector<1x16xf32> to vector<14x16xf32>
    %170 = arith.addf %167, %169 : vector<14x16xf32>
    %171 = arith.addf %170, %46 : vector<14x16xf32>
    %cst_63 = arith.constant dense<0.000000e+00> : vector<14xf32>
    %172 = vector.multi_reduction <add>, %171, %cst_63 [1] : vector<14x16xf32> to vector<14xf32>
    %173 = vector.shape_cast %172 : vector<14xf32> to vector<14x1xf32>
    %cst_64 = arith.constant 1.600000e+01 : f32
    %174 = vector.broadcast %cst_64 : f32 to vector<14x1xf32>
    %175 = arith.divf %173, %174 : vector<14x1xf32>
    %176 = vector.broadcast %175 : vector<14x1xf32> to vector<14x16xf32>
    %177 = arith.subf %171, %176 : vector<14x16xf32>
    %178 = arith.mulf %177, %177 : vector<14x16xf32>
    %cst_65 = arith.constant dense<0.000000e+00> : vector<14xf32>
    %179 = vector.multi_reduction <add>, %178, %cst_65 [1] : vector<14x16xf32> to vector<14xf32>
    %180 = vector.shape_cast %179 : vector<14xf32> to vector<14x1xf32>
    %cst_66 = arith.constant 1.600000e+01 : f32
    %181 = vector.broadcast %cst_66 : f32 to vector<14x1xf32>
    %182 = arith.divf %180, %181 : vector<14x1xf32>
    %cst_67 = arith.constant 9.99999974E-6 : f32
    %183 = vector.broadcast %cst_67 : f32 to vector<14x1xf32>
    %184 = arith.addf %182, %183 : vector<14x1xf32>
    %185 = math.rsqrt %184 : vector<14x1xf32>
    %186 = vector.broadcast %185 : vector<14x1xf32> to vector<14x16xf32>
    %187 = arith.mulf %177, %186 : vector<14x16xf32>
    %c0_68 = arith.constant 0 : index
    %c0_69 = arith.constant 0 : index
    %188 = vector.load %arg16[%c0_68, %c0_69] : memref<1x16xf32, #tpu.memory_space<vmem>>, vector<1x16xf32>
    %189 = vector.broadcast %188 : vector<1x16xf32> to vector<14x16xf32>
    %190 = arith.mulf %187, %189 : vector<14x16xf32>
    %c0_70 = arith.constant 0 : index
    %c0_71 = arith.constant 0 : index
    %191 = vector.load %arg17[%c0_70, %c0_71] : memref<1x16xf32, #tpu.memory_space<vmem>>, vector<1x16xf32>
    %192 = vector.broadcast %191 : vector<1x16xf32> to vector<14x16xf32>
    %193 = arith.addf %190, %192 : vector<14x16xf32>
    %194 = arith.truncf %193 : vector<14x16xf32> to vector<14x16xbf16>
    %c0_72 = arith.constant 0 : index
    %c0_73 = arith.constant 0 : index
    %195 = vector.load %arg18[%c0_72, %c0_73] : memref<16x32xbf16, #tpu.memory_space<vmem>>, vector<16x32xbf16>
    %cst_74 = arith.constant dense<0.000000e+00> : vector<14x32xf32>
    %196 = tpu.matmul %194, %195, %cst_74 {dimension_numbers = #tpu.dot_dimension_numbers<[1], [0], [0], [1], [0, 0, 1, 1], [], []>} : vector<14x16xbf16>, vector<16x32xbf16>, vector<14x32xf32> -> vector<14x32xf32>
    %c0_75 = arith.constant 0 : index
    %c0_76 = arith.constant 0 : index
    %197 = vector.load %arg19[%c0_75, %c0_76] : memref<1x32xf32, #tpu.memory_space<vmem>>, vector<1x32xf32>
    %198 = vector.broadcast %197 : vector<1x32xf32> to vector<14x32xf32>
    %199 = arith.addf %196, %198 : vector<14x32xf32>
    %200 = vector.extract_strided_slice %199 {offsets = [0, 0], sizes = [14, 16], strides = [1, 1]} : vector<14x32xf32> to vector<14x16xf32>
    %201 = vector.extract_strided_slice %199 {offsets = [0, 16], sizes = [14, 16], strides = [1, 1]} : vector<14x32xf32> to vector<14x16xf32>
    %202 = arith.negf %201 : vector<14x16xf32>
    %203 = math.exp %202 : vector<14x16xf32>
    %cst_77 = arith.constant 1.000000e+00 : f32
    %204 = vector.broadcast %cst_77 : f32 to vector<14x16xf32>
    %205 = arith.addf %204, %203 : vector<14x16xf32>
    %206 = arith.divf %204, %205 : vector<14x16xf32>
    %207 = arith.mulf %200, %206 : vector<14x16xf32>
    %cst_78 = arith.constant 0.000000e+00 : f32
    %208 = vector.broadcast %cst_78 : f32 to vector<1x16xf32>
    %209 = tpu.concatenate %208, %207, %208 in 0 : vector<1x16xf32>, vector<14x16xf32>, vector<1x16xf32> -> vector<16x16xf32>
    %c0_79 = arith.constant 0 : index
    %c0_80 = arith.constant 0 : index
    %210 = vector.load %arg20[%c0_79, %c0_80] : memref<3x16xf32, #tpu.memory_space<vmem>>, vector<3x16xf32>
    %c0_81 = arith.constant 0 : index
    %c0_82 = arith.constant 0 : index
    %211 = vector.load %arg29[%c0_81, %c0_82] : memref<14x3xf32, #tpu.memory_space<vmem>>, vector<14x3xf32>
    %cst_83 = arith.constant 0.000000e+00 : f32
    %212 = vector.broadcast %cst_83 : f32 to vector<14x16xf32>
    %213 = vector.extract_strided_slice %209 {offsets = [0, 0], sizes = [14, 16], strides = [1, 1]} : vector<16x16xf32> to vector<14x16xf32>
    %214 = vector.extract_strided_slice %211 {offsets = [0, 0], sizes = [14, 1], strides = [1, 1]} : vector<14x3xf32> to vector<14x1xf32>
    %215 = vector.broadcast %214 : vector<14x1xf32> to vector<14x16xf32>
    %216 = arith.mulf %213, %215 : vector<14x16xf32>
    %217 = vector.extract_strided_slice %210 {offsets = [0, 0], sizes = [1, 16], strides = [1, 1]} : vector<3x16xf32> to vector<1x16xf32>
    %218 = vector.broadcast %217 : vector<1x16xf32> to vector<14x16xf32>
    %219 = arith.mulf %216, %218 : vector<14x16xf32>
    %220 = arith.addf %212, %219 : vector<14x16xf32>
    %221 = vector.extract_strided_slice %209 {offsets = [1, 0], sizes = [14, 16], strides = [1, 1]} : vector<16x16xf32> to vector<14x16xf32>
    %222 = vector.extract_strided_slice %211 {offsets = [0, 1], sizes = [14, 1], strides = [1, 1]} : vector<14x3xf32> to vector<14x1xf32>
    %223 = vector.broadcast %222 : vector<14x1xf32> to vector<14x16xf32>
    %224 = arith.mulf %221, %223 : vector<14x16xf32>
    %225 = vector.extract_strided_slice %210 {offsets = [1, 0], sizes = [1, 16], strides = [1, 1]} : vector<3x16xf32> to vector<1x16xf32>
    %226 = vector.broadcast %225 : vector<1x16xf32> to vector<14x16xf32>
    %227 = arith.mulf %224, %226 : vector<14x16xf32>
    %228 = arith.addf %220, %227 : vector<14x16xf32>
    %229 = vector.extract_strided_slice %209 {offsets = [2, 0], sizes = [14, 16], strides = [1, 1]} : vector<16x16xf32> to vector<14x16xf32>
    %230 = vector.extract_strided_slice %211 {offsets = [0, 2], sizes = [14, 1], strides = [1, 1]} : vector<14x3xf32> to vector<14x1xf32>
    %231 = vector.broadcast %230 : vector<14x1xf32> to vector<14x16xf32>
    %232 = arith.mulf %229, %231 : vector<14x16xf32>
    %233 = vector.extract_strided_slice %210 {offsets = [2, 0], sizes = [1, 16], strides = [1, 1]} : vector<3x16xf32> to vector<1x16xf32>
    %234 = vector.broadcast %233 : vector<1x16xf32> to vector<14x16xf32>
    %235 = arith.mulf %232, %234 : vector<14x16xf32>
    %236 = arith.addf %228, %235 : vector<14x16xf32>
    %c0_84 = arith.constant 0 : index
    %c0_85 = arith.constant 0 : index
    %237 = vector.load %arg21[%c0_84, %c0_85] : memref<1x16xf32, #tpu.memory_space<vmem>>, vector<1x16xf32>
    %238 = vector.broadcast %237 : vector<1x16xf32> to vector<14x16xf32>
    %239 = arith.addf %236, %238 : vector<14x16xf32>
    %c0_86 = arith.constant 0 : index
    %c0_87 = arith.constant 0 : index
    %240 = vector.load %arg22[%c0_86, %c0_87] : memref<1x16xf32, #tpu.memory_space<vmem>>, vector<1x16xf32>
    %241 = vector.broadcast %240 : vector<1x16xf32> to vector<14x16xf32>
    %242 = arith.mulf %239, %241 : vector<14x16xf32>
    %c0_88 = arith.constant 0 : index
    %c0_89 = arith.constant 0 : index
    %243 = vector.load %arg23[%c0_88, %c0_89] : memref<1x16xf32, #tpu.memory_space<vmem>>, vector<1x16xf32>
    %244 = vector.broadcast %243 : vector<1x16xf32> to vector<14x16xf32>
    %245 = arith.addf %242, %244 : vector<14x16xf32>
    %246 = arith.negf %245 : vector<14x16xf32>
    %247 = math.exp %246 : vector<14x16xf32>
    %cst_90 = arith.constant 1.000000e+00 : f32
    %248 = vector.broadcast %cst_90 : f32 to vector<14x16xf32>
    %249 = arith.addf %248, %247 : vector<14x16xf32>
    %250 = arith.divf %248, %249 : vector<14x16xf32>
    %251 = arith.mulf %245, %250 : vector<14x16xf32>
    %252 = arith.truncf %251 : vector<14x16xf32> to vector<14x16xbf16>
    %c0_91 = arith.constant 0 : index
    %c0_92 = arith.constant 0 : index
    %253 = vector.load %arg24[%c0_91, %c0_92] : memref<16x16xbf16, #tpu.memory_space<vmem>>, vector<16x16xbf16>
    %cst_93 = arith.constant dense<0.000000e+00> : vector<14x16xf32>
    %254 = tpu.matmul %252, %253, %cst_93 {dimension_numbers = #tpu.dot_dimension_numbers<[1], [0], [0], [1], [0, 0, 1, 1], [], []>} : vector<14x16xbf16>, vector<16x16xbf16>, vector<14x16xf32> -> vector<14x16xf32>
    %c0_94 = arith.constant 0 : index
    %c0_95 = arith.constant 0 : index
    %255 = vector.load %arg25[%c0_94, %c0_95] : memref<1x16xf32, #tpu.memory_space<vmem>>, vector<1x16xf32>
    %256 = vector.broadcast %255 : vector<1x16xf32> to vector<14x16xf32>
    %257 = arith.addf %254, %256 : vector<14x16xf32>
    %258 = arith.addf %257, %171 : vector<14x16xf32>
    %259 = arith.addf %258, %171 : vector<14x16xf32>
    %cst_96 = arith.constant dense<0.000000e+00> : vector<14xf32>
    %260 = vector.multi_reduction <add>, %259, %cst_96 [1] : vector<14x16xf32> to vector<14xf32>
    %261 = vector.shape_cast %260 : vector<14xf32> to vector<14x1xf32>
    %cst_97 = arith.constant 1.600000e+01 : f32
    %262 = vector.broadcast %cst_97 : f32 to vector<14x1xf32>
    %263 = arith.divf %261, %262 : vector<14x1xf32>
    %264 = vector.broadcast %263 : vector<14x1xf32> to vector<14x16xf32>
    %265 = arith.subf %259, %264 : vector<14x16xf32>
    %266 = arith.mulf %265, %265 : vector<14x16xf32>
    %cst_98 = arith.constant dense<0.000000e+00> : vector<14xf32>
    %267 = vector.multi_reduction <add>, %266, %cst_98 [1] : vector<14x16xf32> to vector<14xf32>
    %268 = vector.shape_cast %267 : vector<14xf32> to vector<14x1xf32>
    %cst_99 = arith.constant 1.600000e+01 : f32
    %269 = vector.broadcast %cst_99 : f32 to vector<14x1xf32>
    %270 = arith.divf %268, %269 : vector<14x1xf32>
    %cst_100 = arith.constant 9.99999974E-6 : f32
    %271 = vector.broadcast %cst_100 : f32 to vector<14x1xf32>
    %272 = arith.addf %270, %271 : vector<14x1xf32>
    %273 = math.rsqrt %272 : vector<14x1xf32>
    %274 = vector.broadcast %273 : vector<14x1xf32> to vector<14x16xf32>
    %275 = arith.mulf %265, %274 : vector<14x16xf32>
    %c0_101 = arith.constant 0 : index
    %c0_102 = arith.constant 0 : index
    %276 = vector.load %arg4[%c0_101, %c0_102] : memref<1x16xf32, #tpu.memory_space<vmem>>, vector<1x16xf32>
    %277 = vector.broadcast %276 : vector<1x16xf32> to vector<14x16xf32>
    %278 = arith.mulf %275, %277 : vector<14x16xf32>
    %c0_103 = arith.constant 0 : index
    %c0_104 = arith.constant 0 : index
    %279 = vector.load %arg5[%c0_103, %c0_104] : memref<1x16xf32, #tpu.memory_space<vmem>>, vector<1x16xf32>
    %280 = vector.broadcast %279 : vector<1x16xf32> to vector<14x16xf32>
    %281 = arith.addf %278, %280 : vector<14x16xf32>
    %282 = arith.truncf %281 : vector<14x16xf32> to vector<14x16xbf16>
    %c0_105 = arith.constant 0 : index
    %c0_106 = arith.constant 0 : index
    %283 = vector.load %arg6[%c0_105, %c0_106] : memref<16x32xbf16, #tpu.memory_space<vmem>>, vector<16x32xbf16>
    %cst_107 = arith.constant dense<0.000000e+00> : vector<14x32xf32>
    %284 = tpu.matmul %282, %283, %cst_107 {dimension_numbers = #tpu.dot_dimension_numbers<[1], [0], [0], [1], [0, 0, 1, 1], [], []>} : vector<14x16xbf16>, vector<16x32xbf16>, vector<14x32xf32> -> vector<14x32xf32>
    %c0_108 = arith.constant 0 : index
    %c0_109 = arith.constant 0 : index
    %285 = vector.load %arg7[%c0_108, %c0_109] : memref<1x32xf32, #tpu.memory_space<vmem>>, vector<1x32xf32>
    %286 = vector.broadcast %285 : vector<1x32xf32> to vector<14x32xf32>
    %287 = arith.addf %284, %286 : vector<14x32xf32>
    %288 = arith.negf %287 : vector<14x32xf32>
    %289 = math.exp %288 : vector<14x32xf32>
    %cst_110 = arith.constant 1.000000e+00 : f32
    %290 = vector.broadcast %cst_110 : f32 to vector<14x32xf32>
    %291 = arith.addf %290, %289 : vector<14x32xf32>
    %292 = arith.divf %290, %291 : vector<14x32xf32>
    %293 = arith.mulf %287, %292 : vector<14x32xf32>
    %294 = arith.truncf %293 : vector<14x32xf32> to vector<14x32xbf16>
    %c0_111 = arith.constant 0 : index
    %c0_112 = arith.constant 0 : index
    %295 = vector.load %arg8[%c0_111, %c0_112] : memref<32x16xbf16, #tpu.memory_space<vmem>>, vector<32x16xbf16>
    %cst_113 = arith.constant dense<0.000000e+00> : vector<14x16xf32>
    %296 = tpu.matmul %294, %295, %cst_113 {dimension_numbers = #tpu.dot_dimension_numbers<[1], [0], [0], [1], [0, 0, 1, 1], [], []>} : vector<14x32xbf16>, vector<32x16xbf16>, vector<14x16xf32> -> vector<14x16xf32>
    %c0_114 = arith.constant 0 : index
    %c0_115 = arith.constant 0 : index
    %297 = vector.load %arg9[%c0_114, %c0_115] : memref<1x16xf32, #tpu.memory_space<vmem>>, vector<1x16xf32>
    %298 = vector.broadcast %297 : vector<1x16xf32> to vector<14x16xf32>
    %299 = arith.addf %296, %298 : vector<14x16xf32>
    %cst_116 = arith.constant 2.000000e+00 : f32
    %300 = vector.broadcast %cst_116 : f32 to vector<14x16xf32>
    %301 = arith.mulf %300, %299 : vector<14x16xf32>
    %302 = arith.addf %301, %171 : vector<14x16xf32>
    %cst_117 = arith.constant dense<0.000000e+00> : vector<14xf32>
    %303 = vector.multi_reduction <add>, %302, %cst_117 [1] : vector<14x16xf32> to vector<14xf32>
    %304 = vector.shape_cast %303 : vector<14xf32> to vector<14x1xf32>
    %cst_118 = arith.constant 1.600000e+01 : f32
    %305 = vector.broadcast %cst_118 : f32 to vector<14x1xf32>
    %306 = arith.divf %304, %305 : vector<14x1xf32>
    %307 = vector.broadcast %306 : vector<14x1xf32> to vector<14x16xf32>
    %308 = arith.subf %302, %307 : vector<14x16xf32>
    %309 = arith.mulf %308, %308 : vector<14x16xf32>
    %cst_119 = arith.constant dense<0.000000e+00> : vector<14xf32>
    %310 = vector.multi_reduction <add>, %309, %cst_119 [1] : vector<14x16xf32> to vector<14xf32>
    %311 = vector.shape_cast %310 : vector<14xf32> to vector<14x1xf32>
    %cst_120 = arith.constant 1.600000e+01 : f32
    %312 = vector.broadcast %cst_120 : f32 to vector<14x1xf32>
    %313 = arith.divf %311, %312 : vector<14x1xf32>
    %cst_121 = arith.constant 9.99999974E-6 : f32
    %314 = vector.broadcast %cst_121 : f32 to vector<14x1xf32>
    %315 = arith.addf %313, %314 : vector<14x1xf32>
    %316 = math.rsqrt %315 : vector<14x1xf32>
    %317 = vector.broadcast %316 : vector<14x1xf32> to vector<14x16xf32>
    %318 = arith.mulf %308, %317 : vector<14x16xf32>
    %c0_122 = arith.constant 0 : index
    %c0_123 = arith.constant 0 : index
    %319 = vector.load %arg26[%c0_122, %c0_123] : memref<1x16xf32, #tpu.memory_space<vmem>>, vector<1x16xf32>
    %320 = vector.broadcast %319 : vector<1x16xf32> to vector<14x16xf32>
    %321 = arith.mulf %318, %320 : vector<14x16xf32>
    %c0_124 = arith.constant 0 : index
    %c0_125 = arith.constant 0 : index
    %322 = vector.load %arg27[%c0_124, %c0_125] : memref<1x16xf32, #tpu.memory_space<vmem>>, vector<1x16xf32>
    %323 = vector.broadcast %322 : vector<1x16xf32> to vector<14x16xf32>
    %324 = arith.addf %321, %323 : vector<14x16xf32>
    %c0_126 = arith.constant 0 : index
    %c0_127 = arith.constant 0 : index
    %325 = vector.load %arg31[%c0_126, %c0_127] : memref<14x16xf32, #tpu.memory_space<vmem>>, vector<14x16xf32>
    tpu.vector_store %arg31[%c0_126, %c0_127], %324 {strides = array<i32>} : memref<14x16xf32, #tpu.memory_space<vmem>>, vector<14x16xf32>,
    %c1_i32 = arith.constant 1 : i32
    %326 = arith.cmpi eq, %arg0, %c1_i32 : i32
    %327 = arith.extui %326 : i1 to i32
    %c0_i32_128 = arith.constant 0 : i32
    %328 = arith.cmpi ne, %327, %c0_i32_128 : i32
    scf.if %328 {
      %c0_129 = arith.constant 0 : index
      %c0_130 = arith.constant 0 : index
      %329 = vector.load %arg30[%c0_129, %c0_130] : memref<14x16xf32, #tpu.memory_space<vmem>>, vector<14x16xf32>
      tpu.vector_store %arg30[%c0_129, %c0_130], %324 {strides = array<i32>} : memref<14x16xf32, #tpu.memory_space<vmem>>, vector<14x16xf32>,
    } else {
    }
    return
  }
  func.func @transform_0(%arg0: i32) -> (i32, i32) {
    %c0_i32 = arith.constant 0 : i32
    %c0_i32_0 = arith.constant 0 : i32
    %c0_i32_1 = arith.constant 0 : i32
    return %c0_i32, %c0_i32_0 : i32, i32
  }
  func.func @transform_1(%arg0: i32) -> (i32, i32) {
    %c0_i32 = arith.constant 0 : i32
    %c0_i32_0 = arith.constant 0 : i32
    %c0_i32_1 = arith.constant 0 : i32
    return %c0_i32, %c0_i32_0 : i32, i32
  }
  func.func @transform_2(%arg0: i32) -> (i32, i32) {
    %c0_i32 = arith.constant 0 : i32
    %c0_i32_0 = arith.constant 0 : i32
    %c0_i32_1 = arith.constant 0 : i32
    return %c0_i32, %c0_i32_0 : i32, i32
  }
  func.func @transform_3(%arg0: i32) -> (i32, i32) {
    %c0_i32 = arith.constant 0 : i32
    %c0_i32_0 = arith.constant 0 : i32
    %c0_i32_1 = arith.constant 0 : i32
    return %c0_i32, %c0_i32_0 : i32, i32
  }
  func.func @transform_4(%arg0: i32) -> (i32, i32) {
    %c0_i32 = arith.constant 0 : i32
    %c0_i32_0 = arith.constant 0 : i32
    %c0_i32_1 = arith.constant 0 : i32
    return %c0_i32, %c0_i32_0 : i32, i32
  }
  func.func @transform_5(%arg0: i32) -> (i32, i32) {
    %c0_i32 = arith.constant 0 : i32
    %c0_i32_0 = arith.constant 0 : i32
    %c0_i32_1 = arith.constant 0 : i32
    return %c0_i32, %c0_i32_0 : i32, i32
  }
  func.func @transform_6(%arg0: i32) -> (i32, i32) {
    %c0_i32 = arith.constant 0 : i32
    %c0_i32_0 = arith.constant 0 : i32
    %c0_i32_1 = arith.constant 0 : i32
    return %c0_i32, %c0_i32_0 : i32, i32
  }
  func.func @transform_7(%arg0: i32) -> (i32, i32) {
    %c0_i32 = arith.constant 0 : i32
    %c0_i32_0 = arith.constant 0 : i32
    %c0_i32_1 = arith.constant 0 : i32
    return %c0_i32, %c0_i32_0 : i32, i32
  }
  func.func @transform_8(%arg0: i32) -> (i32, i32) {
    %c0_i32 = arith.constant 0 : i32
    %c0_i32_0 = arith.constant 0 : i32
    %c0_i32_1 = arith.constant 0 : i32
    return %c0_i32, %c0_i32_0 : i32, i32
  }
  func.func @transform_9(%arg0: i32) -> (i32, i32) {
    %c0_i32 = arith.constant 0 : i32
    %c0_i32_0 = arith.constant 0 : i32
    %c0_i32_1 = arith.constant 0 : i32
    return %c0_i32, %c0_i32_0 : i32, i32
  }
  func.func @transform_10(%arg0: i32) -> (i32, i32) {
    %c0_i32 = arith.constant 0 : i32
    %c0_i32_0 = arith.constant 0 : i32
    %c0_i32_1 = arith.constant 0 : i32
    return %c0_i32, %c0_i32_0 : i32, i32
  }
  func.func @transform_11(%arg0: i32) -> (i32, i32) {
    %c0_i32 = arith.constant 0 : i32
    %c0_i32_0 = arith.constant 0 : i32
    %c0_i32_1 = arith.constant 0 : i32
    return %c0_i32, %c0_i32_0 : i32, i32
  }
  func.func @transform_12(%arg0: i32) -> (i32, i32) {
    %c0_i32 = arith.constant 0 : i32
    %c0_i32_0 = arith.constant 0 : i32
    %c0_i32_1 = arith.constant 0 : i32
    return %c0_i32, %c0_i32_0 : i32, i32
  }
  func.func @transform_13(%arg0: i32) -> (i32, i32) {
    %c0_i32 = arith.constant 0 : i32
    %c0_i32_0 = arith.constant 0 : i32
    %c0_i32_1 = arith.constant 0 : i32
    return %c0_i32, %c0_i32_0 : i32, i32
  }
  func.func @transform_14(%arg0: i32) -> (i32, i32) {
    %c0_i32 = arith.constant 0 : i32
    %c0_i32_0 = arith.constant 0 : i32
    %c0_i32_1 = arith.constant 0 : i32
    return %c0_i32, %c0_i32_0 : i32, i32
  }
  func.func @transform_15(%arg0: i32) -> (i32, i32) {
    %c0_i32 = arith.constant 0 : i32
    %c0_i32_0 = arith.constant 0 : i32
    %c0_i32_1 = arith.constant 0 : i32
    return %c0_i32, %c0_i32_0 : i32, i32
  }
  func.func @transform_16(%arg0: i32) -> (i32, i32) {
    %c0_i32 = arith.constant 0 : i32
    %c0_i32_0 = arith.constant 0 : i32
    %c0_i32_1 = arith.constant 0 : i32
    return %c0_i32, %c0_i32_0 : i32, i32
  }
  func.func @transform_17(%arg0: i32) -> (i32, i32) {
    %c0_i32 = arith.constant 0 : i32
    %c0_i32_0 = arith.constant 0 : i32
    %c0_i32_1 = arith.constant 0 : i32
    return %c0_i32, %c0_i32_0 : i32, i32
  }
  func.func @transform_18(%arg0: i32) -> (i32, i32) {
    %c0_i32 = arith.constant 0 : i32
    %c0_i32_0 = arith.constant 0 : i32
    %c0_i32_1 = arith.constant 0 : i32
    return %c0_i32, %c0_i32_0 : i32, i32
  }
  func.func @transform_19(%arg0: i32) -> (i32, i32) {
    %c0_i32 = arith.constant 0 : i32
    %c0_i32_0 = arith.constant 0 : i32
    %c0_i32_1 = arith.constant 0 : i32
    return %c0_i32, %c0_i32_0 : i32, i32
  }
  func.func @transform_20(%arg0: i32) -> (i32, i32) {
    %c0_i32 = arith.constant 0 : i32
    %c0_i32_0 = arith.constant 0 : i32
    %c0_i32_1 = arith.constant 0 : i32
    return %c0_i32, %c0_i32_0 : i32, i32
  }
  func.func @transform_21(%arg0: i32) -> (i32, i32) {
    %c0_i32 = arith.constant 0 : i32
    %c0_i32_0 = arith.constant 0 : i32
    %c0_i32_1 = arith.constant 0 : i32
    return %c0_i32, %c0_i32_0 : i32, i32
  }
  func.func @transform_22(%arg0: i32) -> (i32, i32) {
    %c0_i32 = arith.constant 0 : i32
    %c0_i32_0 = arith.constant 0 : i32
    %c0_i32_1 = arith.constant 0 : i32
    return %c0_i32, %c0_i32_0 : i32, i32
  }
  func.func @transform_23(%arg0: i32) -> (i32, i32) {
    %c0_i32 = arith.constant 0 : i32
    %c0_i32_0 = arith.constant 0 : i32
    %c0_i32_1 = arith.constant 0 : i32
    return %c0_i32, %c0_i32_0 : i32, i32
  }
  func.func @transform_24(%arg0: i32) -> (i32, i32) {
    %c0_i32 = arith.constant 0 : i32
    %c0_i32_0 = arith.constant 0 : i32
    %c0_i32_1 = arith.constant 0 : i32
    return %c0_i32, %c0_i32_0 : i32, i32
  }
  func.func @transform_25(%arg0: i32) -> (i32, i32) {
    %c0_i32 = arith.constant 0 : i32
    %c0_i32_0 = arith.constant 0 : i32
    %c0_i32_1 = arith.constant 0 : i32
    return %c0_i32, %c0_i32_0 : i32, i32
  }
  func.func @transform_26(%arg0: i32) -> (i32, i32) {
    %c0_i32 = arith.constant 0 : i32
    %c0_i32_0 = arith.constant 0 : i32
    %c0_i32_1 = arith.constant 0 : i32
    return %c0_i32, %c0_i32_0 : i32, i32
  }
  func.func @transform_27(%arg0: i32) -> (i32, i32) {
    %c0_i32 = arith.constant 0 : i32
    %c0_i32_0 = arith.constant 0 : i32
    %c0_i32_1 = arith.constant 0 : i32
    return %c0_i32, %c0_i32_0 : i32, i32
  }
  func.func @transform_28(%arg0: i32) -> (i32, i32) {
    %c0_i32 = arith.constant 0 : i32
    %c0_i32_0 = arith.constant 0 : i32
    %c0_i32_1 = arith.constant 0 : i32
    return %c0_i32, %c0_i32_0 : i32, i32
  }
  func.func @transform_29(%arg0: i32) -> (i32, i32) {
    %c0_i32 = arith.constant 0 : i32
    %c0_i32_0 = arith.constant 0 : i32
    %c0_i32_1 = arith.constant 0 : i32
    return %c0_i32, %c0_i32_0 : i32, i32
  }
}

module attributes {stable_mosaic.version = 11 : i64} {
  func.func @_lstm_logsm_kernel(%arg0: i32, %arg1: memref<56x16xf32, #tpu.memory_space<vmem>>, %arg2: memref<16x40xbf16, #tpu.memory_space<vmem>>, %arg3: memref<10x40xbf16, #tpu.memory_space<vmem>>, %arg4: memref<1x40xf32, #tpu.memory_space<vmem>>, %arg5: memref<10x40xbf16, #tpu.memory_space<vmem>>, %arg6: memref<10x40xbf16, #tpu.memory_space<vmem>>, %arg7: memref<1x40xf32, #tpu.memory_space<vmem>>, %arg8: memref<10x40xbf16, #tpu.memory_space<vmem>>, %arg9: memref<10x40xbf16, #tpu.memory_space<vmem>>, %arg10: memref<1x40xf32, #tpu.memory_space<vmem>>, %arg11: memref<56x10xf32, #tpu.memory_space<vmem>>) attributes {dimension_semantics = [#tpu.dimension_semantics<arbitrary>], iteration_bounds = array<i64: 1>, scalar_prefetch = 0 : i64, scratch_operands = 0 : i64, tpu.core_type = #tpu.core_type<tc>, window_params = [{pipeline_mode = #tpu.pipeline_mode<synchronous>, transform_indices = @transform_0, window_bounds = array<i64: 56, 16>}, {pipeline_mode = #tpu.pipeline_mode<synchronous>, transform_indices = @transform_1, window_bounds = array<i64: 16, 40>}, {pipeline_mode = #tpu.pipeline_mode<synchronous>, transform_indices = @transform_2, window_bounds = array<i64: 10, 40>}, {pipeline_mode = #tpu.pipeline_mode<synchronous>, transform_indices = @transform_3, window_bounds = array<i64: 1, 40>}, {pipeline_mode = #tpu.pipeline_mode<synchronous>, transform_indices = @transform_4, window_bounds = array<i64: 10, 40>}, {pipeline_mode = #tpu.pipeline_mode<synchronous>, transform_indices = @transform_5, window_bounds = array<i64: 10, 40>}, {pipeline_mode = #tpu.pipeline_mode<synchronous>, transform_indices = @transform_6, window_bounds = array<i64: 1, 40>}, {pipeline_mode = #tpu.pipeline_mode<synchronous>, transform_indices = @transform_7, window_bounds = array<i64: 10, 40>}, {pipeline_mode = #tpu.pipeline_mode<synchronous>, transform_indices = @transform_8, window_bounds = array<i64: 10, 40>}, {pipeline_mode = #tpu.pipeline_mode<synchronous>, transform_indices = @transform_9, window_bounds = array<i64: 1, 40>}, {pipeline_mode = #tpu.pipeline_mode<synchronous>, transform_indices = @transform_10, window_bounds = array<i64: 56, 10>}]} {
    %c0 = arith.constant 0 : index
    %c0_0 = arith.constant 0 : index
    %0 = vector.load %arg1[%c0, %c0_0] : memref<56x16xf32, #tpu.memory_space<vmem>>, vector<56x16xf32>
    %1 = arith.truncf %0 : vector<56x16xf32> to vector<56x16xbf16>
    %c0_1 = arith.constant 0 : index
    %c0_2 = arith.constant 0 : index
    %2 = vector.load %arg2[%c0_1, %c0_2] : memref<16x40xbf16, #tpu.memory_space<vmem>>, vector<16x40xbf16>
    %cst = arith.constant dense<0.000000e+00> : vector<56x40xf32>
    %3 = tpu.matmul %1, %2, %cst {dimension_numbers = #tpu.dot_dimension_numbers<[1], [0], [0], [1], [0, 0, 1, 1], [], []>} : vector<56x16xbf16>, vector<16x40xbf16>, vector<56x40xf32> -> vector<56x40xf32>
    %c0_3 = arith.constant 0 : index
    %c0_4 = arith.constant 0 : index
    %4 = vector.load %arg4[%c0_3, %c0_4] : memref<1x40xf32, #tpu.memory_space<vmem>>, vector<1x40xf32>
    %5 = vector.broadcast %4 : vector<1x40xf32> to vector<56x40xf32>
    %6 = arith.addf %3, %5 : vector<56x40xf32>
    %c0_5 = arith.constant 0 : index
    %c0_6 = arith.constant 0 : index
    %7 = vector.load %arg3[%c0_5, %c0_6] : memref<10x40xbf16, #tpu.memory_space<vmem>>, vector<10x40xbf16>
    %cst_7 = arith.constant 0.000000e+00 : f32
    %8 = vector.broadcast %cst_7 : f32 to vector<8x10xf32>
    %cst_8 = arith.constant 0.000000e+00 : f32
    %9 = vector.broadcast %cst_8 : f32 to vector<8x10xf32>
    %10 = vector.extract_strided_slice %6 {offsets = [0, 0], sizes = [8, 40], strides = [1, 1]} : vector<56x40xf32> to vector<8x40xf32>
    %11 = arith.truncf %8 : vector<8x10xf32> to vector<8x10xbf16>
    %cst_9 = arith.constant dense<0.000000e+00> : vector<8x40xf32>
    %12 = tpu.matmul %11, %7, %cst_9 {dimension_numbers = #tpu.dot_dimension_numbers<[1], [0], [0], [1], [0, 0, 1, 1], [], []>} : vector<8x10xbf16>, vector<10x40xbf16>, vector<8x40xf32> -> vector<8x40xf32>
    %13 = arith.addf %10, %12 : vector<8x40xf32>
    %14 = vector.extract_strided_slice %13 {offsets = [0, 0], sizes = [8, 10], strides = [1, 1]} : vector<8x40xf32> to vector<8x10xf32>
    %15 = arith.negf %14 : vector<8x10xf32>
    %16 = math.exp %15 : vector<8x10xf32>
    %cst_10 = arith.constant 1.000000e+00 : f32
    %17 = vector.broadcast %cst_10 : f32 to vector<8x10xf32>
    %18 = arith.addf %17, %16 : vector<8x10xf32>
    %19 = arith.divf %17, %18 : vector<8x10xf32>
    %20 = vector.extract_strided_slice %13 {offsets = [0, 10], sizes = [8, 10], strides = [1, 1]} : vector<8x40xf32> to vector<8x10xf32>
    %21 = arith.negf %20 : vector<8x10xf32>
    %22 = math.exp %21 : vector<8x10xf32>
    %cst_11 = arith.constant 1.000000e+00 : f32
    %23 = vector.broadcast %cst_11 : f32 to vector<8x10xf32>
    %24 = arith.addf %23, %22 : vector<8x10xf32>
    %25 = arith.divf %23, %24 : vector<8x10xf32>
    %26 = vector.extract_strided_slice %13 {offsets = [0, 20], sizes = [8, 10], strides = [1, 1]} : vector<8x40xf32> to vector<8x10xf32>
    %27 = math.tanh %26 : vector<8x10xf32>
    %28 = vector.extract_strided_slice %13 {offsets = [0, 30], sizes = [8, 10], strides = [1, 1]} : vector<8x40xf32> to vector<8x10xf32>
    %29 = arith.negf %28 : vector<8x10xf32>
    %30 = math.exp %29 : vector<8x10xf32>
    %cst_12 = arith.constant 1.000000e+00 : f32
    %31 = vector.broadcast %cst_12 : f32 to vector<8x10xf32>
    %32 = arith.addf %31, %30 : vector<8x10xf32>
    %33 = arith.divf %31, %32 : vector<8x10xf32>
    %34 = arith.mulf %25, %9 : vector<8x10xf32>
    %35 = arith.mulf %19, %27 : vector<8x10xf32>
    %36 = arith.addf %34, %35 : vector<8x10xf32>
    %37 = math.tanh %36 : vector<8x10xf32>
    %38 = arith.mulf %33, %37 : vector<8x10xf32>
    %39 = vector.extract_strided_slice %6 {offsets = [8, 0], sizes = [8, 40], strides = [1, 1]} : vector<56x40xf32> to vector<8x40xf32>
    %40 = arith.truncf %38 : vector<8x10xf32> to vector<8x10xbf16>
    %cst_13 = arith.constant dense<0.000000e+00> : vector<8x40xf32>
    %41 = tpu.matmul %40, %7, %cst_13 {dimension_numbers = #tpu.dot_dimension_numbers<[1], [0], [0], [1], [0, 0, 1, 1], [], []>} : vector<8x10xbf16>, vector<10x40xbf16>, vector<8x40xf32> -> vector<8x40xf32>
    %42 = arith.addf %39, %41 : vector<8x40xf32>
    %43 = vector.extract_strided_slice %42 {offsets = [0, 0], sizes = [8, 10], strides = [1, 1]} : vector<8x40xf32> to vector<8x10xf32>
    %44 = arith.negf %43 : vector<8x10xf32>
    %45 = math.exp %44 : vector<8x10xf32>
    %cst_14 = arith.constant 1.000000e+00 : f32
    %46 = vector.broadcast %cst_14 : f32 to vector<8x10xf32>
    %47 = arith.addf %46, %45 : vector<8x10xf32>
    %48 = arith.divf %46, %47 : vector<8x10xf32>
    %49 = vector.extract_strided_slice %42 {offsets = [0, 10], sizes = [8, 10], strides = [1, 1]} : vector<8x40xf32> to vector<8x10xf32>
    %50 = arith.negf %49 : vector<8x10xf32>
    %51 = math.exp %50 : vector<8x10xf32>
    %cst_15 = arith.constant 1.000000e+00 : f32
    %52 = vector.broadcast %cst_15 : f32 to vector<8x10xf32>
    %53 = arith.addf %52, %51 : vector<8x10xf32>
    %54 = arith.divf %52, %53 : vector<8x10xf32>
    %55 = vector.extract_strided_slice %42 {offsets = [0, 20], sizes = [8, 10], strides = [1, 1]} : vector<8x40xf32> to vector<8x10xf32>
    %56 = math.tanh %55 : vector<8x10xf32>
    %57 = vector.extract_strided_slice %42 {offsets = [0, 30], sizes = [8, 10], strides = [1, 1]} : vector<8x40xf32> to vector<8x10xf32>
    %58 = arith.negf %57 : vector<8x10xf32>
    %59 = math.exp %58 : vector<8x10xf32>
    %cst_16 = arith.constant 1.000000e+00 : f32
    %60 = vector.broadcast %cst_16 : f32 to vector<8x10xf32>
    %61 = arith.addf %60, %59 : vector<8x10xf32>
    %62 = arith.divf %60, %61 : vector<8x10xf32>
    %63 = arith.mulf %54, %36 : vector<8x10xf32>
    %64 = arith.mulf %48, %56 : vector<8x10xf32>
    %65 = arith.addf %63, %64 : vector<8x10xf32>
    %66 = math.tanh %65 : vector<8x10xf32>
    %67 = arith.mulf %62, %66 : vector<8x10xf32>
    %68 = vector.extract_strided_slice %6 {offsets = [16, 0], sizes = [8, 40], strides = [1, 1]} : vector<56x40xf32> to vector<8x40xf32>
    %69 = arith.truncf %67 : vector<8x10xf32> to vector<8x10xbf16>
    %cst_17 = arith.constant dense<0.000000e+00> : vector<8x40xf32>
    %70 = tpu.matmul %69, %7, %cst_17 {dimension_numbers = #tpu.dot_dimension_numbers<[1], [0], [0], [1], [0, 0, 1, 1], [], []>} : vector<8x10xbf16>, vector<10x40xbf16>, vector<8x40xf32> -> vector<8x40xf32>
    %71 = arith.addf %68, %70 : vector<8x40xf32>
    %72 = vector.extract_strided_slice %71 {offsets = [0, 0], sizes = [8, 10], strides = [1, 1]} : vector<8x40xf32> to vector<8x10xf32>
    %73 = arith.negf %72 : vector<8x10xf32>
    %74 = math.exp %73 : vector<8x10xf32>
    %cst_18 = arith.constant 1.000000e+00 : f32
    %75 = vector.broadcast %cst_18 : f32 to vector<8x10xf32>
    %76 = arith.addf %75, %74 : vector<8x10xf32>
    %77 = arith.divf %75, %76 : vector<8x10xf32>
    %78 = vector.extract_strided_slice %71 {offsets = [0, 10], sizes = [8, 10], strides = [1, 1]} : vector<8x40xf32> to vector<8x10xf32>
    %79 = arith.negf %78 : vector<8x10xf32>
    %80 = math.exp %79 : vector<8x10xf32>
    %cst_19 = arith.constant 1.000000e+00 : f32
    %81 = vector.broadcast %cst_19 : f32 to vector<8x10xf32>
    %82 = arith.addf %81, %80 : vector<8x10xf32>
    %83 = arith.divf %81, %82 : vector<8x10xf32>
    %84 = vector.extract_strided_slice %71 {offsets = [0, 20], sizes = [8, 10], strides = [1, 1]} : vector<8x40xf32> to vector<8x10xf32>
    %85 = math.tanh %84 : vector<8x10xf32>
    %86 = vector.extract_strided_slice %71 {offsets = [0, 30], sizes = [8, 10], strides = [1, 1]} : vector<8x40xf32> to vector<8x10xf32>
    %87 = arith.negf %86 : vector<8x10xf32>
    %88 = math.exp %87 : vector<8x10xf32>
    %cst_20 = arith.constant 1.000000e+00 : f32
    %89 = vector.broadcast %cst_20 : f32 to vector<8x10xf32>
    %90 = arith.addf %89, %88 : vector<8x10xf32>
    %91 = arith.divf %89, %90 : vector<8x10xf32>
    %92 = arith.mulf %83, %65 : vector<8x10xf32>
    %93 = arith.mulf %77, %85 : vector<8x10xf32>
    %94 = arith.addf %92, %93 : vector<8x10xf32>
    %95 = math.tanh %94 : vector<8x10xf32>
    %96 = arith.mulf %91, %95 : vector<8x10xf32>
    %97 = vector.extract_strided_slice %6 {offsets = [24, 0], sizes = [8, 40], strides = [1, 1]} : vector<56x40xf32> to vector<8x40xf32>
    %98 = arith.truncf %96 : vector<8x10xf32> to vector<8x10xbf16>
    %cst_21 = arith.constant dense<0.000000e+00> : vector<8x40xf32>
    %99 = tpu.matmul %98, %7, %cst_21 {dimension_numbers = #tpu.dot_dimension_numbers<[1], [0], [0], [1], [0, 0, 1, 1], [], []>} : vector<8x10xbf16>, vector<10x40xbf16>, vector<8x40xf32> -> vector<8x40xf32>
    %100 = arith.addf %97, %99 : vector<8x40xf32>
    %101 = vector.extract_strided_slice %100 {offsets = [0, 0], sizes = [8, 10], strides = [1, 1]} : vector<8x40xf32> to vector<8x10xf32>
    %102 = arith.negf %101 : vector<8x10xf32>
    %103 = math.exp %102 : vector<8x10xf32>
    %cst_22 = arith.constant 1.000000e+00 : f32
    %104 = vector.broadcast %cst_22 : f32 to vector<8x10xf32>
    %105 = arith.addf %104, %103 : vector<8x10xf32>
    %106 = arith.divf %104, %105 : vector<8x10xf32>
    %107 = vector.extract_strided_slice %100 {offsets = [0, 10], sizes = [8, 10], strides = [1, 1]} : vector<8x40xf32> to vector<8x10xf32>
    %108 = arith.negf %107 : vector<8x10xf32>
    %109 = math.exp %108 : vector<8x10xf32>
    %cst_23 = arith.constant 1.000000e+00 : f32
    %110 = vector.broadcast %cst_23 : f32 to vector<8x10xf32>
    %111 = arith.addf %110, %109 : vector<8x10xf32>
    %112 = arith.divf %110, %111 : vector<8x10xf32>
    %113 = vector.extract_strided_slice %100 {offsets = [0, 20], sizes = [8, 10], strides = [1, 1]} : vector<8x40xf32> to vector<8x10xf32>
    %114 = math.tanh %113 : vector<8x10xf32>
    %115 = vector.extract_strided_slice %100 {offsets = [0, 30], sizes = [8, 10], strides = [1, 1]} : vector<8x40xf32> to vector<8x10xf32>
    %116 = arith.negf %115 : vector<8x10xf32>
    %117 = math.exp %116 : vector<8x10xf32>
    %cst_24 = arith.constant 1.000000e+00 : f32
    %118 = vector.broadcast %cst_24 : f32 to vector<8x10xf32>
    %119 = arith.addf %118, %117 : vector<8x10xf32>
    %120 = arith.divf %118, %119 : vector<8x10xf32>
    %121 = arith.mulf %112, %94 : vector<8x10xf32>
    %122 = arith.mulf %106, %114 : vector<8x10xf32>
    %123 = arith.addf %121, %122 : vector<8x10xf32>
    %124 = math.tanh %123 : vector<8x10xf32>
    %125 = arith.mulf %120, %124 : vector<8x10xf32>
    %126 = vector.extract_strided_slice %6 {offsets = [32, 0], sizes = [8, 40], strides = [1, 1]} : vector<56x40xf32> to vector<8x40xf32>
    %127 = arith.truncf %125 : vector<8x10xf32> to vector<8x10xbf16>
    %cst_25 = arith.constant dense<0.000000e+00> : vector<8x40xf32>
    %128 = tpu.matmul %127, %7, %cst_25 {dimension_numbers = #tpu.dot_dimension_numbers<[1], [0], [0], [1], [0, 0, 1, 1], [], []>} : vector<8x10xbf16>, vector<10x40xbf16>, vector<8x40xf32> -> vector<8x40xf32>
    %129 = arith.addf %126, %128 : vector<8x40xf32>
    %130 = vector.extract_strided_slice %129 {offsets = [0, 0], sizes = [8, 10], strides = [1, 1]} : vector<8x40xf32> to vector<8x10xf32>
    %131 = arith.negf %130 : vector<8x10xf32>
    %132 = math.exp %131 : vector<8x10xf32>
    %cst_26 = arith.constant 1.000000e+00 : f32
    %133 = vector.broadcast %cst_26 : f32 to vector<8x10xf32>
    %134 = arith.addf %133, %132 : vector<8x10xf32>
    %135 = arith.divf %133, %134 : vector<8x10xf32>
    %136 = vector.extract_strided_slice %129 {offsets = [0, 10], sizes = [8, 10], strides = [1, 1]} : vector<8x40xf32> to vector<8x10xf32>
    %137 = arith.negf %136 : vector<8x10xf32>
    %138 = math.exp %137 : vector<8x10xf32>
    %cst_27 = arith.constant 1.000000e+00 : f32
    %139 = vector.broadcast %cst_27 : f32 to vector<8x10xf32>
    %140 = arith.addf %139, %138 : vector<8x10xf32>
    %141 = arith.divf %139, %140 : vector<8x10xf32>
    %142 = vector.extract_strided_slice %129 {offsets = [0, 20], sizes = [8, 10], strides = [1, 1]} : vector<8x40xf32> to vector<8x10xf32>
    %143 = math.tanh %142 : vector<8x10xf32>
    %144 = vector.extract_strided_slice %129 {offsets = [0, 30], sizes = [8, 10], strides = [1, 1]} : vector<8x40xf32> to vector<8x10xf32>
    %145 = arith.negf %144 : vector<8x10xf32>
    %146 = math.exp %145 : vector<8x10xf32>
    %cst_28 = arith.constant 1.000000e+00 : f32
    %147 = vector.broadcast %cst_28 : f32 to vector<8x10xf32>
    %148 = arith.addf %147, %146 : vector<8x10xf32>
    %149 = arith.divf %147, %148 : vector<8x10xf32>
    %150 = arith.mulf %141, %123 : vector<8x10xf32>
    %151 = arith.mulf %135, %143 : vector<8x10xf32>
    %152 = arith.addf %150, %151 : vector<8x10xf32>
    %153 = math.tanh %152 : vector<8x10xf32>
    %154 = arith.mulf %149, %153 : vector<8x10xf32>
    %155 = vector.extract_strided_slice %6 {offsets = [40, 0], sizes = [8, 40], strides = [1, 1]} : vector<56x40xf32> to vector<8x40xf32>
    %156 = arith.truncf %154 : vector<8x10xf32> to vector<8x10xbf16>
    %cst_29 = arith.constant dense<0.000000e+00> : vector<8x40xf32>
    %157 = tpu.matmul %156, %7, %cst_29 {dimension_numbers = #tpu.dot_dimension_numbers<[1], [0], [0], [1], [0, 0, 1, 1], [], []>} : vector<8x10xbf16>, vector<10x40xbf16>, vector<8x40xf32> -> vector<8x40xf32>
    %158 = arith.addf %155, %157 : vector<8x40xf32>
    %159 = vector.extract_strided_slice %158 {offsets = [0, 0], sizes = [8, 10], strides = [1, 1]} : vector<8x40xf32> to vector<8x10xf32>
    %160 = arith.negf %159 : vector<8x10xf32>
    %161 = math.exp %160 : vector<8x10xf32>
    %cst_30 = arith.constant 1.000000e+00 : f32
    %162 = vector.broadcast %cst_30 : f32 to vector<8x10xf32>
    %163 = arith.addf %162, %161 : vector<8x10xf32>
    %164 = arith.divf %162, %163 : vector<8x10xf32>
    %165 = vector.extract_strided_slice %158 {offsets = [0, 10], sizes = [8, 10], strides = [1, 1]} : vector<8x40xf32> to vector<8x10xf32>
    %166 = arith.negf %165 : vector<8x10xf32>
    %167 = math.exp %166 : vector<8x10xf32>
    %cst_31 = arith.constant 1.000000e+00 : f32
    %168 = vector.broadcast %cst_31 : f32 to vector<8x10xf32>
    %169 = arith.addf %168, %167 : vector<8x10xf32>
    %170 = arith.divf %168, %169 : vector<8x10xf32>
    %171 = vector.extract_strided_slice %158 {offsets = [0, 20], sizes = [8, 10], strides = [1, 1]} : vector<8x40xf32> to vector<8x10xf32>
    %172 = math.tanh %171 : vector<8x10xf32>
    %173 = vector.extract_strided_slice %158 {offsets = [0, 30], sizes = [8, 10], strides = [1, 1]} : vector<8x40xf32> to vector<8x10xf32>
    %174 = arith.negf %173 : vector<8x10xf32>
    %175 = math.exp %174 : vector<8x10xf32>
    %cst_32 = arith.constant 1.000000e+00 : f32
    %176 = vector.broadcast %cst_32 : f32 to vector<8x10xf32>
    %177 = arith.addf %176, %175 : vector<8x10xf32>
    %178 = arith.divf %176, %177 : vector<8x10xf32>
    %179 = arith.mulf %170, %152 : vector<8x10xf32>
    %180 = arith.mulf %164, %172 : vector<8x10xf32>
    %181 = arith.addf %179, %180 : vector<8x10xf32>
    %182 = math.tanh %181 : vector<8x10xf32>
    %183 = arith.mulf %178, %182 : vector<8x10xf32>
    %184 = vector.extract_strided_slice %6 {offsets = [48, 0], sizes = [8, 40], strides = [1, 1]} : vector<56x40xf32> to vector<8x40xf32>
    %185 = arith.truncf %183 : vector<8x10xf32> to vector<8x10xbf16>
    %cst_33 = arith.constant dense<0.000000e+00> : vector<8x40xf32>
    %186 = tpu.matmul %185, %7, %cst_33 {dimension_numbers = #tpu.dot_dimension_numbers<[1], [0], [0], [1], [0, 0, 1, 1], [], []>} : vector<8x10xbf16>, vector<10x40xbf16>, vector<8x40xf32> -> vector<8x40xf32>
    %187 = arith.addf %184, %186 : vector<8x40xf32>
    %188 = vector.extract_strided_slice %187 {offsets = [0, 0], sizes = [8, 10], strides = [1, 1]} : vector<8x40xf32> to vector<8x10xf32>
    %189 = arith.negf %188 : vector<8x10xf32>
    %190 = math.exp %189 : vector<8x10xf32>
    %cst_34 = arith.constant 1.000000e+00 : f32
    %191 = vector.broadcast %cst_34 : f32 to vector<8x10xf32>
    %192 = arith.addf %191, %190 : vector<8x10xf32>
    %193 = arith.divf %191, %192 : vector<8x10xf32>
    %194 = vector.extract_strided_slice %187 {offsets = [0, 10], sizes = [8, 10], strides = [1, 1]} : vector<8x40xf32> to vector<8x10xf32>
    %195 = arith.negf %194 : vector<8x10xf32>
    %196 = math.exp %195 : vector<8x10xf32>
    %cst_35 = arith.constant 1.000000e+00 : f32
    %197 = vector.broadcast %cst_35 : f32 to vector<8x10xf32>
    %198 = arith.addf %197, %196 : vector<8x10xf32>
    %199 = arith.divf %197, %198 : vector<8x10xf32>
    %200 = vector.extract_strided_slice %187 {offsets = [0, 20], sizes = [8, 10], strides = [1, 1]} : vector<8x40xf32> to vector<8x10xf32>
    %201 = math.tanh %200 : vector<8x10xf32>
    %202 = vector.extract_strided_slice %187 {offsets = [0, 30], sizes = [8, 10], strides = [1, 1]} : vector<8x40xf32> to vector<8x10xf32>
    %203 = arith.negf %202 : vector<8x10xf32>
    %204 = math.exp %203 : vector<8x10xf32>
    %cst_36 = arith.constant 1.000000e+00 : f32
    %205 = vector.broadcast %cst_36 : f32 to vector<8x10xf32>
    %206 = arith.addf %205, %204 : vector<8x10xf32>
    %207 = arith.divf %205, %206 : vector<8x10xf32>
    %208 = arith.mulf %199, %181 : vector<8x10xf32>
    %209 = arith.mulf %193, %201 : vector<8x10xf32>
    %210 = arith.addf %208, %209 : vector<8x10xf32>
    %211 = math.tanh %210 : vector<8x10xf32>
    %212 = arith.mulf %207, %211 : vector<8x10xf32>
    %213 = tpu.concatenate %38, %67, %96, %125, %154, %183, %212 in 0 : vector<8x10xf32>, vector<8x10xf32>, vector<8x10xf32>, vector<8x10xf32>, vector<8x10xf32>, vector<8x10xf32>, vector<8x10xf32> -> vector<56x10xf32>
    %214 = arith.truncf %213 : vector<56x10xf32> to vector<56x10xbf16>
    %c0_37 = arith.constant 0 : index
    %c0_38 = arith.constant 0 : index
    %215 = vector.load %arg5[%c0_37, %c0_38] : memref<10x40xbf16, #tpu.memory_space<vmem>>, vector<10x40xbf16>
    %cst_39 = arith.constant dense<0.000000e+00> : vector<56x40xf32>
    %216 = tpu.matmul %214, %215, %cst_39 {dimension_numbers = #tpu.dot_dimension_numbers<[1], [0], [0], [1], [0, 0, 1, 1], [], []>} : vector<56x10xbf16>, vector<10x40xbf16>, vector<56x40xf32> -> vector<56x40xf32>
    %c0_40 = arith.constant 0 : index
    %c0_41 = arith.constant 0 : index
    %217 = vector.load %arg7[%c0_40, %c0_41] : memref<1x40xf32, #tpu.memory_space<vmem>>, vector<1x40xf32>
    %218 = vector.broadcast %217 : vector<1x40xf32> to vector<56x40xf32>
    %219 = arith.addf %216, %218 : vector<56x40xf32>
    %c0_42 = arith.constant 0 : index
    %c0_43 = arith.constant 0 : index
    %220 = vector.load %arg6[%c0_42, %c0_43] : memref<10x40xbf16, #tpu.memory_space<vmem>>, vector<10x40xbf16>
    %cst_44 = arith.constant 0.000000e+00 : f32
    %221 = vector.broadcast %cst_44 : f32 to vector<8x10xf32>
    %cst_45 = arith.constant 0.000000e+00 : f32
    %222 = vector.broadcast %cst_45 : f32 to vector<8x10xf32>
    %223 = vector.extract_strided_slice %219 {offsets = [0, 0], sizes = [8, 40], strides = [1, 1]} : vector<56x40xf32> to vector<8x40xf32>
    %224 = arith.truncf %221 : vector<8x10xf32> to vector<8x10xbf16>
    %cst_46 = arith.constant dense<0.000000e+00> : vector<8x40xf32>
    %225 = tpu.matmul %224, %220, %cst_46 {dimension_numbers = #tpu.dot_dimension_numbers<[1], [0], [0], [1], [0, 0, 1, 1], [], []>} : vector<8x10xbf16>, vector<10x40xbf16>, vector<8x40xf32> -> vector<8x40xf32>
    %226 = arith.addf %223, %225 : vector<8x40xf32>
    %227 = vector.extract_strided_slice %226 {offsets = [0, 0], sizes = [8, 10], strides = [1, 1]} : vector<8x40xf32> to vector<8x10xf32>
    %228 = arith.negf %227 : vector<8x10xf32>
    %229 = math.exp %228 : vector<8x10xf32>
    %cst_47 = arith.constant 1.000000e+00 : f32
    %230 = vector.broadcast %cst_47 : f32 to vector<8x10xf32>
    %231 = arith.addf %230, %229 : vector<8x10xf32>
    %232 = arith.divf %230, %231 : vector<8x10xf32>
    %233 = vector.extract_strided_slice %226 {offsets = [0, 10], sizes = [8, 10], strides = [1, 1]} : vector<8x40xf32> to vector<8x10xf32>
    %234 = arith.negf %233 : vector<8x10xf32>
    %235 = math.exp %234 : vector<8x10xf32>
    %cst_48 = arith.constant 1.000000e+00 : f32
    %236 = vector.broadcast %cst_48 : f32 to vector<8x10xf32>
    %237 = arith.addf %236, %235 : vector<8x10xf32>
    %238 = arith.divf %236, %237 : vector<8x10xf32>
    %239 = vector.extract_strided_slice %226 {offsets = [0, 20], sizes = [8, 10], strides = [1, 1]} : vector<8x40xf32> to vector<8x10xf32>
    %240 = math.tanh %239 : vector<8x10xf32>
    %241 = vector.extract_strided_slice %226 {offsets = [0, 30], sizes = [8, 10], strides = [1, 1]} : vector<8x40xf32> to vector<8x10xf32>
    %242 = arith.negf %241 : vector<8x10xf32>
    %243 = math.exp %242 : vector<8x10xf32>
    %cst_49 = arith.constant 1.000000e+00 : f32
    %244 = vector.broadcast %cst_49 : f32 to vector<8x10xf32>
    %245 = arith.addf %244, %243 : vector<8x10xf32>
    %246 = arith.divf %244, %245 : vector<8x10xf32>
    %247 = arith.mulf %238, %222 : vector<8x10xf32>
    %248 = arith.mulf %232, %240 : vector<8x10xf32>
    %249 = arith.addf %247, %248 : vector<8x10xf32>
    %250 = math.tanh %249 : vector<8x10xf32>
    %251 = arith.mulf %246, %250 : vector<8x10xf32>
    %252 = vector.extract_strided_slice %219 {offsets = [8, 0], sizes = [8, 40], strides = [1, 1]} : vector<56x40xf32> to vector<8x40xf32>
    %253 = arith.truncf %251 : vector<8x10xf32> to vector<8x10xbf16>
    %cst_50 = arith.constant dense<0.000000e+00> : vector<8x40xf32>
    %254 = tpu.matmul %253, %220, %cst_50 {dimension_numbers = #tpu.dot_dimension_numbers<[1], [0], [0], [1], [0, 0, 1, 1], [], []>} : vector<8x10xbf16>, vector<10x40xbf16>, vector<8x40xf32> -> vector<8x40xf32>
    %255 = arith.addf %252, %254 : vector<8x40xf32>
    %256 = vector.extract_strided_slice %255 {offsets = [0, 0], sizes = [8, 10], strides = [1, 1]} : vector<8x40xf32> to vector<8x10xf32>
    %257 = arith.negf %256 : vector<8x10xf32>
    %258 = math.exp %257 : vector<8x10xf32>
    %cst_51 = arith.constant 1.000000e+00 : f32
    %259 = vector.broadcast %cst_51 : f32 to vector<8x10xf32>
    %260 = arith.addf %259, %258 : vector<8x10xf32>
    %261 = arith.divf %259, %260 : vector<8x10xf32>
    %262 = vector.extract_strided_slice %255 {offsets = [0, 10], sizes = [8, 10], strides = [1, 1]} : vector<8x40xf32> to vector<8x10xf32>
    %263 = arith.negf %262 : vector<8x10xf32>
    %264 = math.exp %263 : vector<8x10xf32>
    %cst_52 = arith.constant 1.000000e+00 : f32
    %265 = vector.broadcast %cst_52 : f32 to vector<8x10xf32>
    %266 = arith.addf %265, %264 : vector<8x10xf32>
    %267 = arith.divf %265, %266 : vector<8x10xf32>
    %268 = vector.extract_strided_slice %255 {offsets = [0, 20], sizes = [8, 10], strides = [1, 1]} : vector<8x40xf32> to vector<8x10xf32>
    %269 = math.tanh %268 : vector<8x10xf32>
    %270 = vector.extract_strided_slice %255 {offsets = [0, 30], sizes = [8, 10], strides = [1, 1]} : vector<8x40xf32> to vector<8x10xf32>
    %271 = arith.negf %270 : vector<8x10xf32>
    %272 = math.exp %271 : vector<8x10xf32>
    %cst_53 = arith.constant 1.000000e+00 : f32
    %273 = vector.broadcast %cst_53 : f32 to vector<8x10xf32>
    %274 = arith.addf %273, %272 : vector<8x10xf32>
    %275 = arith.divf %273, %274 : vector<8x10xf32>
    %276 = arith.mulf %267, %249 : vector<8x10xf32>
    %277 = arith.mulf %261, %269 : vector<8x10xf32>
    %278 = arith.addf %276, %277 : vector<8x10xf32>
    %279 = math.tanh %278 : vector<8x10xf32>
    %280 = arith.mulf %275, %279 : vector<8x10xf32>
    %281 = vector.extract_strided_slice %219 {offsets = [16, 0], sizes = [8, 40], strides = [1, 1]} : vector<56x40xf32> to vector<8x40xf32>
    %282 = arith.truncf %280 : vector<8x10xf32> to vector<8x10xbf16>
    %cst_54 = arith.constant dense<0.000000e+00> : vector<8x40xf32>
    %283 = tpu.matmul %282, %220, %cst_54 {dimension_numbers = #tpu.dot_dimension_numbers<[1], [0], [0], [1], [0, 0, 1, 1], [], []>} : vector<8x10xbf16>, vector<10x40xbf16>, vector<8x40xf32> -> vector<8x40xf32>
    %284 = arith.addf %281, %283 : vector<8x40xf32>
    %285 = vector.extract_strided_slice %284 {offsets = [0, 0], sizes = [8, 10], strides = [1, 1]} : vector<8x40xf32> to vector<8x10xf32>
    %286 = arith.negf %285 : vector<8x10xf32>
    %287 = math.exp %286 : vector<8x10xf32>
    %cst_55 = arith.constant 1.000000e+00 : f32
    %288 = vector.broadcast %cst_55 : f32 to vector<8x10xf32>
    %289 = arith.addf %288, %287 : vector<8x10xf32>
    %290 = arith.divf %288, %289 : vector<8x10xf32>
    %291 = vector.extract_strided_slice %284 {offsets = [0, 10], sizes = [8, 10], strides = [1, 1]} : vector<8x40xf32> to vector<8x10xf32>
    %292 = arith.negf %291 : vector<8x10xf32>
    %293 = math.exp %292 : vector<8x10xf32>
    %cst_56 = arith.constant 1.000000e+00 : f32
    %294 = vector.broadcast %cst_56 : f32 to vector<8x10xf32>
    %295 = arith.addf %294, %293 : vector<8x10xf32>
    %296 = arith.divf %294, %295 : vector<8x10xf32>
    %297 = vector.extract_strided_slice %284 {offsets = [0, 20], sizes = [8, 10], strides = [1, 1]} : vector<8x40xf32> to vector<8x10xf32>
    %298 = math.tanh %297 : vector<8x10xf32>
    %299 = vector.extract_strided_slice %284 {offsets = [0, 30], sizes = [8, 10], strides = [1, 1]} : vector<8x40xf32> to vector<8x10xf32>
    %300 = arith.negf %299 : vector<8x10xf32>
    %301 = math.exp %300 : vector<8x10xf32>
    %cst_57 = arith.constant 1.000000e+00 : f32
    %302 = vector.broadcast %cst_57 : f32 to vector<8x10xf32>
    %303 = arith.addf %302, %301 : vector<8x10xf32>
    %304 = arith.divf %302, %303 : vector<8x10xf32>
    %305 = arith.mulf %296, %278 : vector<8x10xf32>
    %306 = arith.mulf %290, %298 : vector<8x10xf32>
    %307 = arith.addf %305, %306 : vector<8x10xf32>
    %308 = math.tanh %307 : vector<8x10xf32>
    %309 = arith.mulf %304, %308 : vector<8x10xf32>
    %310 = vector.extract_strided_slice %219 {offsets = [24, 0], sizes = [8, 40], strides = [1, 1]} : vector<56x40xf32> to vector<8x40xf32>
    %311 = arith.truncf %309 : vector<8x10xf32> to vector<8x10xbf16>
    %cst_58 = arith.constant dense<0.000000e+00> : vector<8x40xf32>
    %312 = tpu.matmul %311, %220, %cst_58 {dimension_numbers = #tpu.dot_dimension_numbers<[1], [0], [0], [1], [0, 0, 1, 1], [], []>} : vector<8x10xbf16>, vector<10x40xbf16>, vector<8x40xf32> -> vector<8x40xf32>
    %313 = arith.addf %310, %312 : vector<8x40xf32>
    %314 = vector.extract_strided_slice %313 {offsets = [0, 0], sizes = [8, 10], strides = [1, 1]} : vector<8x40xf32> to vector<8x10xf32>
    %315 = arith.negf %314 : vector<8x10xf32>
    %316 = math.exp %315 : vector<8x10xf32>
    %cst_59 = arith.constant 1.000000e+00 : f32
    %317 = vector.broadcast %cst_59 : f32 to vector<8x10xf32>
    %318 = arith.addf %317, %316 : vector<8x10xf32>
    %319 = arith.divf %317, %318 : vector<8x10xf32>
    %320 = vector.extract_strided_slice %313 {offsets = [0, 10], sizes = [8, 10], strides = [1, 1]} : vector<8x40xf32> to vector<8x10xf32>
    %321 = arith.negf %320 : vector<8x10xf32>
    %322 = math.exp %321 : vector<8x10xf32>
    %cst_60 = arith.constant 1.000000e+00 : f32
    %323 = vector.broadcast %cst_60 : f32 to vector<8x10xf32>
    %324 = arith.addf %323, %322 : vector<8x10xf32>
    %325 = arith.divf %323, %324 : vector<8x10xf32>
    %326 = vector.extract_strided_slice %313 {offsets = [0, 20], sizes = [8, 10], strides = [1, 1]} : vector<8x40xf32> to vector<8x10xf32>
    %327 = math.tanh %326 : vector<8x10xf32>
    %328 = vector.extract_strided_slice %313 {offsets = [0, 30], sizes = [8, 10], strides = [1, 1]} : vector<8x40xf32> to vector<8x10xf32>
    %329 = arith.negf %328 : vector<8x10xf32>
    %330 = math.exp %329 : vector<8x10xf32>
    %cst_61 = arith.constant 1.000000e+00 : f32
    %331 = vector.broadcast %cst_61 : f32 to vector<8x10xf32>
    %332 = arith.addf %331, %330 : vector<8x10xf32>
    %333 = arith.divf %331, %332 : vector<8x10xf32>
    %334 = arith.mulf %325, %307 : vector<8x10xf32>
    %335 = arith.mulf %319, %327 : vector<8x10xf32>
    %336 = arith.addf %334, %335 : vector<8x10xf32>
    %337 = math.tanh %336 : vector<8x10xf32>
    %338 = arith.mulf %333, %337 : vector<8x10xf32>
    %339 = vector.extract_strided_slice %219 {offsets = [32, 0], sizes = [8, 40], strides = [1, 1]} : vector<56x40xf32> to vector<8x40xf32>
    %340 = arith.truncf %338 : vector<8x10xf32> to vector<8x10xbf16>
    %cst_62 = arith.constant dense<0.000000e+00> : vector<8x40xf32>
    %341 = tpu.matmul %340, %220, %cst_62 {dimension_numbers = #tpu.dot_dimension_numbers<[1], [0], [0], [1], [0, 0, 1, 1], [], []>} : vector<8x10xbf16>, vector<10x40xbf16>, vector<8x40xf32> -> vector<8x40xf32>
    %342 = arith.addf %339, %341 : vector<8x40xf32>
    %343 = vector.extract_strided_slice %342 {offsets = [0, 0], sizes = [8, 10], strides = [1, 1]} : vector<8x40xf32> to vector<8x10xf32>
    %344 = arith.negf %343 : vector<8x10xf32>
    %345 = math.exp %344 : vector<8x10xf32>
    %cst_63 = arith.constant 1.000000e+00 : f32
    %346 = vector.broadcast %cst_63 : f32 to vector<8x10xf32>
    %347 = arith.addf %346, %345 : vector<8x10xf32>
    %348 = arith.divf %346, %347 : vector<8x10xf32>
    %349 = vector.extract_strided_slice %342 {offsets = [0, 10], sizes = [8, 10], strides = [1, 1]} : vector<8x40xf32> to vector<8x10xf32>
    %350 = arith.negf %349 : vector<8x10xf32>
    %351 = math.exp %350 : vector<8x10xf32>
    %cst_64 = arith.constant 1.000000e+00 : f32
    %352 = vector.broadcast %cst_64 : f32 to vector<8x10xf32>
    %353 = arith.addf %352, %351 : vector<8x10xf32>
    %354 = arith.divf %352, %353 : vector<8x10xf32>
    %355 = vector.extract_strided_slice %342 {offsets = [0, 20], sizes = [8, 10], strides = [1, 1]} : vector<8x40xf32> to vector<8x10xf32>
    %356 = math.tanh %355 : vector<8x10xf32>
    %357 = vector.extract_strided_slice %342 {offsets = [0, 30], sizes = [8, 10], strides = [1, 1]} : vector<8x40xf32> to vector<8x10xf32>
    %358 = arith.negf %357 : vector<8x10xf32>
    %359 = math.exp %358 : vector<8x10xf32>
    %cst_65 = arith.constant 1.000000e+00 : f32
    %360 = vector.broadcast %cst_65 : f32 to vector<8x10xf32>
    %361 = arith.addf %360, %359 : vector<8x10xf32>
    %362 = arith.divf %360, %361 : vector<8x10xf32>
    %363 = arith.mulf %354, %336 : vector<8x10xf32>
    %364 = arith.mulf %348, %356 : vector<8x10xf32>
    %365 = arith.addf %363, %364 : vector<8x10xf32>
    %366 = math.tanh %365 : vector<8x10xf32>
    %367 = arith.mulf %362, %366 : vector<8x10xf32>
    %368 = vector.extract_strided_slice %219 {offsets = [40, 0], sizes = [8, 40], strides = [1, 1]} : vector<56x40xf32> to vector<8x40xf32>
    %369 = arith.truncf %367 : vector<8x10xf32> to vector<8x10xbf16>
    %cst_66 = arith.constant dense<0.000000e+00> : vector<8x40xf32>
    %370 = tpu.matmul %369, %220, %cst_66 {dimension_numbers = #tpu.dot_dimension_numbers<[1], [0], [0], [1], [0, 0, 1, 1], [], []>} : vector<8x10xbf16>, vector<10x40xbf16>, vector<8x40xf32> -> vector<8x40xf32>
    %371 = arith.addf %368, %370 : vector<8x40xf32>
    %372 = vector.extract_strided_slice %371 {offsets = [0, 0], sizes = [8, 10], strides = [1, 1]} : vector<8x40xf32> to vector<8x10xf32>
    %373 = arith.negf %372 : vector<8x10xf32>
    %374 = math.exp %373 : vector<8x10xf32>
    %cst_67 = arith.constant 1.000000e+00 : f32
    %375 = vector.broadcast %cst_67 : f32 to vector<8x10xf32>
    %376 = arith.addf %375, %374 : vector<8x10xf32>
    %377 = arith.divf %375, %376 : vector<8x10xf32>
    %378 = vector.extract_strided_slice %371 {offsets = [0, 10], sizes = [8, 10], strides = [1, 1]} : vector<8x40xf32> to vector<8x10xf32>
    %379 = arith.negf %378 : vector<8x10xf32>
    %380 = math.exp %379 : vector<8x10xf32>
    %cst_68 = arith.constant 1.000000e+00 : f32
    %381 = vector.broadcast %cst_68 : f32 to vector<8x10xf32>
    %382 = arith.addf %381, %380 : vector<8x10xf32>
    %383 = arith.divf %381, %382 : vector<8x10xf32>
    %384 = vector.extract_strided_slice %371 {offsets = [0, 20], sizes = [8, 10], strides = [1, 1]} : vector<8x40xf32> to vector<8x10xf32>
    %385 = math.tanh %384 : vector<8x10xf32>
    %386 = vector.extract_strided_slice %371 {offsets = [0, 30], sizes = [8, 10], strides = [1, 1]} : vector<8x40xf32> to vector<8x10xf32>
    %387 = arith.negf %386 : vector<8x10xf32>
    %388 = math.exp %387 : vector<8x10xf32>
    %cst_69 = arith.constant 1.000000e+00 : f32
    %389 = vector.broadcast %cst_69 : f32 to vector<8x10xf32>
    %390 = arith.addf %389, %388 : vector<8x10xf32>
    %391 = arith.divf %389, %390 : vector<8x10xf32>
    %392 = arith.mulf %383, %365 : vector<8x10xf32>
    %393 = arith.mulf %377, %385 : vector<8x10xf32>
    %394 = arith.addf %392, %393 : vector<8x10xf32>
    %395 = math.tanh %394 : vector<8x10xf32>
    %396 = arith.mulf %391, %395 : vector<8x10xf32>
    %397 = vector.extract_strided_slice %219 {offsets = [48, 0], sizes = [8, 40], strides = [1, 1]} : vector<56x40xf32> to vector<8x40xf32>
    %398 = arith.truncf %396 : vector<8x10xf32> to vector<8x10xbf16>
    %cst_70 = arith.constant dense<0.000000e+00> : vector<8x40xf32>
    %399 = tpu.matmul %398, %220, %cst_70 {dimension_numbers = #tpu.dot_dimension_numbers<[1], [0], [0], [1], [0, 0, 1, 1], [], []>} : vector<8x10xbf16>, vector<10x40xbf16>, vector<8x40xf32> -> vector<8x40xf32>
    %400 = arith.addf %397, %399 : vector<8x40xf32>
    %401 = vector.extract_strided_slice %400 {offsets = [0, 0], sizes = [8, 10], strides = [1, 1]} : vector<8x40xf32> to vector<8x10xf32>
    %402 = arith.negf %401 : vector<8x10xf32>
    %403 = math.exp %402 : vector<8x10xf32>
    %cst_71 = arith.constant 1.000000e+00 : f32
    %404 = vector.broadcast %cst_71 : f32 to vector<8x10xf32>
    %405 = arith.addf %404, %403 : vector<8x10xf32>
    %406 = arith.divf %404, %405 : vector<8x10xf32>
    %407 = vector.extract_strided_slice %400 {offsets = [0, 10], sizes = [8, 10], strides = [1, 1]} : vector<8x40xf32> to vector<8x10xf32>
    %408 = arith.negf %407 : vector<8x10xf32>
    %409 = math.exp %408 : vector<8x10xf32>
    %cst_72 = arith.constant 1.000000e+00 : f32
    %410 = vector.broadcast %cst_72 : f32 to vector<8x10xf32>
    %411 = arith.addf %410, %409 : vector<8x10xf32>
    %412 = arith.divf %410, %411 : vector<8x10xf32>
    %413 = vector.extract_strided_slice %400 {offsets = [0, 20], sizes = [8, 10], strides = [1, 1]} : vector<8x40xf32> to vector<8x10xf32>
    %414 = math.tanh %413 : vector<8x10xf32>
    %415 = vector.extract_strided_slice %400 {offsets = [0, 30], sizes = [8, 10], strides = [1, 1]} : vector<8x40xf32> to vector<8x10xf32>
    %416 = arith.negf %415 : vector<8x10xf32>
    %417 = math.exp %416 : vector<8x10xf32>
    %cst_73 = arith.constant 1.000000e+00 : f32
    %418 = vector.broadcast %cst_73 : f32 to vector<8x10xf32>
    %419 = arith.addf %418, %417 : vector<8x10xf32>
    %420 = arith.divf %418, %419 : vector<8x10xf32>
    %421 = arith.mulf %412, %394 : vector<8x10xf32>
    %422 = arith.mulf %406, %414 : vector<8x10xf32>
    %423 = arith.addf %421, %422 : vector<8x10xf32>
    %424 = math.tanh %423 : vector<8x10xf32>
    %425 = arith.mulf %420, %424 : vector<8x10xf32>
    %426 = tpu.concatenate %251, %280, %309, %338, %367, %396, %425 in 0 : vector<8x10xf32>, vector<8x10xf32>, vector<8x10xf32>, vector<8x10xf32>, vector<8x10xf32>, vector<8x10xf32>, vector<8x10xf32> -> vector<56x10xf32>
    %427 = arith.truncf %426 : vector<56x10xf32> to vector<56x10xbf16>
    %c0_74 = arith.constant 0 : index
    %c0_75 = arith.constant 0 : index
    %428 = vector.load %arg8[%c0_74, %c0_75] : memref<10x40xbf16, #tpu.memory_space<vmem>>, vector<10x40xbf16>
    %cst_76 = arith.constant dense<0.000000e+00> : vector<56x40xf32>
    %429 = tpu.matmul %427, %428, %cst_76 {dimension_numbers = #tpu.dot_dimension_numbers<[1], [0], [0], [1], [0, 0, 1, 1], [], []>} : vector<56x10xbf16>, vector<10x40xbf16>, vector<56x40xf32> -> vector<56x40xf32>
    %c0_77 = arith.constant 0 : index
    %c0_78 = arith.constant 0 : index
    %430 = vector.load %arg10[%c0_77, %c0_78] : memref<1x40xf32, #tpu.memory_space<vmem>>, vector<1x40xf32>
    %431 = vector.broadcast %430 : vector<1x40xf32> to vector<56x40xf32>
    %432 = arith.addf %429, %431 : vector<56x40xf32>
    %c0_79 = arith.constant 0 : index
    %c0_80 = arith.constant 0 : index
    %433 = vector.load %arg9[%c0_79, %c0_80] : memref<10x40xbf16, #tpu.memory_space<vmem>>, vector<10x40xbf16>
    %cst_81 = arith.constant 0.000000e+00 : f32
    %434 = vector.broadcast %cst_81 : f32 to vector<8x10xf32>
    %cst_82 = arith.constant 0.000000e+00 : f32
    %435 = vector.broadcast %cst_82 : f32 to vector<8x10xf32>
    %436 = vector.extract_strided_slice %432 {offsets = [0, 0], sizes = [8, 40], strides = [1, 1]} : vector<56x40xf32> to vector<8x40xf32>
    %437 = arith.truncf %434 : vector<8x10xf32> to vector<8x10xbf16>
    %cst_83 = arith.constant dense<0.000000e+00> : vector<8x40xf32>
    %438 = tpu.matmul %437, %433, %cst_83 {dimension_numbers = #tpu.dot_dimension_numbers<[1], [0], [0], [1], [0, 0, 1, 1], [], []>} : vector<8x10xbf16>, vector<10x40xbf16>, vector<8x40xf32> -> vector<8x40xf32>
    %439 = arith.addf %436, %438 : vector<8x40xf32>
    %440 = vector.extract_strided_slice %439 {offsets = [0, 0], sizes = [8, 10], strides = [1, 1]} : vector<8x40xf32> to vector<8x10xf32>
    %441 = arith.negf %440 : vector<8x10xf32>
    %442 = math.exp %441 : vector<8x10xf32>
    %cst_84 = arith.constant 1.000000e+00 : f32
    %443 = vector.broadcast %cst_84 : f32 to vector<8x10xf32>
    %444 = arith.addf %443, %442 : vector<8x10xf32>
    %445 = arith.divf %443, %444 : vector<8x10xf32>
    %446 = vector.extract_strided_slice %439 {offsets = [0, 10], sizes = [8, 10], strides = [1, 1]} : vector<8x40xf32> to vector<8x10xf32>
    %447 = arith.negf %446 : vector<8x10xf32>
    %448 = math.exp %447 : vector<8x10xf32>
    %cst_85 = arith.constant 1.000000e+00 : f32
    %449 = vector.broadcast %cst_85 : f32 to vector<8x10xf32>
    %450 = arith.addf %449, %448 : vector<8x10xf32>
    %451 = arith.divf %449, %450 : vector<8x10xf32>
    %452 = vector.extract_strided_slice %439 {offsets = [0, 20], sizes = [8, 10], strides = [1, 1]} : vector<8x40xf32> to vector<8x10xf32>
    %453 = math.tanh %452 : vector<8x10xf32>
    %454 = vector.extract_strided_slice %439 {offsets = [0, 30], sizes = [8, 10], strides = [1, 1]} : vector<8x40xf32> to vector<8x10xf32>
    %455 = arith.negf %454 : vector<8x10xf32>
    %456 = math.exp %455 : vector<8x10xf32>
    %cst_86 = arith.constant 1.000000e+00 : f32
    %457 = vector.broadcast %cst_86 : f32 to vector<8x10xf32>
    %458 = arith.addf %457, %456 : vector<8x10xf32>
    %459 = arith.divf %457, %458 : vector<8x10xf32>
    %460 = arith.mulf %451, %435 : vector<8x10xf32>
    %461 = arith.mulf %445, %453 : vector<8x10xf32>
    %462 = arith.addf %460, %461 : vector<8x10xf32>
    %463 = math.tanh %462 : vector<8x10xf32>
    %464 = arith.mulf %459, %463 : vector<8x10xf32>
    %465 = vector.extract_strided_slice %432 {offsets = [8, 0], sizes = [8, 40], strides = [1, 1]} : vector<56x40xf32> to vector<8x40xf32>
    %466 = arith.truncf %464 : vector<8x10xf32> to vector<8x10xbf16>
    %cst_87 = arith.constant dense<0.000000e+00> : vector<8x40xf32>
    %467 = tpu.matmul %466, %433, %cst_87 {dimension_numbers = #tpu.dot_dimension_numbers<[1], [0], [0], [1], [0, 0, 1, 1], [], []>} : vector<8x10xbf16>, vector<10x40xbf16>, vector<8x40xf32> -> vector<8x40xf32>
    %468 = arith.addf %465, %467 : vector<8x40xf32>
    %469 = vector.extract_strided_slice %468 {offsets = [0, 0], sizes = [8, 10], strides = [1, 1]} : vector<8x40xf32> to vector<8x10xf32>
    %470 = arith.negf %469 : vector<8x10xf32>
    %471 = math.exp %470 : vector<8x10xf32>
    %cst_88 = arith.constant 1.000000e+00 : f32
    %472 = vector.broadcast %cst_88 : f32 to vector<8x10xf32>
    %473 = arith.addf %472, %471 : vector<8x10xf32>
    %474 = arith.divf %472, %473 : vector<8x10xf32>
    %475 = vector.extract_strided_slice %468 {offsets = [0, 10], sizes = [8, 10], strides = [1, 1]} : vector<8x40xf32> to vector<8x10xf32>
    %476 = arith.negf %475 : vector<8x10xf32>
    %477 = math.exp %476 : vector<8x10xf32>
    %cst_89 = arith.constant 1.000000e+00 : f32
    %478 = vector.broadcast %cst_89 : f32 to vector<8x10xf32>
    %479 = arith.addf %478, %477 : vector<8x10xf32>
    %480 = arith.divf %478, %479 : vector<8x10xf32>
    %481 = vector.extract_strided_slice %468 {offsets = [0, 20], sizes = [8, 10], strides = [1, 1]} : vector<8x40xf32> to vector<8x10xf32>
    %482 = math.tanh %481 : vector<8x10xf32>
    %483 = vector.extract_strided_slice %468 {offsets = [0, 30], sizes = [8, 10], strides = [1, 1]} : vector<8x40xf32> to vector<8x10xf32>
    %484 = arith.negf %483 : vector<8x10xf32>
    %485 = math.exp %484 : vector<8x10xf32>
    %cst_90 = arith.constant 1.000000e+00 : f32
    %486 = vector.broadcast %cst_90 : f32 to vector<8x10xf32>
    %487 = arith.addf %486, %485 : vector<8x10xf32>
    %488 = arith.divf %486, %487 : vector<8x10xf32>
    %489 = arith.mulf %480, %462 : vector<8x10xf32>
    %490 = arith.mulf %474, %482 : vector<8x10xf32>
    %491 = arith.addf %489, %490 : vector<8x10xf32>
    %492 = math.tanh %491 : vector<8x10xf32>
    %493 = arith.mulf %488, %492 : vector<8x10xf32>
    %494 = vector.extract_strided_slice %432 {offsets = [16, 0], sizes = [8, 40], strides = [1, 1]} : vector<56x40xf32> to vector<8x40xf32>
    %495 = arith.truncf %493 : vector<8x10xf32> to vector<8x10xbf16>
    %cst_91 = arith.constant dense<0.000000e+00> : vector<8x40xf32>
    %496 = tpu.matmul %495, %433, %cst_91 {dimension_numbers = #tpu.dot_dimension_numbers<[1], [0], [0], [1], [0, 0, 1, 1], [], []>} : vector<8x10xbf16>, vector<10x40xbf16>, vector<8x40xf32> -> vector<8x40xf32>
    %497 = arith.addf %494, %496 : vector<8x40xf32>
    %498 = vector.extract_strided_slice %497 {offsets = [0, 0], sizes = [8, 10], strides = [1, 1]} : vector<8x40xf32> to vector<8x10xf32>
    %499 = arith.negf %498 : vector<8x10xf32>
    %500 = math.exp %499 : vector<8x10xf32>
    %cst_92 = arith.constant 1.000000e+00 : f32
    %501 = vector.broadcast %cst_92 : f32 to vector<8x10xf32>
    %502 = arith.addf %501, %500 : vector<8x10xf32>
    %503 = arith.divf %501, %502 : vector<8x10xf32>
    %504 = vector.extract_strided_slice %497 {offsets = [0, 10], sizes = [8, 10], strides = [1, 1]} : vector<8x40xf32> to vector<8x10xf32>
    %505 = arith.negf %504 : vector<8x10xf32>
    %506 = math.exp %505 : vector<8x10xf32>
    %cst_93 = arith.constant 1.000000e+00 : f32
    %507 = vector.broadcast %cst_93 : f32 to vector<8x10xf32>
    %508 = arith.addf %507, %506 : vector<8x10xf32>
    %509 = arith.divf %507, %508 : vector<8x10xf32>
    %510 = vector.extract_strided_slice %497 {offsets = [0, 20], sizes = [8, 10], strides = [1, 1]} : vector<8x40xf32> to vector<8x10xf32>
    %511 = math.tanh %510 : vector<8x10xf32>
    %512 = vector.extract_strided_slice %497 {offsets = [0, 30], sizes = [8, 10], strides = [1, 1]} : vector<8x40xf32> to vector<8x10xf32>
    %513 = arith.negf %512 : vector<8x10xf32>
    %514 = math.exp %513 : vector<8x10xf32>
    %cst_94 = arith.constant 1.000000e+00 : f32
    %515 = vector.broadcast %cst_94 : f32 to vector<8x10xf32>
    %516 = arith.addf %515, %514 : vector<8x10xf32>
    %517 = arith.divf %515, %516 : vector<8x10xf32>
    %518 = arith.mulf %509, %491 : vector<8x10xf32>
    %519 = arith.mulf %503, %511 : vector<8x10xf32>
    %520 = arith.addf %518, %519 : vector<8x10xf32>
    %521 = math.tanh %520 : vector<8x10xf32>
    %522 = arith.mulf %517, %521 : vector<8x10xf32>
    %523 = vector.extract_strided_slice %432 {offsets = [24, 0], sizes = [8, 40], strides = [1, 1]} : vector<56x40xf32> to vector<8x40xf32>
    %524 = arith.truncf %522 : vector<8x10xf32> to vector<8x10xbf16>
    %cst_95 = arith.constant dense<0.000000e+00> : vector<8x40xf32>
    %525 = tpu.matmul %524, %433, %cst_95 {dimension_numbers = #tpu.dot_dimension_numbers<[1], [0], [0], [1], [0, 0, 1, 1], [], []>} : vector<8x10xbf16>, vector<10x40xbf16>, vector<8x40xf32> -> vector<8x40xf32>
    %526 = arith.addf %523, %525 : vector<8x40xf32>
    %527 = vector.extract_strided_slice %526 {offsets = [0, 0], sizes = [8, 10], strides = [1, 1]} : vector<8x40xf32> to vector<8x10xf32>
    %528 = arith.negf %527 : vector<8x10xf32>
    %529 = math.exp %528 : vector<8x10xf32>
    %cst_96 = arith.constant 1.000000e+00 : f32
    %530 = vector.broadcast %cst_96 : f32 to vector<8x10xf32>
    %531 = arith.addf %530, %529 : vector<8x10xf32>
    %532 = arith.divf %530, %531 : vector<8x10xf32>
    %533 = vector.extract_strided_slice %526 {offsets = [0, 10], sizes = [8, 10], strides = [1, 1]} : vector<8x40xf32> to vector<8x10xf32>
    %534 = arith.negf %533 : vector<8x10xf32>
    %535 = math.exp %534 : vector<8x10xf32>
    %cst_97 = arith.constant 1.000000e+00 : f32
    %536 = vector.broadcast %cst_97 : f32 to vector<8x10xf32>
    %537 = arith.addf %536, %535 : vector<8x10xf32>
    %538 = arith.divf %536, %537 : vector<8x10xf32>
    %539 = vector.extract_strided_slice %526 {offsets = [0, 20], sizes = [8, 10], strides = [1, 1]} : vector<8x40xf32> to vector<8x10xf32>
    %540 = math.tanh %539 : vector<8x10xf32>
    %541 = vector.extract_strided_slice %526 {offsets = [0, 30], sizes = [8, 10], strides = [1, 1]} : vector<8x40xf32> to vector<8x10xf32>
    %542 = arith.negf %541 : vector<8x10xf32>
    %543 = math.exp %542 : vector<8x10xf32>
    %cst_98 = arith.constant 1.000000e+00 : f32
    %544 = vector.broadcast %cst_98 : f32 to vector<8x10xf32>
    %545 = arith.addf %544, %543 : vector<8x10xf32>
    %546 = arith.divf %544, %545 : vector<8x10xf32>
    %547 = arith.mulf %538, %520 : vector<8x10xf32>
    %548 = arith.mulf %532, %540 : vector<8x10xf32>
    %549 = arith.addf %547, %548 : vector<8x10xf32>
    %550 = math.tanh %549 : vector<8x10xf32>
    %551 = arith.mulf %546, %550 : vector<8x10xf32>
    %552 = vector.extract_strided_slice %432 {offsets = [32, 0], sizes = [8, 40], strides = [1, 1]} : vector<56x40xf32> to vector<8x40xf32>
    %553 = arith.truncf %551 : vector<8x10xf32> to vector<8x10xbf16>
    %cst_99 = arith.constant dense<0.000000e+00> : vector<8x40xf32>
    %554 = tpu.matmul %553, %433, %cst_99 {dimension_numbers = #tpu.dot_dimension_numbers<[1], [0], [0], [1], [0, 0, 1, 1], [], []>} : vector<8x10xbf16>, vector<10x40xbf16>, vector<8x40xf32> -> vector<8x40xf32>
    %555 = arith.addf %552, %554 : vector<8x40xf32>
    %556 = vector.extract_strided_slice %555 {offsets = [0, 0], sizes = [8, 10], strides = [1, 1]} : vector<8x40xf32> to vector<8x10xf32>
    %557 = arith.negf %556 : vector<8x10xf32>
    %558 = math.exp %557 : vector<8x10xf32>
    %cst_100 = arith.constant 1.000000e+00 : f32
    %559 = vector.broadcast %cst_100 : f32 to vector<8x10xf32>
    %560 = arith.addf %559, %558 : vector<8x10xf32>
    %561 = arith.divf %559, %560 : vector<8x10xf32>
    %562 = vector.extract_strided_slice %555 {offsets = [0, 10], sizes = [8, 10], strides = [1, 1]} : vector<8x40xf32> to vector<8x10xf32>
    %563 = arith.negf %562 : vector<8x10xf32>
    %564 = math.exp %563 : vector<8x10xf32>
    %cst_101 = arith.constant 1.000000e+00 : f32
    %565 = vector.broadcast %cst_101 : f32 to vector<8x10xf32>
    %566 = arith.addf %565, %564 : vector<8x10xf32>
    %567 = arith.divf %565, %566 : vector<8x10xf32>
    %568 = vector.extract_strided_slice %555 {offsets = [0, 20], sizes = [8, 10], strides = [1, 1]} : vector<8x40xf32> to vector<8x10xf32>
    %569 = math.tanh %568 : vector<8x10xf32>
    %570 = vector.extract_strided_slice %555 {offsets = [0, 30], sizes = [8, 10], strides = [1, 1]} : vector<8x40xf32> to vector<8x10xf32>
    %571 = arith.negf %570 : vector<8x10xf32>
    %572 = math.exp %571 : vector<8x10xf32>
    %cst_102 = arith.constant 1.000000e+00 : f32
    %573 = vector.broadcast %cst_102 : f32 to vector<8x10xf32>
    %574 = arith.addf %573, %572 : vector<8x10xf32>
    %575 = arith.divf %573, %574 : vector<8x10xf32>
    %576 = arith.mulf %567, %549 : vector<8x10xf32>
    %577 = arith.mulf %561, %569 : vector<8x10xf32>
    %578 = arith.addf %576, %577 : vector<8x10xf32>
    %579 = math.tanh %578 : vector<8x10xf32>
    %580 = arith.mulf %575, %579 : vector<8x10xf32>
    %581 = vector.extract_strided_slice %432 {offsets = [40, 0], sizes = [8, 40], strides = [1, 1]} : vector<56x40xf32> to vector<8x40xf32>
    %582 = arith.truncf %580 : vector<8x10xf32> to vector<8x10xbf16>
    %cst_103 = arith.constant dense<0.000000e+00> : vector<8x40xf32>
    %583 = tpu.matmul %582, %433, %cst_103 {dimension_numbers = #tpu.dot_dimension_numbers<[1], [0], [0], [1], [0, 0, 1, 1], [], []>} : vector<8x10xbf16>, vector<10x40xbf16>, vector<8x40xf32> -> vector<8x40xf32>
    %584 = arith.addf %581, %583 : vector<8x40xf32>
    %585 = vector.extract_strided_slice %584 {offsets = [0, 0], sizes = [8, 10], strides = [1, 1]} : vector<8x40xf32> to vector<8x10xf32>
    %586 = arith.negf %585 : vector<8x10xf32>
    %587 = math.exp %586 : vector<8x10xf32>
    %cst_104 = arith.constant 1.000000e+00 : f32
    %588 = vector.broadcast %cst_104 : f32 to vector<8x10xf32>
    %589 = arith.addf %588, %587 : vector<8x10xf32>
    %590 = arith.divf %588, %589 : vector<8x10xf32>
    %591 = vector.extract_strided_slice %584 {offsets = [0, 10], sizes = [8, 10], strides = [1, 1]} : vector<8x40xf32> to vector<8x10xf32>
    %592 = arith.negf %591 : vector<8x10xf32>
    %593 = math.exp %592 : vector<8x10xf32>
    %cst_105 = arith.constant 1.000000e+00 : f32
    %594 = vector.broadcast %cst_105 : f32 to vector<8x10xf32>
    %595 = arith.addf %594, %593 : vector<8x10xf32>
    %596 = arith.divf %594, %595 : vector<8x10xf32>
    %597 = vector.extract_strided_slice %584 {offsets = [0, 20], sizes = [8, 10], strides = [1, 1]} : vector<8x40xf32> to vector<8x10xf32>
    %598 = math.tanh %597 : vector<8x10xf32>
    %599 = vector.extract_strided_slice %584 {offsets = [0, 30], sizes = [8, 10], strides = [1, 1]} : vector<8x40xf32> to vector<8x10xf32>
    %600 = arith.negf %599 : vector<8x10xf32>
    %601 = math.exp %600 : vector<8x10xf32>
    %cst_106 = arith.constant 1.000000e+00 : f32
    %602 = vector.broadcast %cst_106 : f32 to vector<8x10xf32>
    %603 = arith.addf %602, %601 : vector<8x10xf32>
    %604 = arith.divf %602, %603 : vector<8x10xf32>
    %605 = arith.mulf %596, %578 : vector<8x10xf32>
    %606 = arith.mulf %590, %598 : vector<8x10xf32>
    %607 = arith.addf %605, %606 : vector<8x10xf32>
    %608 = math.tanh %607 : vector<8x10xf32>
    %609 = arith.mulf %604, %608 : vector<8x10xf32>
    %610 = vector.extract_strided_slice %432 {offsets = [48, 0], sizes = [8, 40], strides = [1, 1]} : vector<56x40xf32> to vector<8x40xf32>
    %611 = arith.truncf %609 : vector<8x10xf32> to vector<8x10xbf16>
    %cst_107 = arith.constant dense<0.000000e+00> : vector<8x40xf32>
    %612 = tpu.matmul %611, %433, %cst_107 {dimension_numbers = #tpu.dot_dimension_numbers<[1], [0], [0], [1], [0, 0, 1, 1], [], []>} : vector<8x10xbf16>, vector<10x40xbf16>, vector<8x40xf32> -> vector<8x40xf32>
    %613 = arith.addf %610, %612 : vector<8x40xf32>
    %614 = vector.extract_strided_slice %613 {offsets = [0, 0], sizes = [8, 10], strides = [1, 1]} : vector<8x40xf32> to vector<8x10xf32>
    %615 = arith.negf %614 : vector<8x10xf32>
    %616 = math.exp %615 : vector<8x10xf32>
    %cst_108 = arith.constant 1.000000e+00 : f32
    %617 = vector.broadcast %cst_108 : f32 to vector<8x10xf32>
    %618 = arith.addf %617, %616 : vector<8x10xf32>
    %619 = arith.divf %617, %618 : vector<8x10xf32>
    %620 = vector.extract_strided_slice %613 {offsets = [0, 10], sizes = [8, 10], strides = [1, 1]} : vector<8x40xf32> to vector<8x10xf32>
    %621 = arith.negf %620 : vector<8x10xf32>
    %622 = math.exp %621 : vector<8x10xf32>
    %cst_109 = arith.constant 1.000000e+00 : f32
    %623 = vector.broadcast %cst_109 : f32 to vector<8x10xf32>
    %624 = arith.addf %623, %622 : vector<8x10xf32>
    %625 = arith.divf %623, %624 : vector<8x10xf32>
    %626 = vector.extract_strided_slice %613 {offsets = [0, 20], sizes = [8, 10], strides = [1, 1]} : vector<8x40xf32> to vector<8x10xf32>
    %627 = math.tanh %626 : vector<8x10xf32>
    %628 = vector.extract_strided_slice %613 {offsets = [0, 30], sizes = [8, 10], strides = [1, 1]} : vector<8x40xf32> to vector<8x10xf32>
    %629 = arith.negf %628 : vector<8x10xf32>
    %630 = math.exp %629 : vector<8x10xf32>
    %cst_110 = arith.constant 1.000000e+00 : f32
    %631 = vector.broadcast %cst_110 : f32 to vector<8x10xf32>
    %632 = arith.addf %631, %630 : vector<8x10xf32>
    %633 = arith.divf %631, %632 : vector<8x10xf32>
    %634 = arith.mulf %625, %607 : vector<8x10xf32>
    %635 = arith.mulf %619, %627 : vector<8x10xf32>
    %636 = arith.addf %634, %635 : vector<8x10xf32>
    %637 = math.tanh %636 : vector<8x10xf32>
    %638 = arith.mulf %633, %637 : vector<8x10xf32>
    %639 = tpu.concatenate %464, %493, %522, %551, %580, %609, %638 in 0 : vector<8x10xf32>, vector<8x10xf32>, vector<8x10xf32>, vector<8x10xf32>, vector<8x10xf32>, vector<8x10xf32>, vector<8x10xf32> -> vector<56x10xf32>
    %cst_111 = arith.constant dense<0xFF800000> : vector<56xf32>
    %640 = vector.multi_reduction <maximumf>, %639, %cst_111 [1] : vector<56x10xf32> to vector<56xf32>
    %641 = vector.shape_cast %640 : vector<56xf32> to vector<56x1xf32>
    %642 = vector.broadcast %641 : vector<56x1xf32> to vector<56x10xf32>
    %643 = arith.subf %639, %642 : vector<56x10xf32>
    %644 = math.exp %643 : vector<56x10xf32>
    %cst_112 = arith.constant dense<0.000000e+00> : vector<56xf32>
    %645 = vector.multi_reduction <add>, %644, %cst_112 [1] : vector<56x10xf32> to vector<56xf32>
    %646 = vector.shape_cast %645 : vector<56xf32> to vector<56x1xf32>
    %647 = math.log %646 : vector<56x1xf32>
    %648 = vector.broadcast %647 : vector<56x1xf32> to vector<56x10xf32>
    %649 = arith.subf %643, %648 : vector<56x10xf32>
    %c0_113 = arith.constant 0 : index
    %c0_114 = arith.constant 0 : index
    %650 = vector.load %arg11[%c0_113, %c0_114] : memref<56x10xf32, #tpu.memory_space<vmem>>, vector<56x10xf32>
    tpu.vector_store %arg11[%c0_113, %c0_114], %649 {strides = array<i32>} : memref<56x10xf32, #tpu.memory_space<vmem>>, vector<56x10xf32>,
    return
  }
  func.func @transform_0(%arg0: i32) -> (i32, i32) {
    %c0_i32 = arith.constant 0 : i32
    %c0_i32_0 = arith.constant 0 : i32
    %c0_i32_1 = arith.constant 0 : i32
    return %c0_i32, %c0_i32_0 : i32, i32
  }
  func.func @transform_1(%arg0: i32) -> (i32, i32) {
    %c0_i32 = arith.constant 0 : i32
    %c0_i32_0 = arith.constant 0 : i32
    %c0_i32_1 = arith.constant 0 : i32
    return %c0_i32, %c0_i32_0 : i32, i32
  }
  func.func @transform_2(%arg0: i32) -> (i32, i32) {
    %c0_i32 = arith.constant 0 : i32
    %c0_i32_0 = arith.constant 0 : i32
    %c0_i32_1 = arith.constant 0 : i32
    return %c0_i32, %c0_i32_0 : i32, i32
  }
  func.func @transform_3(%arg0: i32) -> (i32, i32) {
    %c0_i32 = arith.constant 0 : i32
    %c0_i32_0 = arith.constant 0 : i32
    %c0_i32_1 = arith.constant 0 : i32
    return %c0_i32, %c0_i32_0 : i32, i32
  }
  func.func @transform_4(%arg0: i32) -> (i32, i32) {
    %c0_i32 = arith.constant 0 : i32
    %c0_i32_0 = arith.constant 0 : i32
    %c0_i32_1 = arith.constant 0 : i32
    return %c0_i32, %c0_i32_0 : i32, i32
  }
  func.func @transform_5(%arg0: i32) -> (i32, i32) {
    %c0_i32 = arith.constant 0 : i32
    %c0_i32_0 = arith.constant 0 : i32
    %c0_i32_1 = arith.constant 0 : i32
    return %c0_i32, %c0_i32_0 : i32, i32
  }
  func.func @transform_6(%arg0: i32) -> (i32, i32) {
    %c0_i32 = arith.constant 0 : i32
    %c0_i32_0 = arith.constant 0 : i32
    %c0_i32_1 = arith.constant 0 : i32
    return %c0_i32, %c0_i32_0 : i32, i32
  }
  func.func @transform_7(%arg0: i32) -> (i32, i32) {
    %c0_i32 = arith.constant 0 : i32
    %c0_i32_0 = arith.constant 0 : i32
    %c0_i32_1 = arith.constant 0 : i32
    return %c0_i32, %c0_i32_0 : i32, i32
  }
  func.func @transform_8(%arg0: i32) -> (i32, i32) {
    %c0_i32 = arith.constant 0 : i32
    %c0_i32_0 = arith.constant 0 : i32
    %c0_i32_1 = arith.constant 0 : i32
    return %c0_i32, %c0_i32_0 : i32, i32
  }
  func.func @transform_9(%arg0: i32) -> (i32, i32) {
    %c0_i32 = arith.constant 0 : i32
    %c0_i32_0 = arith.constant 0 : i32
    %c0_i32_1 = arith.constant 0 : i32
    return %c0_i32, %c0_i32_0 : i32, i32
  }
  func.func @transform_10(%arg0: i32) -> (i32, i32) {
    %c0_i32 = arith.constant 0 : i32
    %c0_i32_0 = arith.constant 0 : i32
    %c0_i32_1 = arith.constant 0 : i32
    return %c0_i32, %c0_i32_0 : i32, i32
  }
}

</mosaic_0001>

<bundles_post_ra>
// kernel: _lambda_.4
= control target key start
LH: loop header
LB: loop body
LE: loop exit
PB: predicated region body
PF: predicated region fallthrough
CT: control target
= control target key end

     0   :  { %vm167_vm0 = vcmask 1043456   ;;  %vm168_vm1 = vcmask 1044480   ;;  %vm124_vm2 = vcmask 72704   ;;  %v471_v1 = vmov 65535   ;;  %s690_s1 = inlined_call_operand.vmem [shape: bf16[9,16], index: 1, kind: input, shape index: {}]   ;;  %s691_s0 = inlined_call_operand.vmem [shape: bf16[210,9], index: 0, kind: input, shape index: {}]   ;;  %s692_s2 = inlined_call_operand.vmem [shape: f32[1,16], index: 2, kind: input, shape index: {}]   ;;  %s693_s3 = inlined_call_operand.vmem [shape: f32[210,16], index: 3, kind: output, shape index: {}]  }
   0x1   :  { %v456_v0 = vld [vmem:[%s690_s1] sm:$0x1f]   ;;  %v169_v2 = vsel %vm167_vm0, 4294967295, %v471_v1  ;;  %v458_v7 = vld [vmem:[%s691_s0 + $0x8] sm:$0xff]   ;;  %v461_v9 = vld [vmem:[%s691_s0 + $0x10] sm:$0xff]   ;;  %vm345_vm3 = vcmask 130048  }
   0x2   :  { %v457_v3 = vld [vmem:[%s691_s0] sm:$0xff]   ;;  %v170_v4 = vsel %vm168_vm1, %v169_v2, 0  ;;  %v460_v8 = vld [vmem:[%s691_s0 + $0x48] sm:$0xff]   ;;  %v463_v10 = vld [vmem:[%s691_s0 + $0x50] sm:$0xff]   ;;  %vm372_vm4 = vcmask 123904  }
   0x3   :  { %v172_v5 = vand.u32 %v456_v0, %v170_v4  ;;  %425 = vmatprep.mubr.msk.bf16.mxu0 %vm124_vm2, %v457_v3  ;;  %v459_v6 = vld [vmem:[%s691_s0 + $0x40] sm:$0xff]   ;;  %v462_v11 = vld [vmem:[%s691_s0 + $0x18] sm:$0xff]   ;;  %v466_v15 = vld [vmem:[%s691_s0 + $0x28] sm:$0xff]  }
   0x4   :  { %441 = vmatprep.mubr.msk.bf16.mxu1 %vm124_vm2, %v459_v6  ;;  %v464_v12 = vld [vmem:[%s691_s0 + $0x58] sm:$0xff]   ;;  %v465_v13 = vld [vmem:[%s691_s0 + $0x20] sm:$0xff]   ;;  %v468_v16 = vld [vmem:[%s691_s0 + $0x68] ss:$0 sps:$4 sm:$0x11]  }
   0x5   :  { %423 = vmatprep.subr.bf16.mxu0 %v172_v5  ;;  %453 = vmatprep.subr.bf16.mxu1 %v172_v5  ;;  %v467_v14 = vld [vmem:[%s691_s0 + $0x60] sm:$0xff]   ;;  %v469_v17 = vld [vmem:[%s691_s0 + $0x30] sm:$0xff]   ;;  %v470_v18 = vld [vmem:[%s691_s0 + $0x38] sm:$0xff]  }
   0x6   :  { %424 = vmatpush3.bf16.msra.mxu0 %v172_v5  ;;  %454 = vmatpush3.bf16.msra.mxu1 %v172_v5  ;;  %v554_v19 = vld [vmem:[%s692_s2] ss:$0 sm:$0xff] }
   0x9   :  { %426 = vmatmul.mubr.msk.bf16.vlgmr.msra.gmra.mrb[0].mxu0 %vm124_vm2, %v458_v7  ;;  %442 = vmatmul.mubr.msk.bf16.vlgmr.msra.gmra.mrb[0].mxu1 %vm124_vm2, %v460_v8 }
   0xa   :  { %429 = vmatprep.mubr.msk.bf16.mxu0 %vm124_vm2, %v461_v9  ;;  %445 = vmatprep.mubr.msk.bf16.mxu1 %vm124_vm2, %v463_v10 }
  0x11   :  { %430 = vmatmul.mubr.msk.bf16.gmra.mrb[4].mxu0 %vm124_vm2, %v462_v11  ;;  %446 = vmatmul.mubr.msk.bf16.gmra.mrb[4].mxu1 %vm124_vm2, %v464_v12 }
  0x12   :  { %433 = vmatprep.mubr.msk.bf16.mxu0 %vm124_vm2, %v465_v13  ;;  %449 = vmatprep.mubr.msk.bf16.mxu1 %vm124_vm2, %v467_v14 }
  0x19   :  { %434 = vmatmul.mubr.msk.bf16.gmra.mrb[8].mxu0 %vm124_vm2, %v466_v15  ;;  %450 = vmatmul.mubr.msk.bf16.gmra.mrb[8].mxu1 %vm124_vm2, %v468_v16 }
  0x1a   :  { %437 = vmatprep.mubr.msk.bf16.mxu0 %vm124_vm2, %v469_v17 }
  0x21   :  { %438 = vmatmul.mubr.msk.bf16.gmra.mrb[12].mxu0 %vm124_vm2, %v470_v18 }
  0xdc   :  { %v427_v20 = vpop.f32.mrb[0].mxu0  ;;  %v443_v21 = vpop.f32.mrb[0].mxu1 }
  0xdd   :  { %v217_v22 = vadd.f32 %v427_v20, %v554_v19  ;;  %v208_v23 = vpop.f32.mrb[1].mxu0  ;;  %v281_v24 = vadd.f32 %v443_v21, %v554_v19  ;;  %v272_v25 = vpop.f32.mrb[1].mxu1 }
  0xde   :  { %v209_v26 = vadd.f32 %v554_v19, %v208_v23  ;;  %v428_v27 = vpop.f32.mrb[2].mxu0  ;;  %v273_v28 = vadd.f32 %v554_v19, %v272_v25  ;;  %v444_v29 = vpop.f32.mrb[2].mxu1 }
  0xdf   :  { %v320_v30 = vmax.f32 %v217_v22, 0.0  ;;  %v220_v31 = vadd.f32 %v428_v27, %v554_v19  ;;  %v211_v32 = vpop.f32.mrb[3].mxu0  ;;  %v336_v33 = vmax.f32 %v281_v24, 0.0  ;;  %v284_v34 = vadd.f32 %v444_v29, %v554_v19  ;;  %v275_v35 = vpop.f32.mrb[3].mxu1 }
  0xe0   :  { %v318_v36 = vmax.f32 %v209_v26, 0.0  ;;  %v212_v37 = vadd.f32 %v554_v19, %v211_v32  ;;  %v334_v38 = vmax.f32 %v273_v28, 0.0  ;;  %v276_v39 = vadd.f32 %v554_v19, %v275_v35 }
  0xe1   :  { %348 = vst.msk [vmem:[%s693_s3 + $0x10] sm:$0xff] %vm345_vm3, %v320_v30  ;;  %v321_v40 = vmax.f32 %v220_v31, 0.0  ;;  %364 = vst.msk [vmem:[%s693_s3 + $0x90] sm:$0xff] %vm345_vm3, %v336_v33  ;;  %v337_v41 = vmax.f32 %v284_v34, 0.0 }
  0xe2   :  { %346 = vst.msk [vmem:[%s693_s3] sm:$0xff] %vm345_vm3, %v318_v36  ;;  %v319_v42 = vmax.f32 %v212_v37, 0.0  ;;  %362 = vst.msk [vmem:[%s693_s3 + $0x80] sm:$0xff] %vm345_vm3, %v334_v38  ;;  %v335_v43 = vmax.f32 %v276_v39, 0.0 }
  0xe3   :  { %349 = vst.msk [vmem:[%s693_s3 + $0x18] sm:$0xff] %vm345_vm3, %v321_v40  ;;  %365 = vst.msk [vmem:[%s693_s3 + $0x98] sm:$0xff] %vm345_vm3, %v337_v41 }
  0xe4   :  { %347 = vst.msk [vmem:[%s693_s3 + $0x8] sm:$0xff] %vm345_vm3, %v319_v42  ;;  %v431_v44 = vpop.f32.mrb[4].mxu0  ;;  %363 = vst.msk [vmem:[%s693_s3 + $0x88] sm:$0xff] %vm345_vm3, %v335_v43  ;;  %v447_v45 = vpop.f32.mrb[4].mxu1 }
  0xe5   :  { %v233_v46 = vadd.f32 %v431_v44, %v554_v19  ;;  %v224_v47 = vpop.f32.mrb[5].mxu0  ;;  %v297_v48 = vadd.f32 %v447_v45, %v554_v19  ;;  %v288_v49 = vpop.f32.mrb[5].mxu1 }
  0xe6   :  { %v225_v50 = vadd.f32 %v554_v19, %v224_v47  ;;  %v432_v51 = vpop.f32.mrb[6].mxu0  ;;  %v289_v52 = vadd.f32 %v554_v19, %v288_v49  ;;  %v448_v53 = vpop.f32.mrb[6].mxu1 }
  0xe7   :  { %v324_v54 = vmax.f32 %v233_v46, 0.0  ;;  %v236_v55 = vadd.f32 %v432_v51, %v554_v19  ;;  %v227_v56 = vpop.f32.mrb[7].mxu0  ;;  %v340_v57 = vmax.f32 %v297_v48, 0.0  ;;  %v300_v58 = vadd.f32 %v448_v53, %v554_v19  ;;  %v291_v59 = vpop.f32.mrb[7].mxu1 }
  0xe8   :  { %v322_v60 = vmax.f32 %v225_v50, 0.0  ;;  %v228_v61 = vadd.f32 %v554_v19, %v227_v56  ;;  %v338_v62 = vmax.f32 %v289_v52, 0.0  ;;  %v292_v63 = vadd.f32 %v554_v19, %v291_v59 }
  0xe9   :  { %352 = vst.msk [vmem:[%s693_s3 + $0x30] sm:$0xff] %vm345_vm3, %v324_v54  ;;  %v325_v0 = vmax.f32 %v236_v55, 0.0  ;;  %368 = vst.msk [vmem:[%s693_s3 + $0xb0] sm:$0xff] %vm345_vm3, %v340_v57  ;;  %v341_v1 = vmax.f32 %v300_v58, 0.0 }
  0xea   :  { %350 = vst.msk [vmem:[%s693_s3 + $0x20] sm:$0xff] %vm345_vm3, %v322_v60  ;;  %v323_v2 = vmax.f32 %v228_v61, 0.0  ;;  %366 = vst.msk [vmem:[%s693_s3 + $0xa0] sm:$0xff] %vm345_vm3, %v338_v62  ;;  %v339_v3 = vmax.f32 %v292_v63, 0.0 }
  0xeb   :  { %353 = vst.msk [vmem:[%s693_s3 + $0x38] sm:$0xff] %vm345_vm3, %v325_v0  ;;  %369 = vst.msk [vmem:[%s693_s3 + $0xb8] sm:$0xff] %vm345_vm3, %v341_v1 }
  0xec   :  { %351 = vst.msk [vmem:[%s693_s3 + $0x28] sm:$0xff] %vm345_vm3, %v323_v2  ;;  %v435_v4 = vpop.f32.mrb[8].mxu0  ;;  %367 = vst.msk [vmem:[%s693_s3 + $0xa8] sm:$0xff] %vm345_vm3, %v339_v3  ;;  %v451_v5 = vpop.f32.mrb[8].mxu1 }
  0xed   :  { %v249_v6 = vadd.f32 %v435_v4, %v554_v19  ;;  %v240_v7 = vpop.f32.mrb[9].mxu0  ;;  %v313_v8 = vadd.f32 %v451_v5, %v554_v19  ;;  %v304_v9 = vpop.f32.mrb[9].mxu1 }
  0xee   :  { %v241_v10 = vadd.f32 %v554_v19, %v240_v7  ;;  %v436_v11 = vpop.f32.mrb[10].mxu0  ;;  %v305_v12 = vadd.f32 %v554_v19, %v304_v9  ;;  %v452_v13 = vpop.f32.mrb[10].mxu1 }
  0xef   :  { %v328_v14 = vmax.f32 %v249_v6, 0.0  ;;  %v252_v15 = vadd.f32 %v436_v11, %v554_v19  ;;  %v243_v16 = vpop.f32.mrb[11].mxu0  ;;  %v344_v17 = vmax.f32 %v313_v8, 0.0  ;;  %v307_v18 = vpop.f32.mrb[11].mxu1 }
  0xf0   :  { %v326_v20 = vmax.f32 %v241_v10, 0.0  ;;  %v244_v21 = vadd.f32 %v554_v19, %v243_v16  ;;  %v342_v22 = vmax.f32 %v305_v12, 0.0  ;;  %v308_v23 = vadd.f32 %v554_v19, %v307_v18 }
  0xf1   :  { %356 = vst.msk [vmem:[%s693_s3 + $0x50] sm:$0xff] %vm345_vm3, %v328_v14  ;;  %v329_v24 = vmax.f32 %v252_v15, 0.0 }
  0xf2   :  { %373 = vst.msk [vmem:[%s693_s3 + $0xd0] sm:$0x3] %vm372_vm4, %v344_v17  ;;  %v327_v25 = vmax.f32 %v244_v21, 0.0  ;;  %v343_v26 = vmax.f32 %v308_v23, 0.0 }
  0xf3   :  { %354 = vst.msk [vmem:[%s693_s3 + $0x40] sm:$0xff] %vm345_vm3, %v326_v20  ;;  %370 = vst.msk [vmem:[%s693_s3 + $0xc0] sm:$0xff] %vm345_vm3, %v342_v22 }
  0xf4   :  { %357 = vst.msk [vmem:[%s693_s3 + $0x58] sm:$0xff] %vm345_vm3, %v329_v24  ;;  %355 = vst.msk [vmem:[%s693_s3 + $0x48] sm:$0xff] %vm345_vm3, %v327_v25  ;;  %v439_v27 = vpop.f32.mrb[12].mxu0 }
  0xf5   :  { %371 = vst.msk [vmem:[%s693_s3 + $0xc8] sm:$0xff] %vm345_vm3, %v343_v26  ;;  %v265_v28 = vadd.f32 %v439_v27, %v554_v19  ;;  %v256_v29 = vpop.f32.mrb[13].mxu0 }
  0xf6   :  { %v257_v30 = vadd.f32 %v554_v19, %v256_v29  ;;  %v440_v31 = vpop.f32.mrb[14].mxu0 }
  0xf7   :  { %v332_v32 = vmax.f32 %v265_v28, 0.0  ;;  %v268_v33 = vadd.f32 %v440_v31, %v554_v19  ;;  %v259_v34 = vpop.f32.mrb[15].mxu0 }
  0xf8   :  { %v330_v35 = vmax.f32 %v257_v30, 0.0  ;;  %v260_v36 = vadd.f32 %v554_v19, %v259_v34 }
  0xf9   :  { %360 = vst.msk [vmem:[%s693_s3 + $0x70] sm:$0xff] %vm345_vm3, %v332_v32  ;;  %v333_v37 = vmax.f32 %v268_v33, 0.0 }
  0xfa   :  { %358 = vst.msk [vmem:[%s693_s3 + $0x60] sm:$0xff] %vm345_vm3, %v330_v35  ;;  %v331_v38 = vmax.f32 %v260_v36, 0.0 }
  0xfb   :  { %361 = vst.msk [vmem:[%s693_s3 + $0x78] sm:$0xff] %vm345_vm3, %v333_v37 }
  0xfc   :  { %359 = vst.msk [vmem:[%s693_s3 + $0x68] sm:$0xff] %vm345_vm3, %v331_v38 }

// kernel: _lambda_.5
= control target key start
LH: loop header
LB: loop body
LE: loop exit
PB: predicated region body
PF: predicated region fallthrough
CT: control target
= control target key end

     0   :  { %v267_v0 = vmov 0   ;;  %vm127_vm0 = vcmask 130048   ;;  %vm205_vm1 = vcmask 123904   ;;  %s362_s1 = inlined_call_operand.vmem [shape: bf16[144,16], index: 1, kind: input, shape index: {}]   ;;  %s363_s0 = inlined_call_operand.vmem [shape: bf16[42,144], index: 0, kind: input, shape index: {}]   ;;  %s364_s2 = inlined_call_operand.vmem [shape: f32[1,16], index: 2, kind: input, shape index: {}]   ;;  %s365_s3 = inlined_call_operand.vmem [shape: f32[42,16], index: 3, kind: output, shape index: {}]  }
   0x1   :  { %230 = vmatprep.subr.bf16.mxu1 %v267_v0  ;;  %v249_v1 = vld [vmem:[%s362_s1] sm:$0xff]   ;;  %137 = vmatprep.subr.bf16.mxu0 %v267_v0  ;;  %v250_v2 = vld [vmem:[%s362_s1 + $0x8] sm:$0xff]   ;;  %v251_v3 = vld [vmem:[%s362_s1 + $0x10] sm:$0xff]  }
   0x2   :  { %239 = vmatpush1.bf16.msra.mxu1 %v249_v1  ;;  %138 = vmatpush1.bf16.msra.mxu0 %v249_v1  ;;  %v252_v4 = vld [vmem:[%s362_s1 + $0x18] sm:$0xff]   ;;  %v263_v6 = vld [vmem:[%s363_s0 + $0x4] ss:$8 sps:$4 sm:$0xff]   ;;  %v255_v9 = vld [vmem:[%s362_s1 + $0x30] sm:$0xff]  }
   0x3   :  { %231 = vmatprep.subr.bf16.mxu1 %v267_v0  ;;  %139 = vmatprep.subr.bf16.mxu0 %v267_v0  ;;  %v260_v5 = vld [vmem:[%s363_s0 + $0x14] ss:$8 sps:$4 sm:$0xff]   ;;  %v253_v7 = vld [vmem:[%s362_s1 + $0x20] sm:$0xff]   ;;  %v254_v8 = vld [vmem:[%s362_s1 + $0x28] sm:$0xff]  }
   0x4   :  { %228 = vmatprep.mubr.msk.bf16.mxu1 %vm127_vm0, %v260_v5  ;;  %227 = vmatprep.mubr.msk.bf16.mxu0 %vm127_vm0, %v263_v6  ;;  %v256_v10 = vld [vmem:[%s362_s1 + $0x38] sm:$0xff]   ;;  %v257_v11 = vld [vmem:[%s362_s1 + $0x40] sm:$0xff]  }
   0x5   :  { %v258_v12 = vld [vmem:[%s363_s0 + $0x10] ss:$8 sps:$4 sm:$0xff]   ;;  %v261_v13 = vld [vmem:[%s363_s0] ss:$8 sps:$4 sm:$0xff]  }
   0x6   :  { %240 = vmatpush1.bf16.msra.mxu1 %v250_v2  ;;  %140 = vmatpush1.bf16.msra.mxu0 %v250_v2  ;;  %v264_v14 = vld [vmem:[%s363_s0 + $0x24] ss:$8 sps:$4 sm:$0x1f]   ;;  %v266_v15 = vld [vmem:[%s363_s0 + $0x20] ss:$8 sps:$4 sm:$0x1f]  }
   0x7   :  { %232 = vmatprep.subr.bf16.mxu1 %v267_v0  ;;  %141 = vmatprep.subr.bf16.mxu0 %v267_v0  ;;  %v211_v16 = vld [vmem:[%s364_s2] ss:$0 sm:$0xff] }
   0xa   :  { %241 = vmatpush1.bf16.msra.mxu1 %v251_v3  ;;  %142 = vmatpush1.bf16.msra.mxu0 %v251_v3 }
   0xb   :  { %233 = vmatprep.subr.bf16.mxu1 %v267_v0  ;;  %143 = vmatprep.subr.bf16.mxu0 %v267_v0 }
   0xe   :  { %242 = vmatpush1.bf16.msra.mxu1 %v252_v4  ;;  %144 = vmatpush1.bf16.msra.mxu0 %v252_v4 }
   0xf   :  { %234 = vmatprep.subr.bf16.mxu1 %v267_v0  ;;  %145 = vmatprep.subr.bf16.mxu0 %v267_v0 }
  0x12   :  { %243 = vmatpush1.bf16.msra.mxu1 %v253_v7  ;;  %146 = vmatpush1.bf16.msra.mxu0 %v253_v7 }
  0x13   :  { %235 = vmatprep.subr.bf16.mxu1 %v267_v0  ;;  %147 = vmatprep.subr.bf16.mxu0 %v267_v0 }
  0x16   :  { %244 = vmatpush1.bf16.msra.mxu1 %v254_v8  ;;  %148 = vmatpush1.bf16.msra.mxu0 %v254_v8 }
  0x17   :  { %236 = vmatprep.subr.bf16.mxu1 %v267_v0  ;;  %149 = vmatprep.subr.bf16.mxu0 %v267_v0 }
  0x1a   :  { %245 = vmatpush1.bf16.msra.mxu1 %v255_v9  ;;  %150 = vmatpush1.bf16.msra.mxu0 %v255_v9 }
  0x1b   :  { %237 = vmatprep.subr.bf16.mxu1 %v267_v0  ;;  %151 = vmatprep.subr.bf16.mxu0 %v267_v0 }
  0x1e   :  { %246 = vmatpush1.bf16.msra.mxu1 %v256_v10  ;;  %152 = vmatpush1.bf16.msra.mxu0 %v256_v10 }
  0x1f   :  { %238 = vmatprep.subr.bf16.mxu1 %v267_v0  ;;  %153 = vmatprep.subr.bf16.mxu0 %v267_v0 }
  0x22   :  { %247 = vmatpush1.bf16.msra.mxu1 %v257_v11  ;;  %154 = vmatpush1.bf16.msra.mxu0 %v257_v11 }
  0x25   :  { %178 = vmatmul.mubr.bf16.vlgmr.msra.gmra.mrb[0].mxu1 %v258_v12  ;;  %170 = vmatmul.mubr.bf16.vlgmr.msra.gmra.mrb[0].mxu0 %v261_v13 }
  0x26   :  { %229 = vmatprep.mubr.msk.bf16.mxu1 %vm127_vm0, %v264_v14 }
  0x2d   :  { %186 = vmatmul.mubr.bf16.gmra.mrb[4].mxu1 %v266_v15 }
  0xf8   :  { %v179_v17 = vpop.f32.mrb[0].mxu1  ;;  %v171_v18 = vpop.f32.mrb[0].mxu0 }
  0xf9   :  { %v180_v19 = vadd.f32 %v211_v16, %v179_v17  ;;  %v181_v20 = vpop.f32.mrb[1].mxu1  ;;  %v172_v21 = vadd.f32 %v211_v16, %v171_v18  ;;  %v173_v22 = vpop.f32.mrb[1].mxu0 }
  0xfa   :  { %v182_v23 = vpop.f32.mrb[2].mxu1  ;;  %v174_v24 = vpop.f32.mrb[2].mxu0 }
  0xfb   :  { %v196_v25 = vmax.f32 %v180_v19, 0.0  ;;  %v183_v26 = vadd.f32 %v211_v16, %v182_v23  ;;  %v184_v27 = vpop.f32.mrb[3].mxu1  ;;  %v194_v28 = vmax.f32 %v172_v21, 0.0  ;;  %v175_v29 = vadd.f32 %v211_v16, %v174_v24  ;;  %v176_v30 = vpop.f32.mrb[3].mxu0 }
  0xfd   :  { %202 = vst.msk [vmem:[%s365_s3 + $0x10] sm:$0xff] %vm127_vm0, %v196_v25  ;;  %v197_v31 = vmax.f32 %v183_v26, 0.0  ;;  %200 = vst.msk [vmem:[%s365_s3] sm:$0xff] %vm127_vm0, %v194_v28  ;;  %v195_v32 = vmax.f32 %v175_v29, 0.0 }
  0xff   :  { %203 = vst.msk [vmem:[%s365_s3 + $0x18] sm:$0xff] %vm127_vm0, %v197_v31  ;;  %201 = vst.msk [vmem:[%s365_s3 + $0x8] sm:$0xff] %vm127_vm0, %v195_v32 }
 0x100   :  { %v187_v33 = vpop.f32.mrb[4].mxu1 }
 0x101   :  { %v188_v34 = vadd.f32 %v211_v16, %v187_v33  ;;  %v189_v35 = vpop.f32.mrb[5].mxu1 }
 0x102   :  { %v190_v36 = vpop.f32.mrb[6].mxu1 }
 0x103   :  { %v198_v37 = vmax.f32 %v188_v34, 0.0  ;;  %v191_v38 = vadd.f32 %v211_v16, %v190_v36  ;;  %v192_v39 = vpop.f32.mrb[7].mxu1 }
 0x105   :  { %204 = vst.msk [vmem:[%s365_s3 + $0x20] sm:$0xff] %vm127_vm0, %v198_v37  ;;  %v199_v40 = vmax.f32 %v191_v38, 0.0 }
 0x107   :  { %206 = vst.msk [vmem:[%s365_s3 + $0x28] sm:$0x3] %vm205_vm1, %v199_v40 }

// kernel: _lambda_.7
= control target key start
LH: loop header
LB: loop body
LE: loop exit
PB: predicated region body
PF: predicated region fallthrough
CT: control target
= control target key end

     0   :  { %v2519_v1 = vmov 0.0   ;;  %vm150_vm0 = vcmask 1044480   ;;  %vm2520_vm1 = vmmov 0   ;;  %vm62_vm2 = vcmask 130048   ;;  %s2522_s25 = smov 108   ;;  %s2524_s26 = smov 20   ;;  %s3108_s1 = inlined_call_operand.vmem [shape: bf16[16,40], index: 1, kind: input, shape index: {}]   ;;  %s3109_s2 = inlined_call_operand.vmem [shape: bf16[10,40], index: 2, kind: input, shape index: {}]   ;;  %s3110_s0 = inlined_call_operand.vmem [shape: f32[56,16], index: 0, kind: input, shape index: {}]   ;;  %s3111_s3 = inlined_call_operand.vmem [shape: f32[1,40], index: 3, kind: input, shape index: {}]   ;;  %s3112_s4 = inlined_call_operand.vmem [shape: bf16[10,40], index: 4, kind: input, shape index: {}]   ;;  %s3113_s5 = inlined_call_operand.vmem [shape: bf16[10,40], index: 5, kind: input, shape index: {}]   ;;  %s3114_s6 = inlined_call_operand.vmem [shape: f32[1,40], index: 6, kind: input, shape index: {}]   ;;  %s3115_s7 = inlined_call_operand.vmem [shape: bf16[10,40], index: 7, kind: input, shape index: {}]   ;;  %s3116_s8 = inlined_call_operand.vmem [shape: bf16[10,40], index: 8, kind: input, shape index: {}]   ;;  %s3117_s9 = inlined_call_operand.vmem [shape: f32[1,40], index: 9, kind: input, shape index: {}]   ;;  %s3118_s10 = inlined_call_operand.vmem [shape: f32[56,10], index: 10, kind: output, shape index: {}]  }
   0x1   :  { %v2317_v0 = vld [vmem:[%s3108_s1] sm:$0xff]   ;;  %2162 = vmatprep.subr.bf16.mxu1 %v2519_v1  ;;  %2164 = vmatprep.mubr.msk.bf16.mxu1 %vm2520_vm1, %v2519_v1  ;;  %v37_v4 = vld [vmem:[%s3110_s0 + $0x8] sm:$0xff]  ;;  %v38_v5 = vld [vmem:[%s3110_s0 + $0x10] sm:$0xff]  ;;  %v2521_v10 = vmov 0   ;;  %s2525_s27 = smov 98   ;;  %vm146_vm3 = vcmask 80896  }
   0x2   :  { %v2318_v2 = vld [vmem:[%s3109_s2] sm:$0x1f]   ;;  %2152 = vmatprep.subr.bf16.mxu0 %v2317_v0  ;;  %v39_v8 = vld [vmem:[%s3110_s0 + $0x18] sm:$0xff]  ;;  %v41_v54 = vld [vmem:[%s3110_s0 + $0x28] sm:$0xff]  ;;  %vm1883_vm4 = vcmask 326896  }
   0x3   :  { %v36_v3 = vld [vmem:[%s3110_s0] sm:$0xff]  ;;  %2153 = vmatpush3.bf16.msra.mxu0 %v2317_v0  ;;  %v2600_v6 = vsel %vm150_vm0, %v2318_v2, 0  ;;  %v44_v9 = vpack.c.bf16 %v39_v8, %v38_v5  ;;  %v42_v55 = vld [vmem:[%s3110_s0 + $0x30] sm:$0xff] }
   0x4   :  { %v43_v7 = vpack.c.bf16 %v37_v4, %v36_v3  ;;  %2163 = vmatpush3.bf16.msra.mxu1 %v2600_v6  ;;  %2174 = vmatprep.subr.bf16.mxu0 %v2519_v1  ;;  %v2620_v11 = vld [vmem:[%s3111_s3] ss:$0 sm:$0xff]  ;;  %s2523_s3 = smov 10   ;;  %v46_v57 = vpack.c.bf16 %v42_v55, %v42_v55 }
   0x5   :  { %2168 = vmatprep.subr.bf16.mxu1 %v2519_v1  ;;  %v40_v53 = vld [vmem:[%s3110_s0 + $0x20] sm:$0xff] }
   0x6   :  { %2154 = vmatprep.mubr.msk.bf16.mxu0 %vm62_vm2, %v43_v7  ;;  %v45_v56 = vpack.c.bf16 %v41_v54, %v40_v53 }
   0x7   :  { %2155 = vmatmul.mubr.msk.bf16.vlgmr.msra.gmra.mrb[0].mxu0 %vm62_vm2, %v44_v9  ;;  %2165 = vmatmul.mubr.bf16.vlgmr.msra.gmra.mrb[0].mxu1 %v2521_v10 }
   0x8   :  { %2175 = vmatpush3.bf16.msra.mxu0 %v2600_v6  ;;  %2169 = vmatpush3.bf16.msra.mxu1 %v2600_v6 }
   0x9   :  { %2170 = vmatprep.mubr.msk.bf16.mxu1 %vm2520_vm1, %v2519_v1  ;;  %2180 = vmatprep.subr.bf16.mxu1 %v2519_v1 }
   0xa   :  { %2186 = vmatprep.subr.bf16.mxu0 %v2519_v1  ;;  %2158 = vmatprep.mubr.msk.bf16.mxu0 %vm62_vm2, %v45_v56 }
   0xf   :  { %2159 = vmatmul.mubr.msk.bf16.gmra.mrb[4].mxu0 %vm62_vm2, %v46_v57 }
  0x10   :  { %2176 = vmatprep.mubr.msk.bf16.mxu0 %vm2520_vm1, %v2519_v1 }
  0xda   :  { %v2622_v12 = vpop.f32.mrb[0].mxu0  ;;  %v188_v13 = vpop.f32.mrb[0].mxu1 }
  0xdb   :  { %v109_v14 = vpop.f32.mrb[1].mxu0  ;;  %v2166_v16 = vpop.f32.mrb[1].mxu1  ;;  %v118_v4 = vadd.f32 %v2622_v12, %v2620_v11 }
  0xdc   :  { %v110_v15 = vadd.f32 %v2620_v11, %v109_v14  ;;  %v2625_v17 = vpop.f32.mrb[2].mxu0  ;;  %v191_v18 = vpop.f32.mrb[2].mxu1 }
  0xdd   :  { %v112_v19 = vpop.f32.mrb[3].mxu0  ;;  %v2167_v21 = vpop.f32.mrb[3].mxu1 }
  0xde   :  { %v194_v20 = vadd.f32 %v188_v13, %v110_v15  ;;  %v113_v37 = vadd.f32 %v2620_v11, %v112_v19 }
  0xe0   :  { %2323 = vtanh.f32 %v194_v20  ;;  %v2042_v23 = vmul.f32 -1.442695, %v194_v20 }
  0xe2   :  { %2325 = vpow2.f32 %v2042_v23  ;;  %v2662_v62 = vpop.f32.mrb[4].mxu0 }
  0xe3   :  { %v2664_v63 = vpop.f32.mrb[5].mxu0 }
  0xe4   :  { %v2161_v0 = vpop.f32.mrb[6].mxu0 }
  0xe5   :  { %v2666_v2 = vpop.f32.mrb[7].mxu0 }
  0xea   :  { %v2324_v22 = vpop.eup %2323 }
  0xeb   :  { %204 = vrot.lane.b32.xlu0 %v2324_v22, %s2522_s25 }
  0xec   :  { %v2326_v24 = vpop.eup %2325 }
  0xed   :  { %v198_v25 = vadd.f32 1.0, %v2326_v24 }
  0xef   :  { %2327 = vrcp.f32 %v198_v25 }
  0xf9   :  { %v2328_v26 = vpop.eup %2327 }
  0xfa   :  { %v202_v29 = vmul.f32 0.0, %v2328_v26 }
 0x15d   :  { %v205_v27 = vpop.permute.xlu0 %204 }
 0x15e   :  { %v207_v28 = vmul.f32 %v2328_v26, %v205_v27 }
 0x160   :  { %209 = vrot.lane.b32.xlu0 %v207_v28, %s2523_s3 }
 0x1d2   :  { %v210_v30 = vpop.permute.xlu0 %209 }
 0x1d3   :  { %v212_v31 = vadd.f32 %v210_v30, %v202_v29  ;;  %v121_v29 = vadd.f32 %v2625_v17, %v2620_v11 }
 0x1d5   :  { %2329 = vtanh.f32 %v212_v31 }
 0x1df   :  { %v2330_v32 = vpop.eup %2329 }
 0x1e0   :  { %215 = vrot.lane.b32.xlu1 %v2330_v32, %s2524_s26 }
 0x252   :  { %v216_v33 = vpop.permute.xlu1 %215 }
 0x253   :  { %v2630_v34 = vmul.f32 %v2328_v26, %v216_v33 }
 0x255   :  { %v219_v35 = vpack.c.bf16 %v2630_v34, %v2630_v34 }
 0x257   :  { %221 = vrot.lane.b32.xlu1 %v219_v35, %s2525_s27 }
 0x2c9   :  { %v222_v36 = vpop.permute.xlu1 %221 }
 0x2ca   :  { %2171 = vmatmul.mubr.msk.bf16.vlgmr.msra.gmra.mrb[4].mxu1 %vm146_vm3, %v222_v36 }
 0x2cb   :  { %2181 = vmatpush3.bf16.msra.mxu1 %v2600_v6  ;;  %2182 = vmatprep.mubr.msk.bf16.mxu1 %vm2520_vm1, %v2519_v1 }
 0x2cc   :  { %2192 = vmatprep.subr.bf16.mxu1 %v2519_v1 }
 0x39d   :  { %v260_v38 = vpop.f32.mrb[4].mxu1 }
 0x39e   :  { %v266_v39 = vadd.f32 %v260_v38, %v113_v37  ;;  %v2172_v40 = vpop.f32.mrb[5].mxu1 }
 0x39f   :  { %v263_v41 = vpop.f32.mrb[6].mxu1 }
 0x3a0   :  { %2331 = vtanh.f32 %v266_v39  ;;  %v2173_v42 = vpop.f32.mrb[7].mxu1  ;;  %v2044_v44 = vmul.f32 -1.442695, %v266_v39 }
 0x3a2   :  { %2333 = vpow2.f32 %v2044_v44 }
 0x3aa   :  { %v2332_v43 = vpop.eup %2331 }
 0x3ab   :  { %276 = vrot.lane.b32.xlu0 %v2332_v43, %s2522_s25 }
 0x3ac   :  { %v2334_v45 = vpop.eup %2333 }
 0x3ad   :  { %v270_v46 = vadd.f32 1.0, %v2334_v45 }
 0x3af   :  { %2335 = vrcp.f32 %v270_v46 }
 0x3b9   :  { %v2336_v47 = vpop.eup %2335 }
 0x3ba   :  { %v274_v50 = vmul.f32 %v2336_v47, %v212_v31 }
 0x41d   :  { %v277_v48 = vpop.permute.xlu0 %276 }
 0x41e   :  { %v279_v49 = vmul.f32 %v2336_v47, %v277_v48 }
 0x420   :  { %281 = vrot.lane.b32.xlu1 %v279_v49, %s2523_s3 }
 0x492   :  { %v282_v51 = vpop.permute.xlu1 %281 }
 0x493   :  { %v284_v52 = vadd.f32 %v282_v51, %v274_v50  ;;  %v126_v50 = vadd.f32 %v2620_v11, %v2664_v63 }
 0x495   :  { %2337 = vtanh.f32 %v284_v52 }
 0x49f   :  { %v2338_v58 = vpop.eup %2337 }
 0x4a0   :  { %287 = vrot.lane.b32.xlu0 %v2338_v58, %s2524_s26 }
 0x512   :  { %v288_v59 = vpop.permute.xlu0 %287 }
 0x513   :  { %v2657_v60 = vmul.f32 %v2336_v47, %v288_v59 }
 0x515   :  { %v291_v61 = vpack.c.bf16 %v2657_v60, %v2657_v60 }
 0x517   :  { %293 = vrot.lane.b32.xlu1 %v291_v61, %s2525_s27 }
 0x589   :  { %v294_v3 = vpop.permute.xlu1 %293 }
 0x58a   :  { %2177 = vmatmul.mubr.msk.bf16.vlgmr.msra.gmra.mrb[8].mxu0 %vm146_vm3, %v294_v3 }
 0x58b   :  { %2187 = vmatpush3.bf16.msra.mxu0 %v2600_v6  ;;  %2188 = vmatprep.mubr.msk.bf16.mxu0 %vm2520_vm1, %v2519_v1 }
 0x58c   :  { %2198 = vmatprep.subr.bf16.mxu0 %v2519_v1 }
 0x65d   :  { %v332_v5 = vpop.f32.mrb[8].mxu0 }
 0x65e   :  { %v338_v7 = vadd.f32 %v332_v5, %v118_v4  ;;  %v2178_v8 = vpop.f32.mrb[9].mxu0 }
 0x65f   :  { %v335_v9 = vpop.f32.mrb[10].mxu0 }
 0x660   :  { %2339 = vtanh.f32 %v338_v7  ;;  %v2179_v13 = vpop.f32.mrb[11].mxu0  ;;  %v2046_v15 = vmul.f32 -1.442695, %v338_v7 }
 0x662   :  { %2341 = vpow2.f32 %v2046_v15 }
 0x66a   :  { %v2340_v14 = vpop.eup %2339 }
 0x66b   :  { %348 = vrot.lane.b32.xlu0 %v2340_v14, %s2522_s25  ;;  %v129_v14 = vadd.f32 %v2620_v11, %v2666_v2 }
 0x66c   :  { %v2342_v16 = vpop.eup %2341 }
 0x66d   :  { %v342_v18 = vadd.f32 1.0, %v2342_v16 }
 0x66f   :  { %2343 = vrcp.f32 %v342_v18 }
 0x679   :  { %v2344_v19 = vpop.eup %2343 }
 0x67a   :  { %v346_v12 = vmul.f32 %v2344_v19, %v284_v52 }
 0x6dd   :  { %v349_v20 = vpop.permute.xlu0 %348 }
 0x6de   :  { %v351_v21 = vmul.f32 %v2344_v19, %v349_v20 }
 0x6e0   :  { %353 = vrot.lane.b32.xlu1 %v351_v21, %s2523_s3 }
 0x752   :  { %v354_v22 = vpop.permute.xlu1 %353 }
 0x753   :  { %v356_v23 = vadd.f32 %v354_v22, %v346_v12 }
 0x755   :  { %2345 = vtanh.f32 %v356_v23 }
 0x75f   :  { %v2346_v24 = vpop.eup %2345 }
 0x760   :  { %359 = vrot.lane.b32.xlu0 %v2346_v24, %s2524_s26 }
 0x7d2   :  { %v360_v25 = vpop.permute.xlu0 %359 }
 0x7d3   :  { %v2678_v26 = vmul.f32 %v2344_v19, %v360_v25 }
 0x7d5   :  { %v363_v27 = vpack.c.bf16 %v2678_v26, %v2678_v26 }
 0x7d7   :  { %365 = vrot.lane.b32.xlu1 %v363_v27, %s2525_s27 }
 0x849   :  { %v366_v28 = vpop.permute.xlu1 %365 }
 0x84a   :  { %2183 = vmatmul.mubr.msk.bf16.vlgmr.msra.gmra.mrb[8].mxu1 %vm146_vm3, %v366_v28 }
 0x84b   :  { %2193 = vmatpush3.bf16.msra.mxu1 %v2600_v6  ;;  %2194 = vmatprep.mubr.msk.bf16.mxu1 %vm2520_vm1, %v2519_v1 }
 0x91d   :  { %v404_v30 = vpop.f32.mrb[8].mxu1 }
 0x91e   :  { %v410_v31 = vadd.f32 %v404_v30, %v121_v29  ;;  %v2184_v32 = vpop.f32.mrb[9].mxu1  ;;  %v2319_v30 = vld [vmem:[%s3112_s4] sm:$0x1f]  }
 0x91f   :  { %v407_v33 = vpop.f32.mrb[10].mxu1  ;;  %2308 = vmatprep.subr.msk.bf16.mxu1 %vm150_vm0, %v2319_v30 }
 0x920   :  { %2347 = vtanh.f32 %v410_v31  ;;  %v2185_v35 = vpop.f32.mrb[11].mxu1  ;;  %v2048_v37 = vmul.f32 -1.442695, %v410_v31  ;;  %v694_v31 = vsel %vm150_vm0, %v2319_v30, 0  ;;  %v651_v33 = vpack.c.bf16 %v2657_v60, %v2630_v34  ;;  %v2320_v34 = vld [vmem:[%s3113_s5] sm:$0x1f]  }
 0x921   :  { %v2743_v60 = vsel %vm150_vm0, %v2320_v34, 0 }
 0x922   :  { %2349 = vpow2.f32 %v2048_v37 }
 0x92a   :  { %v2348_v36 = vpop.eup %2347 }
 0x92b   :  { %420 = vrot.lane.b32.xlu0 %v2348_v36, %s2522_s25 }
 0x92c   :  { %v2350_v38 = vpop.eup %2349 }
 0x92d   :  { %v414_v39 = vadd.f32 1.0, %v2350_v38 }
 0x92f   :  { %2351 = vrcp.f32 %v414_v39 }
 0x939   :  { %v2352_v40 = vpop.eup %2351 }
 0x93a   :  { %v418_v17 = vmul.f32 %v2352_v40, %v356_v23 }
 0x99d   :  { %v421_v41 = vpop.permute.xlu0 %420 }
 0x99e   :  { %v423_v42 = vmul.f32 %v2352_v40, %v421_v41  ;;  %v134_v41 = vadd.f32 %v2662_v62, %v2620_v11 }
 0x9a0   :  { %425 = vrot.lane.b32.xlu1 %v423_v42, %s2523_s3 }
 0xa12   :  { %v426_v43 = vpop.permute.xlu1 %425 }
 0xa13   :  { %v428_v44 = vadd.f32 %v426_v43, %v418_v17 }
 0xa15   :  { %2353 = vtanh.f32 %v428_v44 }
 0xa1f   :  { %v2354_v45 = vpop.eup %2353 }
 0xa20   :  { %431 = vrot.lane.b32.xlu0 %v2354_v45, %s2524_s26 }
 0xa92   :  { %v432_v46 = vpop.permute.xlu0 %431 }
 0xa93   :  { %v2692_v47 = vmul.f32 %v2352_v40, %v432_v46  ;;  %v2763_v46 = vld [vmem:[%s3114_s6] ss:$0 sm:$0xff] }
 0xa95   :  { %v435_v48 = vpack.c.bf16 %v2692_v47, %v2692_v47  ;;  %v652_v39 = vpack.c.bf16 %v2692_v47, %v2678_v26 }
 0xa97   :  { %437 = vrot.lane.b32.xlu1 %v435_v48, %s2525_s27 }
 0xb09   :  { %v438_v49 = vpop.permute.xlu1 %437 }
 0xb0a   :  { %2189 = vmatmul.mubr.msk.bf16.vlgmr.msra.gmra.mrb[12].mxu0 %vm146_vm3, %v438_v49 }
 0xb0b   :  { %2199 = vmatpush3.bf16.msra.mxu0 %v2600_v6  ;;  %2200 = vmatprep.mubr.msk.bf16.mxu0 %vm2520_vm1, %v2519_v1 }
 0xb0c   :  { %2214 = vmatprep.subr.bf16.mxu0 %v2519_v1 }
 0xbdd   :  { %v476_v51 = vpop.f32.mrb[12].mxu0 }
 0xbde   :  { %v482_v52 = vadd.f32 %v476_v51, %v126_v50  ;;  %v2190_v53 = vpop.f32.mrb[13].mxu0 }
 0xbdf   :  { %v479_v54 = vpop.f32.mrb[14].mxu0 }
 0xbe0   :  { %2355 = vtanh.f32 %v482_v52  ;;  %v2191_v55 = vpop.f32.mrb[15].mxu0  ;;  %v2050_v57 = vmul.f32 -1.442695, %v482_v52 }
 0xbe2   :  { %2357 = vpow2.f32 %v2050_v57 }
 0xbea   :  { %v2356_v56 = vpop.eup %2355 }
 0xbeb   :  { %492 = vrot.lane.b32.xlu0 %v2356_v56, %s2522_s25 }
 0xbec   :  { %v2358_v6 = vpop.eup %2357 }
 0xbed   :  { %v486_v58 = vadd.f32 1.0, %v2358_v6 }
 0xbef   :  { %2359 = vrcp.f32 %v486_v58 }
 0xbf9   :  { %v2360_v59 = vpop.eup %2359 }
 0xbfa   :  { %v490_v63 = vmul.f32 %v2360_v59, %v428_v44 }
 0xc5d   :  { %v493_v61 = vpop.permute.xlu0 %492 }
 0xc5e   :  { %v495_v0 = vmul.f32 %v2360_v59, %v493_v61 }
 0xc60   :  { %497 = vrot.lane.b32.xlu1 %v495_v0, %s2523_s3 }
 0xcd2   :  { %v498_v3 = vpop.permute.xlu1 %497 }
 0xcd3   :  { %v500_v4 = vadd.f32 %v498_v3, %v490_v63 }
 0xcd5   :  { %2361 = vtanh.f32 %v500_v4 }
 0xcdf   :  { %v2362_v5 = vpop.eup %2361 }
 0xce0   :  { %503 = vrot.lane.b32.xlu0 %v2362_v5, %s2524_s26 }
 0xd52   :  { %v504_v7 = vpop.permute.xlu0 %503 }
 0xd53   :  { %v2707_v8 = vmul.f32 %v2360_v59, %v504_v7 }
 0xd55   :  { %v507_v9 = vpack.c.bf16 %v2707_v8, %v2707_v8 }
 0xd57   :  { %509 = vrot.lane.b32.xlu1 %v507_v9, %s2525_s27 }
 0xdc9   :  { %v510_v13 = vpop.permute.xlu1 %509 }
 0xdca   :  { %2195 = vmatmul.mubr.msk.bf16.vlgmr.msra.gmra.mrb[12].mxu1 %vm146_vm3, %v510_v13 }
 0xdcb   :  { %2205 = vmatpush3.bf16.msra.mxu1 %v694_v31 }
 0xdcc   :  { %2226 = vmatprep.subr.bf16.mxu1 %v2519_v1 }
 0xe9d   :  { %v548_v15 = vpop.f32.mrb[12].mxu1 }
 0xe9e   :  { %v554_v16 = vadd.f32 %v548_v15, %v129_v14  ;;  %v2196_v18 = vpop.f32.mrb[13].mxu1 }
 0xe9f   :  { %v551_v19 = vpop.f32.mrb[14].mxu1 }
 0xea0   :  { %2363 = vtanh.f32 %v554_v16  ;;  %v2197_v20 = vpop.f32.mrb[15].mxu1  ;;  %v2052_v12 = vmul.f32 -1.442695, %v554_v16 }
 0xea2   :  { %2365 = vpow2.f32 %v2052_v12 }
 0xeaa   :  { %v2364_v21 = vpop.eup %2363 }
 0xeab   :  { %564 = vrot.lane.b32.xlu0 %v2364_v21, %s2522_s25 }
 0xeac   :  { %v2366_v22 = vpop.eup %2365 }
 0xead   :  { %v558_v23 = vadd.f32 1.0, %v2366_v22 }
 0xeaf   :  { %2367 = vrcp.f32 %v558_v23 }
 0xeb9   :  { %v2368_v24 = vpop.eup %2367 }
 0xeba   :  { %v562_v2 = vmul.f32 %v2368_v24, %v500_v4 }
 0xf1d   :  { %v565_v25 = vpop.permute.xlu0 %564 }
 0xf1e   :  { %v567_v27 = vmul.f32 %v2368_v24, %v565_v25 }
 0xf20   :  { %569 = vrot.lane.b32.xlu1 %v567_v27, %s2523_s3 }
 0xf92   :  { %v570_v28 = vpop.permute.xlu1 %569 }
 0xf93   :  { %v2717_v29 = vadd.f32 %v570_v28, %v562_v2 }
 0xf95   :  { %2369 = vtanh.f32 %v2717_v29 }
 0xf9f   :  { %v2370_v32 = vpop.eup %2369 }
 0xfa0   :  { %575 = vrot.lane.b32.xlu0 %v2370_v32, %s2524_s26 }
 0xfa4   :  { %668 = vrot.lane.b32.xlu0 %v651_v33, %s2525_s27 }
0x1012   :  { %v576_v35 = vpop.permute.xlu0 %575 }
0x1013   :  { %v2730_v36 = vmul.f32 %v2368_v24, %v576_v35 }
0x1015   :  { %v579_v37 = vpack.c.bf16 %v2730_v36, %v2730_v36  ;;  %v653_v25 = vpack.c.bf16 %v2730_v36, %v2707_v8 }
0x1016   :  { %v669_v38 = vpop.permute.xlu0 %668 }
0x1017   :  { %581 = vrot.lane.b32.xlu1 %v579_v37, %s2525_s27  ;;  %2206 = vmatprep.mubr.msk.bf16.mxu1 %vm146_vm3, %v669_v38 }
0x101b   :  { %670 = vrot.lane.b32.xlu1 %v652_v39, %s2525_s27 }
0x1089   :  { %v582_v40 = vpop.permute.xlu1 %581 }
0x108a   :  { %2201 = vmatmul.mubr.msk.bf16.vlgmr.msra.gmra.mrb[16].mxu0 %vm146_vm3, %v582_v40 }
0x108b   :  { %2215 = vmatpush3.bf16.msra.mxu0 %v2743_v60  ;;  %2216 = vmatprep.mubr.msk.bf16.mxu0 %vm2520_vm1, %v2519_v1 }
0x108c   :  { %2220 = vmatprep.subr.bf16.mxu0 %v2519_v1 }
0x108d   :  { %v671_v26 = vpop.permute.xlu1 %670 }
0x108e   :  { %2207 = vmatmul.mubr.msk.bf16.vlgmr.msra.gmra.mrb[16].mxu1 %vm146_vm3, %v671_v26 }
0x108f   :  { %2227 = vmatpush3.bf16.msra.mxu1 %v2743_v60 }
0x1090   :  { %2238 = vmatprep.subr.bf16.mxu1 %v2519_v1 }
0x1092   :  { %2217 = vmatmul.mubr.bf16.vlgmr.msra.gmra.mrb[20].mxu0 %v2521_v10 }
0x1093   :  { %2221 = vmatpush3.bf16.msra.mxu0 %v2743_v60  ;;  %2222 = vmatprep.mubr.msk.bf16.mxu0 %vm2520_vm1, %v2519_v1 }
0x1094   :  { %2232 = vmatprep.subr.bf16.mxu0 %v2519_v1 }
0x115d   :  { %v620_v42 = vpop.f32.mrb[16].mxu0 }
0x115e   :  { %v626_v17 = vadd.f32 %v620_v42, %v134_v41  ;;  %v2202_v43 = vpop.f32.mrb[17].mxu0 }
0x115f   :  { %v623_v44 = vpop.f32.mrb[18].mxu0 }
0x1160   :  { %v2203_v45 = vpop.f32.mrb[19].mxu0  ;;  %v2054_v7 = vmul.f32 -1.442695, %v626_v17 }
0x1161   :  { %v2765_v47 = vpop.f32.mrb[16].mxu1 }
0x1162   :  { %v730_v48 = vpop.f32.mrb[17].mxu1 }
0x1163   :  { %v731_v49 = vadd.f32 %v2763_v46, %v730_v48  ;;  %v2768_v50 = vpop.f32.mrb[18].mxu1 }
0x1164   :  { %v733_v51 = vpop.f32.mrb[19].mxu1 }
0x1165   :  { %v804_v52 = vpop.f32.mrb[20].mxu0  ;;  %v734_v28 = vadd.f32 %v2763_v46, %v733_v51 }
0x1166   :  { %v810_v11 = vadd.f32 %v804_v52, %v731_v49  ;;  %v2218_v62 = vpop.f32.mrb[21].mxu0 }
0x1167   :  { %v807_v53 = vpop.f32.mrb[22].mxu0 }
0x1168   :  { %2371 = vtanh.f32 %v810_v11  ;;  %v2219_v54 = vpop.f32.mrb[23].mxu0  ;;  %v2062_v56 = vmul.f32 -1.442695, %v810_v11 }
0x1169   :  { %v739_v54 = vadd.f32 %v2765_v47, %v2763_v46 }
0x116a   :  { %2373 = vpow2.f32 %v2062_v56 }
0x1172   :  { %v2372_v55 = vpop.eup %2371 }
0x1173   :  { %820 = vrot.lane.b32.xlu0 %v2372_v55, %s2522_s25 }
0x1174   :  { %v2374_v57 = vpop.eup %2373 }
0x1175   :  { %v814_v6 = vadd.f32 1.0, %v2374_v57 }
0x1177   :  { %2375 = vrcp.f32 %v814_v6 }
0x1181   :  { %v2376_v58 = vpop.eup %2375 }
0x1182   :  { %v818_v0 = vmul.f32 0.0, %v2376_v58 }
0x11e5   :  { %v821_v59 = vpop.permute.xlu0 %820 }
0x11e6   :  { %v823_v61 = vmul.f32 %v2376_v58, %v821_v59 }
0x11e8   :  { %825 = vrot.lane.b32.xlu1 %v823_v61, %s2523_s3 }
0x125a   :  { %v826_v63 = vpop.permute.xlu1 %825 }
0x125b   :  { %v828_v3 = vadd.f32 %v826_v63, %v818_v0 }
0x125d   :  { %2377 = vtanh.f32 %v828_v3 }
0x125e   :  { %2379 = vtanh.f32 %v626_v17 }
0x125f   :  { %2381 = vpow2.f32 %v2054_v7 }
0x1267   :  { %v2378_v4 = vpop.eup %2377 }
0x1268   :  { %831 = vrot.lane.b32.xlu0 %v2378_v4, %s2524_s26  ;;  %v2380_v5 = vpop.eup %2379 }
0x1269   :  { %v2382_v9 = vpop.eup %2381 }
0x126a   :  { %v630_v13 = vadd.f32 1.0, %v2382_v9 }
0x126c   :  { %636 = vrot.lane.b32.xlu0 %v2380_v5, %s2522_s25  ;;  %2383 = vrcp.f32 %v630_v13 }
0x1276   :  { %v2384_v18 = vpop.eup %2383 }
0x1277   :  { %v634_v12 = vmul.f32 %v2384_v18, %v2717_v29 }
0x12da   :  { %v832_v14 = vpop.permute.xlu0 %831 }
0x12db   :  { %v2774_v15 = vmul.f32 %v2376_v58, %v832_v14 }
0x12dd   :  { %v835_v16 = vpack.c.bf16 %v2774_v15, %v2774_v15 }
0x12de   :  { %v637_v19 = vpop.permute.xlu0 %636 }
0x12df   :  { %v639_v20 = vmul.f32 %v2384_v18, %v637_v19  ;;  %837 = vrot.lane.b32.xlu1 %v835_v16, %s2525_s27 }
0x12e1   :  { %641 = vrot.lane.b32.xlu0 %v639_v20, %s2523_s3  ;;  %v742_v20 = vadd.f32 %v2768_v50, %v2763_v46 }
0x1351   :  { %v838_v21 = vpop.permute.xlu1 %837 }
0x1352   :  { %2223 = vmatmul.mubr.msk.bf16.vlgmr.msra.gmra.mrb[24].mxu0 %vm146_vm3, %v838_v21 }
0x1353   :  { %v642_v22 = vpop.permute.xlu0 %641  ;;  %2233 = vmatpush3.bf16.msra.mxu0 %v2743_v60  ;;  %2234 = vmatprep.mubr.msk.bf16.mxu0 %vm2520_vm1, %v2519_v1 }
0x1354   :  { %v644_v23 = vadd.f32 %v642_v22, %v634_v12  ;;  %2244 = vmatprep.subr.bf16.mxu0 %v2519_v1 }
0x1356   :  { %2385 = vtanh.f32 %v644_v23 }
0x1360   :  { %v2386_v24 = vpop.eup %2385 }
0x1361   :  { %647 = vrot.lane.b32.xlu0 %v2386_v24, %s2524_s26 }
0x1365   :  { %672 = vrot.lane.b32.xlu0 %v653_v25, %s2525_s27 }
0x13d3   :  { %v648_v27 = vpop.permute.xlu0 %647 }
0x13d4   :  { %v650_v42 = vmul.f32 %v2384_v18, %v648_v27 }
0x13d6   :  { %v654_v43 = vpack.c.bf16 %v650_v42, %v650_v42 }
0x13d7   :  { %v673_v2 = vpop.permute.xlu0 %672 }
0x13d8   :  { %2210 = vmatprep.mubr.msk.bf16.mxu1 %vm146_vm3, %v673_v2 }
0x1425   :  { %v876_v29 = vpop.f32.mrb[24].mxu0 }
0x1426   :  { %v882_v30 = vadd.f32 %v876_v29, %v734_v28  ;;  %v2224_v31 = vpop.f32.mrb[25].mxu0 }
0x1427   :  { %v879_v32 = vpop.f32.mrb[26].mxu0 }
0x1428   :  { %2387 = vtanh.f32 %v882_v30  ;;  %v2225_v33 = vpop.f32.mrb[27].mxu0  ;;  %v2064_v37 = vmul.f32 -1.442695, %v882_v30 }
0x142a   :  { %2389 = vpow2.f32 %v2064_v37 }
0x1432   :  { %v2388_v35 = vpop.eup %2387 }
0x1433   :  { %892 = vrot.lane.b32.xlu1 %v2388_v35, %s2522_s25 }
0x1434   :  { %v2390_v8 = vpop.eup %2389 }
0x1435   :  { %v886_v36 = vadd.f32 1.0, %v2390_v8 }
0x1437   :  { %2391 = vrcp.f32 %v886_v36 }
0x1441   :  { %v2392_v38 = vpop.eup %2391 }
0x1442   :  { %v890_v40 = vmul.f32 %v2392_v38, %v828_v3 }
0x14a5   :  { %v893_v39 = vpop.permute.xlu1 %892 }
0x14a6   :  { %v895_v34 = vmul.f32 %v2392_v38, %v893_v39 }
0x14a8   :  { %897 = vrot.lane.b32.xlu1 %v895_v34, %s2523_s3 }
0x151a   :  { %v898_v26 = vpop.permute.xlu1 %897 }
0x151b   :  { %v900_v41 = vadd.f32 %v898_v26, %v890_v40 }
0x151d   :  { %2393 = vtanh.f32 %v900_v41 }
0x1527   :  { %v2394_v17 = vpop.eup %2393 }
0x1528   :  { %903 = vrot.lane.b32.xlu1 %v2394_v17, %s2524_s26 }
0x152c   :  { %674 = vrot.lane.b32.xlu1 %v654_v43, %s2525_s27 }
0x159a   :  { %v904_v44 = vpop.permute.xlu1 %903 }
0x159b   :  { %v2796_v45 = vmul.f32 %v2392_v38, %v904_v44 }
0x159d   :  { %v907_v48 = vpack.c.bf16 %v2796_v45, %v2796_v45 }
0x159e   :  { %v675_v49 = vpop.permute.xlu1 %674 }
0x159f   :  { %909 = vrot.lane.b32.xlu0 %v907_v48, %s2525_s27  ;;  %2211 = vmatmul.mubr.msk.bf16.gmra.mrb[20].mxu1 %vm146_vm3, %v675_v49 }
0x15a0   :  { %2228 = vmatprep.mubr.msk.bf16.mxu1 %vm2520_vm1, %v2519_v1 }
0x1611   :  { %v910_v51 = vpop.permute.xlu0 %909 }
0x1612   :  { %2229 = vmatmul.mubr.msk.bf16.vlgmr.msra.gmra.mrb[24].mxu1 %vm146_vm3, %v910_v51 }
0x1613   :  { %2239 = vmatpush3.bf16.msra.mxu1 %v2743_v60  ;;  %2240 = vmatprep.mubr.msk.bf16.mxu1 %vm2520_vm1, %v2519_v1 }
0x1614   :  { %2250 = vmatprep.subr.bf16.mxu1 %v2519_v1 }
0x1672   :  { %v2809_v52 = vpop.f32.mrb[20].mxu1 }
0x1673   :  { %v2811_v11 = vpop.f32.mrb[21].mxu1 }
0x1674   :  { %v2213_v62 = vpop.f32.mrb[22].mxu1  ;;  %v747_v39 = vadd.f32 %v2763_v46, %v2811_v11 }
0x1675   :  { %v2813_v53 = vpop.f32.mrb[23].mxu1 }
0x16e5   :  { %v948_v55 = vpop.f32.mrb[24].mxu1 }
0x16e6   :  { %v954_v56 = vadd.f32 %v948_v55, %v739_v54  ;;  %v2230_v57 = vpop.f32.mrb[25].mxu1 }
0x16e7   :  { %v951_v6 = vpop.f32.mrb[26].mxu1 }
0x16e8   :  { %2395 = vtanh.f32 %v954_v56  ;;  %v2231_v58 = vpop.f32.mrb[27].mxu1  ;;  %v2066_v61 = vmul.f32 -1.442695, %v954_v56 }
0x16ea   :  { %2397 = vpow2.f32 %v2066_v61 }
0x16f2   :  { %v2396_v59 = vpop.eup %2395 }
0x16f3   :  { %964 = vrot.lane.b32.xlu1 %v2396_v59, %s2522_s25  ;;  %v750_v59 = vadd.f32 %v2763_v46, %v2813_v53 }
0x16f4   :  { %v2398_v0 = vpop.eup %2397 }
0x16f5   :  { %v958_v63 = vadd.f32 1.0, %v2398_v0 }
0x16f7   :  { %2399 = vrcp.f32 %v958_v63 }
0x1701   :  { %v2400_v3 = vpop.eup %2399 }
0x1702   :  { %v962_v47 = vmul.f32 %v2400_v3, %v900_v41 }
0x1765   :  { %v965_v4 = vpop.permute.xlu1 %964 }
0x1766   :  { %v967_v5 = vmul.f32 %v2400_v3, %v965_v4 }
0x1768   :  { %969 = vrot.lane.b32.xlu0 %v967_v5, %s2523_s3 }
0x17da   :  { %v970_v7 = vpop.permute.xlu0 %969 }
0x17db   :  { %v972_v9 = vadd.f32 %v970_v7, %v962_v47 }
0x17dd   :  { %2401 = vtanh.f32 %v972_v9 }
0x17e7   :  { %v2402_v13 = vpop.eup %2401 }
0x17e8   :  { %975 = vrot.lane.b32.xlu1 %v2402_v13, %s2524_s26 }
0x185a   :  { %v976_v14 = vpop.permute.xlu1 %975 }
0x185b   :  { %v2820_v16 = vmul.f32 %v2400_v3, %v976_v14 }
0x185d   :  { %v979_v18 = vpack.c.bf16 %v2820_v16, %v2820_v16 }
0x185f   :  { %981 = vrot.lane.b32.xlu0 %v979_v18, %s2525_s27 }
0x18d1   :  { %v982_v19 = vpop.permute.xlu0 %981 }
0x18d2   :  { %2235 = vmatmul.mubr.msk.bf16.vlgmr.msra.gmra.mrb[28].mxu0 %vm146_vm3, %v982_v19 }
0x18d3   :  { %2245 = vmatpush3.bf16.msra.mxu0 %v2743_v60  ;;  %2246 = vmatprep.mubr.msk.bf16.mxu0 %vm2520_vm1, %v2519_v1 }
0x19a5   :  { %v1020_v21 = vpop.f32.mrb[28].mxu0 }
0x19a6   :  { %v1026_v12 = vadd.f32 %v1020_v21, %v742_v20  ;;  %v2236_v22 = vpop.f32.mrb[29].mxu0  ;;  %v2321_v21 = vld [vmem:[%s3115_s7] sm:$0x1f]  }
0x19a7   :  { %v1023_v23 = vpop.f32.mrb[30].mxu0  ;;  %2309 = vmatprep.subr.msk.bf16.mxu0 %vm150_vm0, %v2321_v21 }
0x19a8   :  { %2403 = vtanh.f32 %v1026_v12  ;;  %v2237_v24 = vpop.f32.mrb[31].mxu0  ;;  %v2068_v27 = vmul.f32 -1.442695, %v1026_v12  ;;  %v1310_v12 = vsel %vm150_vm0, %v2321_v21, 0  ;;  %v1267_v23 = vpack.c.bf16 %v2796_v45, %v2774_v15  ;;  %v2322_v15 = vld [vmem:[%s3116_s8] sm:$0x1f]  }
0x19a9   :  { %v2885_v45 = vsel %vm150_vm0, %v2322_v15, 0 }
0x19aa   :  { %2405 = vpow2.f32 %v2068_v27 }
0x19b2   :  { %v2404_v25 = vpop.eup %2403 }
0x19b3   :  { %1036 = vrot.lane.b32.xlu1 %v2404_v25, %s2522_s25 }
0x19b4   :  { %v2406_v2 = vpop.eup %2405 }
0x19b5   :  { %v1030_v28 = vadd.f32 1.0, %v2406_v2 }
0x19b7   :  { %2407 = vrcp.f32 %v1030_v28 }
0x19c1   :  { %v2408_v29 = vpop.eup %2407 }
0x19c2   :  { %v1034_v50 = vmul.f32 %v2408_v29, %v972_v9 }
0x1a25   :  { %v1037_v30 = vpop.permute.xlu1 %1036 }
0x1a26   :  { %v1039_v31 = vmul.f32 %v2408_v29, %v1037_v30  ;;  %v755_v30 = vadd.f32 %v2809_v52, %v2763_v46 }
0x1a28   :  { %1041 = vrot.lane.b32.xlu0 %v1039_v31, %s2523_s3 }
0x1a9a   :  { %v1042_v32 = vpop.permute.xlu0 %1041 }
0x1a9b   :  { %v1044_v33 = vadd.f32 %v1042_v32, %v1034_v50 }
0x1a9d   :  { %2409 = vtanh.f32 %v1044_v33 }
0x1aa7   :  { %v2410_v35 = vpop.eup %2409 }
0x1aa8   :  { %1047 = vrot.lane.b32.xlu1 %v2410_v35, %s2524_s26 }
0x1b1a   :  { %v1048_v37 = vpop.permute.xlu1 %1047 }
0x1b1b   :  { %v2834_v8 = vmul.f32 %v2408_v29, %v1048_v37  ;;  %v2905_v37 = vld [vmem:[%s3117_s9] ss:$0 sm:$0xff] }
0x1b1d   :  { %v1051_v36 = vpack.c.bf16 %v2834_v8, %v2834_v8  ;;  %v1268_v28 = vpack.c.bf16 %v2834_v8, %v2820_v16 }
0x1b1f   :  { %1053 = vrot.lane.b32.xlu0 %v1051_v36, %s2525_s27 }
0x1b91   :  { %v1054_v38 = vpop.permute.xlu0 %1053 }
0x1b92   :  { %2241 = vmatmul.mubr.msk.bf16.vlgmr.msra.gmra.mrb[28].mxu1 %vm146_vm3, %v1054_v38 }
0x1b93   :  { %2251 = vmatpush3.bf16.msra.mxu1 %v2743_v60  ;;  %2252 = vmatprep.mubr.msk.bf16.mxu1 %vm2520_vm1, %v2519_v1 }
0x1b94   :  { %2266 = vmatprep.subr.bf16.mxu1 %v2519_v1 }
0x1c65   :  { %v1092_v34 = vpop.f32.mrb[28].mxu1 }
0x1c66   :  { %v1098_v40 = vadd.f32 %v1092_v34, %v747_v39  ;;  %v2242_v26 = vpop.f32.mrb[29].mxu1 }
0x1c67   :  { %v1095_v41 = vpop.f32.mrb[30].mxu1 }
0x1c68   :  { %2411 = vtanh.f32 %v1098_v40  ;;  %v2243_v42 = vpop.f32.mrb[31].mxu1  ;;  %v2070_v43 = vmul.f32 -1.442695, %v1098_v40 }
0x1c6a   :  { %2413 = vpow2.f32 %v2070_v43 }
0x1c72   :  { %v2412_v17 = vpop.eup %2411 }
0x1c73   :  { %1108 = vrot.lane.b32.xlu1 %v2412_v17, %s2522_s25 }
0x1c74   :  { %v2414_v60 = vpop.eup %2413 }
0x1c75   :  { %v1102_v44 = vadd.f32 1.0, %v2414_v60 }
0x1c77   :  { %2415 = vrcp.f32 %v1102_v44 }
0x1c81   :  { %v2416_v48 = vpop.eup %2415 }
0x1c82   :  { %v1106_v11 = vmul.f32 %v2416_v48, %v1044_v33 }
0x1ce5   :  { %v1109_v49 = vpop.permute.xlu1 %1108 }
0x1ce6   :  { %v1111_v51 = vmul.f32 %v2416_v48, %v1109_v49 }
0x1ce8   :  { %1113 = vrot.lane.b32.xlu0 %v1111_v51, %s2523_s3 }
0x1d5a   :  { %v1114_v62 = vpop.permute.xlu0 %1113 }
0x1d5b   :  { %v1116_v54 = vadd.f32 %v1114_v62, %v1106_v11 }
0x1d5d   :  { %2417 = vtanh.f32 %v1116_v54 }
0x1d67   :  { %v2418_v55 = vpop.eup %2417 }
0x1d68   :  { %1119 = vrot.lane.b32.xlu1 %v2418_v55, %s2524_s26 }
0x1dda   :  { %v1120_v56 = vpop.permute.xlu1 %1119 }
0x1ddb   :  { %v2849_v57 = vmul.f32 %v2416_v48, %v1120_v56 }
0x1ddd   :  { %v1123_v6 = vpack.c.bf16 %v2849_v57, %v2849_v57 }
0x1ddf   :  { %1125 = vrot.lane.b32.xlu0 %v1123_v6, %s2525_s27 }
0x1e51   :  { %v1126_v58 = vpop.permute.xlu0 %1125 }
0x1e52   :  { %2247 = vmatmul.mubr.msk.bf16.vlgmr.msra.gmra.mrb[32].mxu0 %vm146_vm3, %v1126_v58 }
0x1e53   :  { %2257 = vmatpush3.bf16.msra.mxu0 %v1310_v12 }
0x1e54   :  { %2278 = vmatprep.subr.bf16.mxu0 %v2519_v1 }
0x1f25   :  { %v1164_v61 = vpop.f32.mrb[32].mxu0 }
0x1f26   :  { %v1170_v0 = vadd.f32 %v1164_v61, %v750_v59  ;;  %v2248_v63 = vpop.f32.mrb[33].mxu0 }
0x1f27   :  { %v1167_v3 = vpop.f32.mrb[34].mxu0 }
0x1f28   :  { %2419 = vtanh.f32 %v1170_v0  ;;  %v2249_v4 = vpop.f32.mrb[35].mxu0  ;;  %v2072_v47 = vmul.f32 -1.442695, %v1170_v0 }
0x1f2a   :  { %2421 = vpow2.f32 %v2072_v47 }
0x1f32   :  { %v2420_v5 = vpop.eup %2419 }
0x1f33   :  { %1180 = vrot.lane.b32.xlu1 %v2420_v5, %s2522_s25 }
0x1f34   :  { %v2422_v7 = vpop.eup %2421 }
0x1f35   :  { %v1174_v9 = vadd.f32 1.0, %v2422_v7 }
0x1f37   :  { %2423 = vrcp.f32 %v1174_v9 }
0x1f41   :  { %v2424_v13 = vpop.eup %2423 }
0x1f42   :  { %v1178_v53 = vmul.f32 %v2424_v13, %v1116_v54 }
0x1fa5   :  { %v1181_v14 = vpop.permute.xlu1 %1180 }
0x1fa6   :  { %v1183_v18 = vmul.f32 %v2424_v13, %v1181_v14 }
0x1fa8   :  { %1185 = vrot.lane.b32.xlu0 %v1183_v18, %s2523_s3 }
0x201a   :  { %v1186_v19 = vpop.permute.xlu0 %1185 }
0x201b   :  { %v2859_v20 = vadd.f32 %v1186_v19, %v1178_v53 }
0x201d   :  { %2425 = vtanh.f32 %v2859_v20 }
0x2027   :  { %v2426_v22 = vpop.eup %2425 }
0x2028   :  { %1191 = vrot.lane.b32.xlu1 %v2426_v22, %s2524_s26 }
0x202c   :  { %1284 = vrot.lane.b32.xlu1 %v1267_v23, %s2525_s27 }
0x209a   :  { %v1192_v24 = vpop.permute.xlu1 %1191 }
0x209b   :  { %v2872_v25 = vmul.f32 %v2424_v13, %v1192_v24 }
0x209d   :  { %v1195_v27 = vpack.c.bf16 %v2872_v25, %v2872_v25  ;;  %v1269_v13 = vpack.c.bf16 %v2872_v25, %v2849_v57 }
0x209e   :  { %v1285_v2 = vpop.permute.xlu1 %1284 }
0x209f   :  { %1197 = vrot.lane.b32.xlu0 %v1195_v27, %s2525_s27  ;;  %2258 = vmatprep.mubr.msk.bf16.mxu0 %vm146_vm3, %v1285_v2 }
0x20a3   :  { %1286 = vrot.lane.b32.xlu0 %v1268_v28, %s2525_s27 }
0x2111   :  { %v1198_v29 = vpop.permute.xlu0 %1197 }
0x2112   :  { %2253 = vmatmul.mubr.msk.bf16.vlgmr.msra.gmra.mrb[32].mxu1 %vm146_vm3, %v1198_v29 }
0x2113   :  { %2267 = vmatpush3.bf16.msra.mxu1 %v2885_v45  ;;  %2268 = vmatprep.mubr.msk.bf16.mxu1 %vm2520_vm1, %v2519_v1 }
0x2114   :  { %2272 = vmatprep.subr.bf16.mxu1 %v2519_v1 }
0x2115   :  { %v1287_v16 = vpop.permute.xlu0 %1286 }
0x2116   :  { %2259 = vmatmul.mubr.msk.bf16.vlgmr.msra.gmra.mrb[36].mxu0 %vm146_vm3, %v1287_v16 }
0x2117   :  { %2279 = vmatpush3.bf16.msra.mxu0 %v2885_v45 }
0x2118   :  { %2290 = vmatprep.subr.bf16.mxu0 %v2519_v1 }
0x211a   :  { %2269 = vmatmul.mubr.bf16.vlgmr.msra.gmra.mrb[36].mxu1 %v2521_v10 }
0x211b   :  { %2273 = vmatpush3.bf16.msra.mxu1 %v2885_v45  ;;  %2274 = vmatprep.mubr.msk.bf16.mxu1 %vm2520_vm1, %v2519_v1 }
0x211c   :  { %2284 = vmatprep.subr.bf16.mxu1 %v2519_v1 }
0x21e5   :  { %v1236_v31 = vpop.f32.mrb[32].mxu1 }
0x21e6   :  { %v1242_v50 = vadd.f32 %v1236_v31, %v755_v30  ;;  %v2254_v32 = vpop.f32.mrb[33].mxu1 }
0x21e7   :  { %v1239_v33 = vpop.f32.mrb[34].mxu1 }
0x21e8   :  { %v2255_v35 = vpop.f32.mrb[35].mxu1  ;;  %v2074_v55 = vmul.f32 -1.442695, %v1242_v50 }
0x21e9   :  { %v2907_v10 = vpop.f32.mrb[36].mxu0 }
0x21ea   :  { %v1346_v8 = vpop.f32.mrb[37].mxu0 }
0x21eb   :  { %v1347_v36 = vadd.f32 %v2905_v37, %v1346_v8  ;;  %v2910_v38 = vpop.f32.mrb[38].mxu0 }
0x21ec   :  { %v1349_v39 = vpop.f32.mrb[39].mxu0 }
0x21ed   :  { %v1420_v34 = vpop.f32.mrb[36].mxu1  ;;  %v1350_v53 = vadd.f32 %v2905_v37, %v1349_v39 }
0x21ee   :  { %v1426_v46 = vadd.f32 %v1420_v34, %v1347_v36  ;;  %v2270_v52 = vpop.f32.mrb[37].mxu1 }
0x21ef   :  { %v1423_v40 = vpop.f32.mrb[38].mxu1 }
0x21f0   :  { %2427 = vtanh.f32 %v1426_v46  ;;  %v2271_v26 = vpop.f32.mrb[39].mxu1  ;;  %v2082_v42 = vmul.f32 -1.442695, %v1426_v46  ;;  %v1355_v40 = vadd.f32 %v2907_v10, %v2905_v37 }
0x21f2   :  { %2429 = vpow2.f32 %v2082_v42 }
0x21fa   :  { %v2428_v41 = vpop.eup %2427 }
0x21fb   :  { %1436 = vrot.lane.b32.xlu1 %v2428_v41, %s2522_s25 }
0x21fc   :  { %v2430_v17 = vpop.eup %2429 }
0x21fd   :  { %v1430_v43 = vadd.f32 1.0, %v2430_v17 }
0x21ff   :  { %2431 = vrcp.f32 %v1430_v43 }
0x2209   :  { %v2432_v60 = vpop.eup %2431 }
0x220a   :  { %v1434_v49 = vmul.f32 0.0, %v2432_v60 }
0x226d   :  { %v1437_v44 = vpop.permute.xlu1 %1436 }
0x226e   :  { %v1439_v48 = vmul.f32 %v2432_v60, %v1437_v44 }
0x2270   :  { %1441 = vrot.lane.b32.xlu0 %v1439_v48, %s2523_s3 }
0x22e2   :  { %v1442_v51 = vpop.permute.xlu0 %1441 }
0x22e3   :  { %v1444_v11 = vadd.f32 %v1442_v51, %v1434_v49 }
0x22e5   :  { %2433 = vtanh.f32 %v1444_v11 }
0x22e6   :  { %2435 = vtanh.f32 %v1242_v50 }
0x22e7   :  { %2437 = vpow2.f32 %v2074_v55 }
0x22ef   :  { %v2434_v62 = vpop.eup %2433 }
0x22f0   :  { %1447 = vrot.lane.b32.xlu1 %v2434_v62, %s2524_s26  ;;  %v2436_v54 = vpop.eup %2435 }
0x22f1   :  { %v2438_v56 = vpop.eup %2437 }
0x22f2   :  { %v1246_v6 = vadd.f32 1.0, %v2438_v56 }
0x22f4   :  { %1252 = vrot.lane.b32.xlu1 %v2436_v54, %s2522_s25  ;;  %2439 = vrcp.f32 %v1246_v6 }
0x22fe   :  { %v2440_v0 = vpop.eup %2439 }
0x22ff   :  { %v1250_v5 = vmul.f32 %v2440_v0, %v2859_v20 }
0x2362   :  { %v1448_v58 = vpop.permute.xlu1 %1447 }
0x2363   :  { %v2916_v59 = vmul.f32 %v2432_v60, %v1448_v58 }
0x2365   :  { %v1451_v61 = vpack.c.bf16 %v2916_v59, %v2916_v59 }
0x2366   :  { %v1253_v63 = vpop.permute.xlu1 %1252 }
0x2367   :  { %v1255_v3 = vmul.f32 %v2440_v0, %v1253_v63  ;;  %1453 = vrot.lane.b32.xlu0 %v1451_v61, %s2525_s27  ;;  %v1358_v63 = vadd.f32 %v2910_v38, %v2905_v37 }
0x2369   :  { %1257 = vrot.lane.b32.xlu1 %v1255_v3, %s2523_s3 }
0x23d9   :  { %v1454_v4 = vpop.permute.xlu0 %1453 }
0x23da   :  { %2275 = vmatmul.mubr.msk.bf16.vlgmr.msra.gmra.mrb[40].mxu1 %vm146_vm3, %v1454_v4 }
0x23db   :  { %v1258_v47 = vpop.permute.xlu1 %1257  ;;  %2285 = vmatpush3.bf16.msra.mxu1 %v2885_v45  ;;  %2286 = vmatprep.mubr.msk.bf16.mxu1 %vm2520_vm1, %v2519_v1 }
0x23dc   :  { %v1260_v7 = vadd.f32 %v1258_v47, %v1250_v5  ;;  %2296 = vmatprep.subr.bf16.mxu1 %v2519_v1 }
0x23de   :  { %2441 = vtanh.f32 %v1260_v7 }
0x23e8   :  { %v2442_v9 = vpop.eup %2441 }
0x23e9   :  { %1263 = vrot.lane.b32.xlu1 %v2442_v9, %s2524_s26 }
0x23ed   :  { %1288 = vrot.lane.b32.xlu1 %v1269_v13, %s2525_s27 }
0x245b   :  { %v1264_v14 = vpop.permute.xlu1 %1263 }
0x245c   :  { %v1266_v30 = vmul.f32 %v2440_v0, %v1264_v14 }
0x245e   :  { %v1270_v50 = vpack.c.bf16 %v1266_v30, %v1266_v30 }
0x245f   :  { %v1289_v18 = vpop.permute.xlu1 %1288 }
0x2460   :  { %2262 = vmatprep.mubr.msk.bf16.mxu0 %vm146_vm3, %v1289_v18 }
0x24ad   :  { %v1492_v19 = vpop.f32.mrb[40].mxu1 }
0x24ae   :  { %v1498_v20 = vadd.f32 %v1492_v19, %v1350_v53  ;;  %v2276_v21 = vpop.f32.mrb[41].mxu1 }
0x24af   :  { %v1495_v12 = vpop.f32.mrb[42].mxu1 }
0x24b0   :  { %2443 = vtanh.f32 %v1498_v20  ;;  %v2277_v22 = vpop.f32.mrb[43].mxu1  ;;  %v2084_v24 = vmul.f32 -1.442695, %v1498_v20 }
0x24b2   :  { %2445 = vpow2.f32 %v2084_v24 }
0x24ba   :  { %v2444_v23 = vpop.eup %2443 }
0x24bb   :  { %1508 = vrot.lane.b32.xlu0 %v2444_v23, %s2522_s25 }
0x24bc   :  { %v2446_v57 = vpop.eup %2445 }
0x24bd   :  { %v1502_v25 = vadd.f32 1.0, %v2446_v57 }
0x24bf   :  { %2447 = vrcp.f32 %v1502_v25 }
0x24c9   :  { %v2448_v27 = vpop.eup %2447 }
0x24ca   :  { %v1506_v15 = vmul.f32 %v2448_v27, %v1444_v11 }
0x252d   :  { %v1509_v2 = vpop.permute.xlu0 %1508 }
0x252e   :  { %v1511_v28 = vmul.f32 %v2448_v27, %v1509_v2 }
0x2530   :  { %1513 = vrot.lane.b32.xlu0 %v1511_v28, %s2523_s3 }
0x25a2   :  { %v1514_v29 = vpop.permute.xlu0 %1513 }
0x25a3   :  { %v1516_v16 = vadd.f32 %v1514_v29, %v1506_v15 }
0x25a5   :  { %2449 = vtanh.f32 %v1516_v16 }
0x25af   :  { %v2450_v31 = vpop.eup %2449 }
0x25b0   :  { %1519 = vrot.lane.b32.xlu0 %v2450_v31, %s2524_s26 }
0x25b4   :  { %1290 = vrot.lane.b32.xlu0 %v1270_v50, %s2525_s27 }
0x2622   :  { %v1520_v32 = vpop.permute.xlu0 %1519 }
0x2623   :  { %v2938_v33 = vmul.f32 %v2448_v27, %v1520_v32 }
0x2625   :  { %v1523_v35 = vpack.c.bf16 %v2938_v33, %v2938_v33 }
0x2626   :  { %v1291_v8 = vpop.permute.xlu0 %1290 }
0x2627   :  { %1525 = vrot.lane.b32.xlu1 %v1523_v35, %s2525_s27  ;;  %2263 = vmatmul.mubr.msk.bf16.gmra.mrb[40].mxu0 %vm146_vm3, %v1291_v8 }
0x2628   :  { %2280 = vmatprep.mubr.msk.bf16.mxu0 %vm2520_vm1, %v2519_v1 }
0x2699   :  { %v1526_v36 = vpop.permute.xlu1 %1525 }
0x269a   :  { %2281 = vmatmul.mubr.msk.bf16.vlgmr.msra.gmra.mrb[44].mxu0 %vm146_vm3, %v1526_v36 }
0x269b   :  { %2291 = vmatpush3.bf16.msra.mxu0 %v2885_v45  ;;  %2292 = vmatprep.mubr.msk.bf16.mxu0 %vm2520_vm1, %v2519_v1 }
0x269c   :  { %2302 = vmatprep.subr.bf16.mxu0 %v2519_v1 }
0x26fa   :  { %v2951_v39 = vpop.f32.mrb[40].mxu0 }
0x26fb   :  { %v2953_v34 = vpop.f32.mrb[41].mxu0 }
0x26fc   :  { %v2265_v46 = vpop.f32.mrb[42].mxu0  ;;  %v1363_v27 = vadd.f32 %v2905_v37, %v2953_v34 }
0x26fd   :  { %v2955_v52 = vpop.f32.mrb[43].mxu0 }
0x276d   :  { %v1564_v26 = vpop.f32.mrb[44].mxu0 }
0x276e   :  { %v1570_v41 = vadd.f32 %v1564_v26, %v1355_v40  ;;  %v2282_v42 = vpop.f32.mrb[45].mxu0 }
0x276f   :  { %v1567_v17 = vpop.f32.mrb[46].mxu0 }
0x2770   :  { %2451 = vtanh.f32 %v1570_v41  ;;  %v2283_v43 = vpop.f32.mrb[47].mxu0  ;;  %v2086_v44 = vmul.f32 -1.442695, %v1570_v41  ;;  %v1366_v17 = vadd.f32 %v2905_v37, %v2955_v52 }
0x2772   :  { %2453 = vpow2.f32 %v2086_v44 }
0x277a   :  { %v2452_v60 = vpop.eup %2451 }
0x277b   :  { %1580 = vrot.lane.b32.xlu0 %v2452_v60, %s2522_s25 }
0x277c   :  { %v2454_v48 = vpop.eup %2453 }
0x277d   :  { %v1574_v49 = vadd.f32 1.0, %v2454_v48 }
0x277f   :  { %2455 = vrcp.f32 %v1574_v49 }
0x2789   :  { %v2456_v51 = vpop.eup %2455 }
0x278a   :  { %v1578_v10 = vmul.f32 %v2456_v51, %v1516_v16 }
0x27ed   :  { %v1581_v11 = vpop.permute.xlu0 %1580 }
0x27ee   :  { %v1583_v62 = vmul.f32 %v2456_v51, %v1581_v11 }
0x27f0   :  { %1585 = vrot.lane.b32.xlu1 %v1583_v62, %s2523_s3 }
0x2862   :  { %v1586_v54 = vpop.permute.xlu1 %1585 }
0x2863   :  { %v1588_v55 = vadd.f32 %v1586_v54, %v1578_v10 }
0x2865   :  { %2457 = vtanh.f32 %v1588_v55 }
0x286f   :  { %v2458_v56 = vpop.eup %2457 }
0x2870   :  { %1591 = vrot.lane.b32.xlu0 %v2458_v56, %s2524_s26 }
0x28e2   :  { %v1592_v6 = vpop.permute.xlu0 %1591 }
0x28e3   :  { %v2962_v58 = vmul.f32 %v2456_v51, %v1592_v6 }
0x28e5   :  { %v1595_v61 = vpack.c.bf16 %v2962_v58, %v2962_v58 }
0x28e7   :  { %1597 = vrot.lane.b32.xlu1 %v1595_v61, %s2525_s27 }
0x2959   :  { %v1598_v0 = vpop.permute.xlu1 %1597 }
0x295a   :  { %2287 = vmatmul.mubr.msk.bf16.vlgmr.msra.gmra.mrb[44].mxu1 %vm146_vm3, %v1598_v0 }
0x295b   :  { %2297 = vmatpush3.bf16.msra.mxu1 %v2885_v45  ;;  %2298 = vmatprep.mubr.msk.bf16.mxu1 %vm2520_vm1, %v2519_v1 }
0x2a2d   :  { %v1636_v3 = vpop.f32.mrb[44].mxu1 }
0x2a2e   :  { %v1642_v4 = vadd.f32 %v1636_v3, %v1358_v63  ;;  %v2288_v5 = vpop.f32.mrb[45].mxu1 }
0x2a2f   :  { %v1639_v47 = vpop.f32.mrb[46].mxu1 }
0x2a30   :  { %2459 = vtanh.f32 %v1642_v4  ;;  %v2289_v7 = vpop.f32.mrb[47].mxu1  ;;  %v2088_v13 = vmul.f32 -1.442695, %v1642_v4  ;;  %v1371_v47 = vadd.f32 %v2951_v39, %v2905_v37  ;;  %v1884_v37 = vsel %vm1883_vm4, %v2916_v59, -inf }
0x2a32   :  { %2461 = vpow2.f32 %v2088_v13 }
0x2a3a   :  { %v2460_v9 = vpop.eup %2459 }
0x2a3b   :  { %1652 = vrot.lane.b32.xlu0 %v2460_v9, %s2522_s25 }
0x2a3c   :  { %v2462_v14 = vpop.eup %2461 }
0x2a3d   :  { %v1646_v18 = vadd.f32 1.0, %v2462_v14 }
0x2a3f   :  { %2463 = vrcp.f32 %v1646_v18 }
0x2a49   :  { %v2464_v53 = vpop.eup %2463 }
0x2a4a   :  { %v1650_v38 = vmul.f32 %v2464_v53, %v1588_v55 }
0x2aad   :  { %v1653_v19 = vpop.permute.xlu0 %1652 }
0x2aae   :  { %v1655_v20 = vmul.f32 %v2464_v53, %v1653_v19 }
0x2ab0   :  { %1657 = vrot.lane.b32.xlu1 %v1655_v20, %s2523_s3 }
0x2b22   :  { %v1658_v21 = vpop.permute.xlu1 %1657 }
0x2b23   :  { %v1660_v12 = vadd.f32 %v1658_v21, %v1650_v38 }
0x2b25   :  { %2465 = vtanh.f32 %v1660_v12 }
0x2b2f   :  { %v2466_v22 = vpop.eup %2465 }
0x2b30   :  { %1663 = vrot.lane.b32.xlu0 %v2466_v22, %s2524_s26 }
0x2ba2   :  { %v1664_v23 = vpop.permute.xlu0 %1663 }
0x2ba3   :  { %v2976_v24 = vmul.f32 %v2464_v53, %v1664_v23 }
0x2ba5   :  { %v1667_v57 = vpack.c.bf16 %v2976_v24, %v2976_v24  ;;  %v1893_v39 = vsel %vm1883_vm4, %v2976_v24, -inf }
0x2ba7   :  { %1669 = vrot.lane.b32.xlu1 %v1667_v57, %s2525_s27 }
0x2c19   :  { %v1670_v25 = vpop.permute.xlu1 %1669 }
0x2c1a   :  { %2293 = vmatmul.mubr.msk.bf16.vlgmr.msra.gmra.mrb[48].mxu0 %vm146_vm3, %v1670_v25 }
0x2c1b   :  { %2303 = vmatpush3.bf16.msra.mxu0 %v2885_v45  ;;  %2304 = vmatprep.mubr.msk.bf16.mxu0 %vm2520_vm1, %v2519_v1 }
0x2ced   :  { %v1708_v2 = vpop.f32.mrb[48].mxu0 }
0x2cee   :  { %v1714_v28 = vadd.f32 %v1708_v2, %v1363_v27  ;;  %v2294_v15 = vpop.f32.mrb[49].mxu0 }
0x2cef   :  { %v1711_v29 = vpop.f32.mrb[50].mxu0  ;;  %v1890_v15 = vsel %vm1883_vm4, %v2962_v58, -inf }
0x2cf0   :  { %2467 = vtanh.f32 %v1714_v28  ;;  %v2295_v16 = vpop.f32.mrb[51].mxu0  ;;  %v2090_v31 = vmul.f32 -1.442695, %v1714_v28  ;;  %v1887_v28 = vsel %vm1883_vm4, %v2938_v33, -inf }
0x2cf2   :  { %2469 = vpow2.f32 %v2090_v31 }
0x2cfa   :  { %v2468_v30 = vpop.eup %2467 }
0x2cfb   :  { %1724 = vrot.lane.b32.xlu0 %v2468_v30, %s2522_s25 }
0x2cfc   :  { %v2470_v50 = vpop.eup %2469 }
0x2cfd   :  { %v1718_v32 = vadd.f32 1.0, %v2470_v50 }
0x2cff   :  { %2471 = vrcp.f32 %v1718_v32 }
0x2d09   :  { %v2472_v45 = vpop.eup %2471 }
0x2d0a   :  { %v1722_v8 = vmul.f32 %v2472_v45, %v1660_v12 }
0x2d6d   :  { %v1725_v35 = vpop.permute.xlu0 %1724 }
0x2d6e   :  { %v1727_v1 = vmul.f32 %v2472_v45, %v1725_v35 }
0x2d70   :  { %1729 = vrot.lane.b32.xlu1 %v1727_v1, %s2523_s3 }
0x2de2   :  { %v1730_v36 = vpop.permute.xlu1 %1729 }
0x2de3   :  { %v1732_v34 = vadd.f32 %v1730_v36, %v1722_v8 }
0x2de5   :  { %2473 = vtanh.f32 %v1732_v34 }
0x2def   :  { %v2474_v46 = vpop.eup %2473 }
0x2df0   :  { %1735 = vrot.lane.b32.xlu0 %v2474_v46, %s2524_s26 }
0x2e62   :  { %v1736_v40 = vpop.permute.xlu0 %1735 }
0x2e63   :  { %v2990_v26 = vmul.f32 %v2472_v45, %v1736_v40 }
0x2e65   :  { %v1739_v41 = vpack.c.bf16 %v2990_v26, %v2990_v26  ;;  %v1896_v29 = vsel %vm1883_vm4, %v2990_v26, -inf }
0x2e67   :  { %1741 = vrot.lane.b32.xlu1 %v1739_v41, %s2525_s27 }
0x2ed9   :  { %v1742_v42 = vpop.permute.xlu1 %1741 }
0x2eda   :  { %2299 = vmatmul.mubr.msk.bf16.vlgmr.msra.gmra.mrb[48].mxu1 %vm146_vm3, %v1742_v42 }
0x2fad   :  { %v1780_v43 = vpop.f32.mrb[48].mxu1 }
0x2fae   :  { %v1786_v60 = vadd.f32 %v1780_v43, %v1366_v17  ;;  %v2300_v44 = vpop.f32.mrb[49].mxu1 }
0x2faf   :  { %v1783_v48 = vpop.f32.mrb[50].mxu1 }
0x2fb0   :  { %2475 = vtanh.f32 %v1786_v60  ;;  %v2301_v49 = vpop.f32.mrb[51].mxu1  ;;  %v2092_v11 = vmul.f32 -1.442695, %v1786_v60 }
0x2fb2   :  { %2477 = vpow2.f32 %v2092_v11 }
0x2fba   :  { %v2476_v51 = vpop.eup %2475 }
0x2fbb   :  { %1796 = vrot.lane.b32.xlu0 %v2476_v51, %s2522_s25 }
0x2fbc   :  { %v2478_v62 = vpop.eup %2477 }
0x2fbd   :  { %v1790_v10 = vadd.f32 1.0, %v2478_v62 }
0x2fbf   :  { %2479 = vrcp.f32 %v1790_v10 }
0x2fc9   :  { %v2480_v54 = vpop.eup %2479 }
0x2fca   :  { %v1794_v52 = vmul.f32 %v2480_v54, %v1732_v34 }
0x302d   :  { %v1797_v55 = vpop.permute.xlu0 %1796 }
0x302e   :  { %v1799_v56 = vmul.f32 %v2480_v54, %v1797_v55 }
0x3030   :  { %1801 = vrot.lane.b32.xlu1 %v1799_v56, %s2523_s3 }
0x30a2   :  { %v1802_v6 = vpop.permute.xlu1 %1801 }
0x30a3   :  { %v1804_v61 = vadd.f32 %v1802_v6, %v1794_v52 }
0x30a5   :  { %2481 = vtanh.f32 %v1804_v61 }
0x30af   :  { %v2482_v0 = vpop.eup %2481 }
0x30b0   :  { %1807 = vrot.lane.b32.xlu0 %v2482_v0, %s2524_s26 }
0x3122   :  { %v1808_v63 = vpop.permute.xlu0 %1807 }
0x3123   :  { %v3001_v3 = vmul.f32 %v2480_v54, %v1808_v63 }
0x3125   :  { %v1811_v4 = vpack.c.bf16 %v3001_v3, %v3001_v3  ;;  %v1899_v23 = vsel %vm1883_vm4, %v3001_v3, -inf }
0x3127   :  { %1813 = vrot.lane.b32.xlu1 %v1811_v4, %s2525_s27 }
0x3199   :  { %v1814_v5 = vpop.permute.xlu1 %1813 }
0x319a   :  { %2305 = vmatmul.mubr.msk.bf16.vlgmr.msra.gmra.mrb[52].mxu0 %vm146_vm3, %v1814_v5 }
0x326d   :  { %v1852_v7 = vpop.f32.mrb[52].mxu0 }
0x326e   :  { %v1858_v9 = vadd.f32 %v1852_v7, %v1371_v47  ;;  %v2306_v13 = vpop.f32.mrb[53].mxu0 }
0x326f   :  { %v1855_v14 = vpop.f32.mrb[54].mxu0 }
0x3270   :  { %2483 = vtanh.f32 %v1858_v9  ;;  %v2307_v18 = vpop.f32.mrb[55].mxu0  ;;  %v2094_v19 = vmul.f32 -1.442695, %v1858_v9 }
0x3272   :  { %2485 = vpow2.f32 %v2094_v19 }
0x327a   :  { %v2484_v53 = vpop.eup %2483 }
0x327b   :  { %1868 = vrot.lane.b32.xlu0 %v2484_v53, %s2522_s25 }
0x327c   :  { %v2486_v20 = vpop.eup %2485 }
0x327d   :  { %v1862_v38 = vadd.f32 1.0, %v2486_v20 }
0x327f   :  { %2487 = vrcp.f32 %v1862_v38 }
0x3289   :  { %v2488_v21 = vpop.eup %2487 }
0x328a   :  { %v1866_v57 = vmul.f32 %v2488_v21, %v1804_v61 }
0x32ed   :  { %v1869_v12 = vpop.permute.xlu0 %1868 }
0x32ee   :  { %v1871_v22 = vmul.f32 %v2488_v21, %v1869_v12 }
0x32f0   :  { %1873 = vrot.lane.b32.xlu1 %v1871_v22, %s2523_s3 }
0x3314   :  { %1885 = vmax.xlane.f32.xlu1 %v1884_v37 }
0x3318   :  { %1894 = vmax.xlane.f32.xlu1 %v1893_v39 }
0x331c   :  { %1900 = vmax.xlane.f32.xlu1 %v1899_v23 }
0x3362   :  { %v1874_v25 = vpop.permute.xlu1 %1873 }
0x3363   :  { %v1876_v27 = vadd.f32 %v1874_v25, %v1866_v57 }
0x3365   :  { %2489 = vtanh.f32 %v1876_v27 }
0x336f   :  { %v2490_v2 = vpop.eup %2489 }
0x3370   :  { %1879 = vrot.lane.b32.xlu0 %v2490_v2, %s2524_s26 }
0x338f   :  { %1888 = vmax.xlane.f32.xlu0 %v1887_v28 }
0x3393   :  { %1891 = vmax.xlane.f32.xlu0 %v1890_v15 }
0x3397   :  { %1897 = vmax.xlane.f32.xlu0 %v1896_v29 }
0x33a1   :  { %v1886_v16 = vpop.xlane.xlu1 %1885 }
0x33a2   :  { %v3025_v30 = vsub.f32 %v2916_v59, %v1886_v16 }
0x33a4   :  { %v1912_v31 = vmul.f32 1.442695, %v3025_v30 }
0x33a5   :  { %v1895_v1 = vpop.xlane.xlu1 %1894 }
0x33a6   :  { %2491 = vpow2.f32 %v1912_v31  ;;  %v3035_v59 = vsub.f32 %v2976_v24, %v1895_v1 }
0x33a8   :  { %v1918_v17 = vmul.f32 1.442695, %v3035_v59 }
0x33a9   :  { %v1901_v41 = vpop.xlane.xlu1 %1900 }
0x33aa   :  { %v3043_v60 = vsub.f32 %v3001_v3, %v1901_v41 }
0x33ac   :  { %v1922_v44 = vmul.f32 1.442695, %v3043_v60 }
0x33b0   :  { %v2492_v50 = vpop.eup %2491 }
0x33b1   :  { %1933 = vrot.lane.b32.xlu1 %v2492_v50, %s2525_s27 }
0x33e2   :  { %v1880_v32 = vpop.permute.xlu0 %1879 }
0x33e3   :  { %v1882_v45 = vmul.f32 %v2488_v21, %v1880_v32 }
0x33e5   :  { %v1902_v35 = vsel %vm1883_vm4, %v1882_v45, -inf }
0x33e6   :  { %1903 = vmax.xlane.f32.xlu0 %v1902_v35 }
0x341c   :  { %v1889_v8 = vpop.xlane.xlu0 %1888 }
0x341d   :  { %v3031_v36 = vsub.f32 %v2938_v33, %v1889_v8 }
0x341f   :  { %v1914_v34 = vmul.f32 1.442695, %v3031_v36 }
0x3420   :  { %v1892_v46 = vpop.xlane.xlu0 %1891 }
0x3421   :  { %2493 = vpow2.f32 %v1914_v34  ;;  %v3038_v40 = vsub.f32 %v2962_v58, %v1892_v46 }
0x3423   :  { %v1916_v42 = vmul.f32 1.442695, %v3038_v40  ;;  %v1934_v11 = vpop.permute.xlu1 %1933 }
0x3424   :  { %v1898_v43 = vpop.xlane.xlu0 %1897  ;;  %v1954_v62 = vsel %vm146_vm3, %v1934_v11, 0.0 }
0x3425   :  { %2495 = vpow2.f32 %v1916_v42  ;;  %v3046_v33 = vsub.f32 %v2990_v26, %v1898_v43 }
0x3426   :  { %2497 = vpow2.f32 %v1918_v17 }
0x3427   :  { %v1920_v24 = vmul.f32 1.442695, %v3046_v33 }
0x3429   :  { %2499 = vpow2.f32 %v1920_v24 }
0x342a   :  { %2501 = vpow2.f32 %v1922_v44 }
0x342b   :  { %v2494_v58 = vpop.eup %2493 }
0x342c   :  { %1935 = vrot.lane.b32.xlu0 %v2494_v58, %s2525_s27 }
0x342f   :  { %v2496_v48 = vpop.eup %2495 }
0x3430   :  { %1937 = vrot.lane.b32.xlu1 %v2496_v48, %s2525_s27  ;;  %v2498_v49 = vpop.eup %2497 }
0x3433   :  { %v2500_v51 = vpop.eup %2499 }
0x3434   :  { %1939 = vrot.lane.b32.xlu1 %v2498_v49, %s2525_s27  ;;  %1941 = vrot.lane.b32.xlu0 %v2500_v51, %s2525_s27  ;;  %v2502_v26 = vpop.eup %2501 }
0x3438   :  { %1943 = vrot.lane.b32.xlu1 %v2502_v26, %s2525_s27 }
0x345c   :  { %1955 = vadd.xlane.f32.xlu1 %v1954_v62 }
0x3473   :  { %v1904_v10 = vpop.xlane.xlu0 %1903 }
0x3474   :  { %v3056_v54 = vsub.f32 %v1882_v45, %v1904_v10 }
0x3476   :  { %v1924_v55 = vmul.f32 1.442695, %v3056_v54 }
0x3478   :  { %2503 = vpow2.f32 %v1924_v55 }
0x3482   :  { %v2504_v56 = vpop.eup %2503 }
0x3483   :  { %1945 = vrot.lane.b32.xlu0 %v2504_v56, %s2525_s27 }
0x349e   :  { %v1936_v52 = vpop.permute.xlu0 %1935 }
0x349f   :  { %v1957_v6 = vsel %vm146_vm3, %v1936_v52, 0.0 }
0x34a2   :  { %v1938_v61 = vpop.permute.xlu1 %1937  ;;  %1958 = vadd.xlane.f32.xlu0 %v1957_v6 }
0x34a3   :  { %v1960_v0 = vsel %vm146_vm3, %v1938_v61, 0.0 }
0x34a6   :  { %v1940_v63 = vpop.permute.xlu1 %1939  ;;  %1961 = vadd.xlane.f32.xlu0 %v1960_v0  ;;  %v1942_v3 = vpop.permute.xlu0 %1941 }
0x34a7   :  { %v1963_v4 = vsel %vm146_vm3, %v1940_v63, 0.0  ;;  %v1966_v5 = vsel %vm146_vm3, %v1942_v3, 0.0 }
0x34a8   :  { %1964 = vadd.xlane.f32.xlu1 %v1963_v4 }
0x34aa   :  { %v1944_v47 = vpop.permute.xlu1 %1943  ;;  %1967 = vadd.xlane.f32.xlu0 %v1966_v5 }
0x34ab   :  { %v1969_v7 = vsel %vm146_vm3, %v1944_v47, 0.0 }
0x34ac   :  { %1970 = vadd.xlane.f32.xlu1 %v1969_v7 }
0x34e9   :  { %v1956_v9 = vpop.xlane.xlu1 %1955 }
0x34ea   :  { %2505 = vlog2.f32 %v1956_v9 }
0x34f4   :  { %v2506_v13 = vpop.eup %2505 }
0x34f5   :  { %v1976_v14 = vmul.f32 0.6931472, %v2506_v13  ;;  %v1946_v18 = vpop.permute.xlu0 %1945 }
0x34f6   :  { %v1972_v53 = vsel %vm146_vm3, %v1946_v18, 0.0 }
0x34f7   :  { %v1989_v19 = vsub.f32 %v3025_v30, %v1976_v14  ;;  %1973 = vadd.xlane.f32.xlu0 %v1972_v53 }
0x34f9   :  { %2003 = vrot.lane.b32.xlu1 %v1989_v19, %s2525_s27 }
0x352f   :  { %v1959_v20 = vpop.xlane.xlu0 %1958 }
0x3530   :  { %2507 = vlog2.f32 %v1959_v20 }
0x3533   :  { %v1962_v38 = vpop.xlane.xlu0 %1961 }
0x3534   :  { %2509 = vlog2.f32 %v1962_v38 }
0x3535   :  { %v1965_v21 = vpop.xlane.xlu1 %1964 }
0x3536   :  { %2511 = vlog2.f32 %v1965_v21 }
0x3537   :  { %v1968_v12 = vpop.xlane.xlu0 %1967 }
0x3538   :  { %2513 = vlog2.f32 %v1968_v12 }
0x3539   :  { %v1971_v22 = vpop.xlane.xlu1 %1970 }
0x353a   :  { %v2508_v37 = vpop.eup %2507  ;;  %2515 = vlog2.f32 %v1971_v22 }
0x353b   :  { %v1978_v39 = vmul.f32 0.6931472, %v2508_v37 }
0x353d   :  { %v1990_v23 = vsub.f32 %v3031_v36, %v1978_v39 }
0x353e   :  { %v2510_v57 = vpop.eup %2509 }
0x353f   :  { %v1980_v25 = vmul.f32 0.6931472, %v2510_v57  ;;  %2005 = vrot.lane.b32.xlu0 %v1990_v23, %s2525_s27 }
0x3540   :  { %v2512_v27 = vpop.eup %2511 }
0x3541   :  { %v1991_v2 = vsub.f32 %v3038_v40, %v1980_v25  ;;  %v1982_v28 = vmul.f32 0.6931472, %v2512_v27 }
0x3542   :  { %v2514_v15 = vpop.eup %2513 }
0x3543   :  { %v1984_v29 = vmul.f32 0.6931472, %v2514_v15  ;;  %2007 = vrot.lane.b32.xlu1 %v1991_v2, %s2525_s27  ;;  %v1992_v30 = vsub.f32 %v3035_v59, %v1982_v28 }
0x3544   :  { %v2516_v16 = vpop.eup %2515 }
0x3545   :  { %v1993_v31 = vsub.f32 %v3046_v33, %v1984_v29  ;;  %v1986_v50 = vmul.f32 0.6931472, %v2516_v16 }
0x3547   :  { %2009 = vrot.lane.b32.xlu1 %v1992_v30, %s2525_s27  ;;  %2011 = vrot.lane.b32.xlu0 %v1993_v31, %s2525_s27  ;;  %v1994_v32 = vsub.f32 %v3043_v60, %v1986_v50 }
0x354b   :  { %2013 = vrot.lane.b32.xlu1 %v1994_v32, %s2525_s27 }
0x356b   :  { %v2004_v45 = vpop.permute.xlu1 %2003 }
0x356c   :  { %2024 = vst.msk [vmem:[%s3118_s10] sm:$0xff] %vm146_vm3, %v2004_v45 }
0x3584   :  { %v1974_v35 = vpop.xlane.xlu0 %1973 }
0x3585   :  { %2517 = vlog2.f32 %v1974_v35 }
0x358f   :  { %v2518_v1 = vpop.eup %2517 }
0x3590   :  { %v1988_v8 = vmul.f32 0.6931472, %v2518_v1 }
0x3592   :  { %v1995_v36 = vsub.f32 %v3056_v54, %v1988_v8 }
0x3594   :  { %2015 = vrot.lane.b32.xlu0 %v1995_v36, %s2525_s27 }
0x35b1   :  { %v2006_v34 = vpop.permute.xlu0 %2005 }
0x35b2   :  { %2025 = vst.msk [vmem:[%s3118_s10 + $0x8] sm:$0xff] %vm146_vm3, %v2006_v34 }
0x35b5   :  { %v2008_v59 = vpop.permute.xlu1 %2007 }
0x35b6   :  { %2026 = vst.msk [vmem:[%s3118_s10 + $0x10] sm:$0xff] %vm146_vm3, %v2008_v59 }
0x35b9   :  { %v2010_v46 = vpop.permute.xlu1 %2009  ;;  %v2012_v40 = vpop.permute.xlu0 %2011 }
0x35ba   :  { %2027 = vst.msk [vmem:[%s3118_s10 + $0x18] sm:$0xff] %vm146_vm3, %v2010_v46  ;;  %2028 = vst.msk [vmem:[%s3118_s10 + $0x20] sm:$0xff] %vm146_vm3, %v2012_v40 }
0x35bd   :  { %v2014_v41 = vpop.permute.xlu1 %2013 }
0x35be   :  { %2029 = vst.msk [vmem:[%s3118_s10 + $0x28] sm:$0xff] %vm146_vm3, %v2014_v41 }
0x3606   :  { %v2016_v42 = vpop.permute.xlu0 %2015 }
0x3607   :  { %2030 = vst.msk [vmem:[%s3118_s10 + $0x30] sm:$0xff] %vm146_vm3, %v2016_v42 }

// kernel: _lambda_.6
= control target key start
LH: loop header
LB: loop body
LE: loop exit
PB: predicated region body
PF: predicated region fallthrough
CT: control target
= control target key end

     0   :  { %s2815_s6 = smov 1   ;;  %s2816_s10 = smov 2   ;;  %s3262_s0 = inlined_call_operand.smem [shape: u32[30], index: -1, kind: input, shape index: {}] }
   0x1   :  { %s2873_s5 = sld [smem:[%s3262_s0]]   ;;  %s2817_s14 = smov 3  }
   0x2   :  { %s2878_s9 = sld [smem:[%s3262_s0 + %s2815_s6]]   ;;  %s2818_s18 = smov 4  }
   0x3   :  { %s2883_s13 = sld [smem:[%s3262_s0 + %s2816_s10]]   ;;  %s2819_s22 = smov 5  }
   0x4   :  { %s2888_s17 = sld [smem:[%s3262_s0 + %s2817_s14]]   ;;  %s2820_s26 = smov 6  }
   0x5   :  { %s2893_s21 = sld [smem:[%s3262_s0 + %s2818_s18]]   ;;  %s2821_s30 = smov 7  }
   0x6   :  { %s2898_s25 = sld [smem:[%s3262_s0 + %s2819_s22]]   ;;  %s2822_s4 = smov 8  }
   0x7   :  { %s2903_s29 = sld [smem:[%s3262_s0 + %s2820_s26]]   ;;  %s2823_s10 = smov 9  }
   0x8   :  { %s2908_s3 = sld [smem:[%s3262_s0 + %s2821_s30]]   ;;  %s2824_s15 = smov 10  }
   0x9   :  { %s2913_s8 = sld [smem:[%s3262_s0 + %s2822_s4]]   ;;  %s2825_s20 = smov 11  }
   0xa   :  { %s2918_s14 = sld [smem:[%s3262_s0 + %s2823_s10]]   ;;  %s2826_s26 = smov 12  }
   0xb   :  { %s2923_s19 = sld [smem:[%s3262_s0 + %s2824_s15]]   ;;  %s2827_s1 = smov 13  }
   0xc   :  { %s2928_s24 = sld [smem:[%s3262_s0 + %s2825_s20]]   ;;  %s2828_s7 = smov 14  }
   0xd   :  { %s2933_s30 = sld [smem:[%s3262_s0 + %s2826_s26]]   ;;  %s2829_s15 = smov 15  }
   0xe   :  { %s2938_s6 = sld [smem:[%s3262_s0 + %s2827_s1]]   ;;  %s2830_s22 = smov 16  }
   0xf   :  { %s2943_s12 = sld [smem:[%s3262_s0 + %s2828_s7]]   ;;  %s2831_s28 = smov 17  }
  0x10   :  { %s2948_s20 = sld [smem:[%s3262_s0 + %s2829_s15]]   ;;  %s2832_s7 = smov 18  }
  0x11   :  { %s2953_s27 = sld [smem:[%s3262_s0 + %s2830_s22]]   ;;  %s2833_s15 = smov 19  }
  0x12   :  { %s2958_s4 = sld [smem:[%s3262_s0 + %s2831_s28]]   ;;  %s2834_s22 = smov 20  }
  0x13   :  { %s2835_s28 = smov 21  }
  0x15   :  { %3263 = sst [smem:[#allocation3_spill]] %s2943_s12 }
  0x16   :  { %3264 = sst [smem:[#allocation4_spill]] %s2948_s20 }
  0x17   :  { %3265 = sst [smem:[#allocation5_spill]] %s2953_s27 }
  0x18   :  { %3266 = sst [smem:[#allocation6_spill]] %s2958_s4 }
  0x19   :  { %s2963_s12 = sld [smem:[%s3262_s0 + %s2832_s7]]   ;;  %s2836_s7 = smov 22  }
  0x1a   :  { %s2968_s20 = sld [smem:[%s3262_s0 + %s2833_s15]]   ;;  %s2837_s15 = smov 23  }
  0x1b   :  { %s2973_s27 = sld [smem:[%s3262_s0 + %s2834_s22]]   ;;  %s2838_s22 = smov 24  }
  0x1c   :  { %s2978_s4 = sld [smem:[%s3262_s0 + %s2835_s28]]   ;;  %s2839_s28 = smov 25  }
  0x1f   :  { %3267 = sst [smem:[#allocation7_spill]] %s2963_s12 }
  0x20   :  { %3268 = sst [smem:[#allocation8_spill]] %s2968_s20 }
  0x21   :  { %3269 = sst [smem:[#allocation9_spill]] %s2973_s27 }
  0x22   :  { %3270 = sst [smem:[#allocation10_spill]] %s2978_s4 }
  0x23   :  { %s2983_s12 = sld [smem:[%s3262_s0 + %s2836_s7]]   ;;  %s2840_s7 = smov 26  }
  0x24   :  { %s2988_s20 = sld [smem:[%s3262_s0 + %s2837_s15]]   ;;  %s2841_s15 = smov 27  }
  0x25   :  { %s2993_s27 = sld [smem:[%s3262_s0 + %s2838_s22]]   ;;  %s2842_s22 = smov 28  }
  0x26   :  { %s2998_s4 = sld [smem:[%s3262_s0 + %s2839_s28]]   ;;  %s2843_s28 = smov 29  }
  0x29   :  { %3271 = sst [smem:[#allocation11_spill]] %s2983_s12 }
  0x2a   :  { %3272 = sst [smem:[#allocation12_spill]] %s2988_s20 }
  0x2b   :  { %3273 = sst [smem:[#allocation13_spill]] %s2993_s27 }
  0x2c   :  { %3274 = sst [smem:[#allocation14_spill]] %s2998_s4 }
  0x2d   :  { %s3003_s12 = sld [smem:[%s3262_s0 + %s2840_s7]]   ;;  %s3020_s7 = smov 0  }
  0x2e   :  { %s3008_s20 = sld [smem:[%s3262_s0 + %s2841_s15]]  }
  0x2f   :  { %s3013_s27 = sld [smem:[%s3262_s0 + %s2842_s22]]  }
  0x30   :  { %s3018_s4 = sld [smem:[%s3262_s0 + %s2843_s28]]  }
  0x31 LB: > { %s2421_s10 = sadd.s32 4294967295, %s2813_s7   ;;  %p2423_p0 = scmp.ge.s32.totalorder %s2813_s7, 1  ;;  %s2813_s7 = sphi %s3020_s7, %s69_s7  }
  0x32   : > { %p802_p1 = scmp.lt.s32.totalorder %s2813_s7, 3 }
  0x34   : > { %p803_p2 = pnand %p2423_p0, %p802_p1 }
  0x35   : > { %p2424_p3 = scmp.ne.s32.totalorder (!%p803_p2), %s2421_s10, 0 }
  0x36   : > { %806 = sbr.rel (%p803_p2) target bundleno = 4910 (0x132e), region = 136 }
  0x3d   : > { %872 = sbr.rel (%p2424_p3) target bundleno = 291 (0x123), region = 140  ;;  %v2687_v0 = vld [vmem:[%s2878_s9] sm:$0xff] (!%p2424_p3)   ;;  %v2844_v1 = vmov (!%p2424_p3), 0.0   ;;  %v2688_v2 = vld [vmem:[%s2878_s9 + $0x8] sm:$0xff] (!%p2424_p3)   ;;  %vm2845_vm0 = vmmov (!%p2424_p3), 0   ;;  %v2689_v3 = vld [vmem:[%s2878_s9 + $0x10] sm:$0xff] (!%p2424_p3)  }
  0x3e   : > { %2519 = vmatprep.subr.bf16.mxu0 (!%p2424_p3), %v2844_v1  ;;  %2525 = vmatprep.mubr.msk.bf16.mxu0 (!%p2424_p3), %vm2845_vm0, %v2844_v1  ;;  %v873_v4 = vld [vmem:[%s2873_s5] sm:$0xff] (!%p2424_p3)  ;;  %v874_v5 = vld [vmem:[%s2873_s5 + $0x8] sm:$0x3f] (!%p2424_p3)  ;;  %vm907_vm1 = vcmask (!%p2424_p3), 392192   ;;  %vm952_vm2 = vcmask (!%p2424_p3), 130048   ;;  %vm954_vm3 = vcmask (!%p2424_p3), 128000  }
  0x3f   : > { %2520 = vmatpush3.bf16.msra.mxu0 (!%p2424_p3), %v2687_v0  ;;  %v875_v6 = vpack.c.bf16 (!%p2424_p3), %v874_v5, %v873_v4  ;;  %v2425_v7 = vld [vmem:[%s2883_s13] ss:$0 sm:$0xff] (!%p2424_p3) }
  0x40   : > { %2521 = vmatprep.subr.bf16.mxu0 (!%p2424_p3), %v2844_v1 }
  0x43   : > { %2522 = vmatpush3.bf16.msra.mxu0 (!%p2424_p3), %v2688_v2 }
  0x44   : > { %2523 = vmatprep.subr.bf16.mxu0 %v2844_v1 }
  0x47   : > { %2524 = vmatpush3.bf16.msra.mxu0 %v2689_v3 }
  0x4a   : > { %2526 = vmatmul.mubr.msk.bf16.vlgmr.msra.gmra.mrb[0].mxu0 %vm907_vm1, %v875_v6 }
 0x11d   : > { %v945_v8 = vpop.f32.mrb[0].mxu0 }
 0x11e   : > { %v946_v9 = vadd.f32 %v2425_v7, %v945_v8  ;;  %v2527_v10 = vpop.f32.mrb[1].mxu0 }
 0x11f   : > { %v948_v11 = vpop.f32.mrb[2].mxu0 }
 0x120   : > { %953 = vst.msk [vmem:[#allocation2] sm:$0xff] %vm952_vm2, %v946_v9  ;;  %v949_v12 = vadd.f32 %v2425_v7, %v948_v11  ;;  %v2528_v13 = vpop.f32.mrb[3].mxu0 }
 0x122   : > { %955 = vst.msk [vmem:[#allocation2 + $0x8] sm:$0x3f] %vm954_vm3, %v949_v12 }
 0x123 PF: > { %vm958_vm4 = vcmask 130048   ;;  %vm962_vm5 = vcmask 128000   ;;  %v3049_v28 = vld [vmem:[%s2898_s25] sm:$0xff]   ;;  %v2846_v29 = vmov 0.0   ;;  %vm2847_vm6 = vmmov 0   ;;  %v2712_v48 = vld [vmem:[%s2908_s3 + $0x8] sm:$0xff]  }
 0x124   : > { %2529 = vmatprep.subr.bf16.mxu0 %v2846_v29  ;;  %2531 = vmatprep.mubr.msk.bf16.mxu0 %vm2847_vm6, %v2846_v29  ;;  %v2430_v38 = vld [vmem:[%s2888_s17] ss:$0 sm:$0xff]  ;;  %vm1103_vm7 = vcmask 261120   ;;  %s2848_s0 = smov 108   ;;  %s2849_s11 = smov 112   ;;  %vm1262_vm8 = vcmask 31744  }
 0x125   : > { %2530 = vmatpush3.bf16.msra.mxu0 %v3049_v28  ;;  %2535 = vmatprep.subr.bf16.mxu1 %v2846_v29  ;;  %v2431_v42 = vld [vmem:[%s2893_s21] ss:$0 sm:$0xff]  ;;  %s2850_s15 = smov 124   ;;  %s2851_s16 = smov 120   ;;  %vm1314_vm9 = vcmask 113664   ;;  %vm1318_vm10 = vcmask 111616  }
 0x126   : > { %2539 = vmatprep.mubr.msk.bf16.mxu1 %vm2847_vm6, %v2846_v29  ;;  %2543 = vmatprep.subr.bf16.mxu0 %v2846_v29  ;;  %v2711_v47 = vld [vmem:[%s2908_s3] sm:$0xff]   ;;  %s2852_s18 = smov 104   ;;  %s2853_s22 = smov 116   ;;  %vm1344_vm11 = vcmask 1046528   ;;  %vm1796_vm12 = vcmask 64512   ;;  %vm1799_vm13 = vcmask 97280  }
 0x127   : > { %v3036_v14 = vld [vmem:[#allocation2] sm:$0xff]  ;;  %2536 = vmatpush3.bf16.msra.mxu1 %v2711_v47  ;;  %s2854_s23 = smov 100   ;;  %s2855_s26 = smov 96   ;;  %vm1992_vm14 = vcmask 1040384   ;;  %vm2057_vm15 = vcmask 1041408   ;;  %vm2073_vm0 = vcmask 1045504  }
 0x128   : > { %v959_v16 = vsel %vm958_vm4, %v3036_v14, 0.0  ;;  %2537 = vmatprep.subr.bf16.mxu1 %v2846_v29  ;;  %v2432_v49 = vld [vmem:[%s2903_s29] ss:$0 sm:$0xff]  ;;  %s2856_s28 = smov 88   ;;  %s2857_s1 = smov 84  }
 0x129   : > { %v3038_v15 = vld [vmem:[#allocation2 + $0x8] sm:$0x3f]  ;;  %960 = vadd.xlane.f32.xlu0 %v959_v16  ;;  %v2437_v3 = vld [vmem:[%s2913_s8] ss:$0 sm:$0xff]  ;;  %s2858_s2 = smov 92   ;;  %p2478_p4 = scmp.ne.s32.totalorder %s2421_s10, 1 }
 0x12a   : > { %v963_v17 = vsel %vm962_vm5, %v3038_v15, 0.0 }
 0x12b   : > { %2538 = vmatpush3.bf16.msra.mxu1 %v2712_v48 }
 0x12c   : > { %2549 = vmatprep.subr.bf16.mxu1 %v2846_v29 }
 0x12d   : > { %964 = vadd.xlane.f32.xlu0 %v963_v17 }
 0x1b6   : > { %v961_v18 = vpop.xlane.xlu0 %960 }
 0x1b7   : > { %v967_v19 = vmul.f32 0.0625, %v961_v18 }
 0x1b9   : > { %v969_v20 = vsub.f32 %v3036_v14, %v967_v19 }
 0x1ba   : > { %v965_v21 = vpop.xlane.xlu0 %964 }
 0x1bb   : > { %v968_v22 = vmul.f32 0.0625, %v965_v21  ;;  %v971_v23 = vmul.f32 %v969_v20, %v969_v20 }
 0x1bd   : > { %v970_v24 = vsub.f32 %v3038_v15, %v968_v22  ;;  %v973_v25 = vsel %vm958_vm4, %v971_v23, 0.0 }
 0x1be   : > { %974 = vadd.xlane.f32.xlu1 %v973_v25 }
 0x1bf   : > { %v972_v26 = vmul.f32 %v970_v24, %v970_v24 }
 0x1c1   : > { %v976_v27 = vsel %vm962_vm5, %v972_v26, 0.0  ;;  %v2713_v26 = vld [vmem:[%s2928_s24] sm:$0xff]  }
 0x1c2   : > { %977 = vadd.xlane.f32.xlu1 %v976_v27 }
 0x24b   : > { %v975_v30 = vpop.xlane.xlu1 %974 }
 0x24c   : > { %v979_v31 = vmul.f32 0.0625, %v975_v30 }
 0x24e   : > { %v981_v32 = vadd.f32 1e-05, %v979_v31 }
 0x24f   : > { %v978_v33 = vpop.xlane.xlu1 %977 }
 0x250   : > { %2717 = vrsqrt.f32 %v981_v32  ;;  %v980_v34 = vmul.f32 0.0625, %v978_v33 }
 0x252   : > { %v982_v35 = vadd.f32 1e-05, %v980_v34 }
 0x254   : > { %2719 = vrsqrt.f32 %v982_v35 }
 0x25a   : > { %v2718_v36 = vpop.eup %2717 }
 0x25b   : > { %v985_v37 = vmul.f32 %v2718_v36, %v969_v20  ;;  %v2441_v36 = vld [vmem:[%s2918_s14] ss:$0 sm:$0xff] }
 0x25d   : > { %v994_v41 = vmul.f32 %v2430_v38, %v985_v37 }
 0x25e   : > { %v2720_v39 = vpop.eup %2719 }
 0x25f   : > { %v986_v40 = vmul.f32 %v2720_v39, %v970_v24  ;;  %v1003_v44 = vadd.f32 %v2431_v42, %v994_v41  ;;  %v2442_v41 = vld [vmem:[%s2923_s19] ss:$0 sm:$0xff] }
 0x261   : > { %v995_v43 = vmul.f32 %v2430_v38, %v986_v40 }
 0x263   : > { %v1004_v45 = vadd.f32 %v2431_v42, %v995_v43 }
 0x265   : > { %v1005_v46 = vpack.c.bf16 %v1004_v45, %v1003_v44 }
 0x267   : > { %2532 = vmatmul.mubr.msk.bf16.vlgmr.msra.gmra.mrb[0].mxu0 %vm958_vm4, %v1005_v46  ;;  %v2443_v46 = vld [vmem:[%s2933_s30] ss:$0 sm:$0xff] }
 0x268   : > { %2545 = vmatprep.mubr.msk.bf16.mxu0 %vm2847_vm6, %v2846_v29  ;;  %2544 = vmatpush3.bf16.msra.mxu0 %v2713_v26 }
 0x269   : > { %2555 = vmatprep.subr.bf16.mxu0 %v2846_v29 }
 0x33a   : > { %v1058_v50 = vpop.f32.mrb[0].mxu0 }
 0x33b   : > { %v1059_v51 = vadd.f32 %v2432_v49, %v1058_v50  ;;  %v2533_v52 = vpop.f32.mrb[1].mxu0 }
 0x33c   : > { %v1061_v53 = vpop.f32.mrb[2].mxu0 }
 0x33d   : > { %v2435_v54 = vmul.f32 -1.442695, %v1059_v51  ;;  %v1062_v55 = vadd.f32 %v2432_v49, %v1061_v53  ;;  %v2534_v56 = vpop.f32.mrb[3].mxu0 }
 0x33f   : > { %2721 = vpow2.f32 %v2435_v54  ;;  %v2436_v57 = vmul.f32 -1.442695, %v1062_v55 }
 0x341   : > { %2723 = vpow2.f32 %v2436_v57 }
 0x349   : > { %v2722_v58 = vpop.eup %2721 }
 0x34a   : > { %v1071_v59 = vadd.f32 1.0, %v2722_v58 }
 0x34b   : > { %v2724_v60 = vpop.eup %2723 }
 0x34c   : > { %2725 = vrcp.f32 %v1071_v59  ;;  %v1072_v61 = vadd.f32 1.0, %v2724_v60 }
 0x34e   : > { %2727 = vrcp.f32 %v1072_v61 }
 0x356   : > { %v2726_v62 = vpop.eup %2725 }
 0x357   : > { %v1077_v0 = vmul.f32 %v2726_v62, %v1059_v51 }
 0x358   : > { %v2728_v63 = vpop.eup %2727 }
 0x359   : > { %v1078_v1 = vmul.f32 %v2728_v63, %v1062_v55 }
 0x35b   : > { %v1079_v2 = vpack.c.bf16 %v1078_v1, %v1077_v0 }
 0x35d   : > { %2540 = vmatmul.mubr.msk.bf16.vlgmr.msra.gmra.mrb[0].mxu1 %vm1103_vm7, %v1079_v2  ;;  %v1256_v2 = vld [vmem:[%s3008_s20] sm:$0xff] }
 0x35e   : > { %2551 = vmatprep.mubr.msk.bf16.mxu1 %vm2847_vm6, %v2846_v29 }
 0x430   : > { %v1141_v4 = vpop.f32.mrb[0].mxu1 }
 0x431   : > { %v1142_v5 = vadd.f32 %v2437_v3, %v1141_v4  ;;  %v2541_v6 = vpop.f32.mrb[1].mxu1 }
 0x432   : > { %v1144_v7 = vpop.f32.mrb[2].mxu1  ;;  %v1257_v6 = vld [vmem:[%s3008_s20 + $0x8] sm:$0x3f] }
 0x433   : > { %v1148_v8 = vmul.f32 2.0, %v1142_v5  ;;  %v1145_v9 = vadd.f32 %v2437_v3, %v1144_v7  ;;  %v2542_v10 = vpop.f32.mrb[3].mxu1 }
 0x435   : > { %v3074_v11 = vadd.f32 %v1148_v8, %v3036_v14  ;;  %v1149_v12 = vmul.f32 2.0, %v1145_v9 }
 0x437   : > { %v3077_v13 = vadd.f32 %v1149_v12, %v3038_v15  ;;  %v1152_v16 = vsel %vm958_vm4, %v3074_v11, 0.0 }
 0x438   : > { %1153 = vadd.xlane.f32.xlu0 %v1152_v16 }
 0x439   : > { %v1155_v17 = vsel %vm962_vm5, %v3077_v13, 0.0 }
 0x43a   : > { %1156 = vadd.xlane.f32.xlu1 %v1155_v17 }
 0x4c5   : > { %v1154_v18 = vpop.xlane.xlu0 %1153 }
 0x4c6   : > { %v1158_v19 = vmul.f32 0.0625, %v1154_v18 }
 0x4c7   : > { %v1157_v20 = vpop.xlane.xlu1 %1156 }
 0x4c8   : > { %v1160_v21 = vsub.f32 %v3074_v11, %v1158_v19  ;;  %v1159_v14 = vmul.f32 0.0625, %v1157_v20 }
 0x4ca   : > { %v1161_v22 = vsub.f32 %v3077_v13, %v1159_v14  ;;  %v1162_v23 = vmul.f32 %v1160_v21, %v1160_v21 }
 0x4cc   : > { %v1164_v15 = vsel %vm958_vm4, %v1162_v23, 0.0  ;;  %v1163_v24 = vmul.f32 %v1161_v22, %v1161_v22 }
 0x4cd   : > { %1165 = vadd.xlane.f32.xlu0 %v1164_v15 }
 0x4ce   : > { %v1167_v25 = vsel %vm962_vm5, %v1163_v24, 0.0 }
 0x4cf   : > { %1168 = vadd.xlane.f32.xlu1 %v1167_v25 }
 0x55a   : > { %v1166_v27 = vpop.xlane.xlu0 %1165 }
 0x55b   : > { %v1170_v30 = vmul.f32 0.0625, %v1166_v27 }
 0x55c   : > { %v1169_v31 = vpop.xlane.xlu1 %1168 }
 0x55d   : > { %v1172_v32 = vadd.f32 1e-05, %v1170_v30  ;;  %v1171_v33 = vmul.f32 0.0625, %v1169_v31 }
 0x55f   : > { %2729 = vrsqrt.f32 %v1172_v32  ;;  %v1173_v34 = vadd.f32 1e-05, %v1171_v33 }
 0x561   : > { %2731 = vrsqrt.f32 %v1173_v34 }
 0x569   : > { %v2730_v35 = vpop.eup %2729 }
 0x56a   : > { %v1176_v37 = vmul.f32 %v2730_v35, %v1160_v21 }
 0x56b   : > { %v2732_v38 = vpop.eup %2731 }
 0x56c   : > { %v1185_v39 = vmul.f32 %v2441_v36, %v1176_v37  ;;  %v1177_v40 = vmul.f32 %v2732_v38, %v1161_v22 }
 0x56e   : > { %v1186_v42 = vmul.f32 %v2441_v36, %v1177_v40  ;;  %v1194_v43 = vadd.f32 %v2442_v41, %v1185_v39 }
 0x570   : > { %v1195_v44 = vadd.f32 %v2442_v41, %v1186_v42 }
 0x572   : > { %v1196_v45 = vpack.c.bf16 %v1195_v44, %v1194_v43 }
 0x574   : > { %2546 = vmatmul.mubr.msk.bf16.vlgmr.msra.gmra.mrb[4].mxu0 %vm958_vm4, %v1196_v45 }
 0x575   : > { %2557 = vmatprep.mubr.msk.bf16.mxu0 %vm2847_vm6, %v2846_v29 }
 0x647   : > { %v1249_v47 = vpop.f32.mrb[4].mxu0 }
 0x648   : > { %v2547_v48 = vpop.f32.mrb[5].mxu0  ;;  %v1250_v50 = vadd.f32 %v2443_v46, %v1249_v47 }
 0x649   : > { %v1252_v49 = vpop.f32.mrb[6].mxu0 }
 0x64a   : > { %v1253_v51 = vadd.f32 %v2443_v46, %v1252_v49  ;;  %v2548_v52 = vpop.f32.mrb[7].mxu0 }
 0x64c   : > { %v3095_v53 = vpack.c.bf16 %v1253_v51, %v1250_v50 }
 0x64e   : > { %1391 = vrot.lane.b32.xlu1 %v3095_v53, %s2848_s0  ;;  %1260 = vrot.lane.b32.xlu0 %v3095_v53, %s2849_s11  ;;  %s2859_s0 = smov 4  }
 0x652   : > { %1389 = vrot.lane.b32.xlu1 %v3095_v53, %s2850_s15  ;;  %1516 = vrot.lane.b32.xlu0 %v3095_v53, %s2851_s16  ;;  %s2860_s15 = smov 8   ;;  %s2861_s16 = smov 12  }
 0x656   : > { %1518 = vrot.lane.b32.xlu1 %v3095_v53, %s2852_s18  ;;  %1643 = vrot.lane.b32.xlu0 %v3095_v53, %s2853_s22  ;;  %s3275_s18 = sld [smem:[#allocation3_spill]]  ;;  %s3276_s22 = sld [smem:[#allocation6_spill]] }
 0x65a   : > { %1645 = vrot.lane.b32.xlu1 %v3095_v53, %s2854_s23  ;;  %s3277_s23 = sld [smem:[#allocation4_spill]] }
 0x6c0   : > { %v1261_v54 = vpop.permute.xlu0 %1260  ;;  %v1392_v56 = vpop.permute.xlu1 %1391 }
 0x6c1   : > { %v1267_v55 = vsel %vm1262_vm8, %v1261_v54, 0  ;;  %v1397_v58 = vsel %vm1262_vm8, %v1392_v56, 0 }
 0x6c2   : > { %2550 = vmatpush3.bf16.xpose.msra.mxu1 %v1267_v55 }
 0x6c3   : > { %2561 = vmatprep.subr.bf16.mxu1 %v2846_v29 }
 0x6c4   : > { %v1390_v57 = vpop.permute.xlu1 %1389  ;;  %v1517_v62 = vpop.permute.xlu0 %1516 }
 0x6c8   : > { %v1519_v59 = vpop.permute.xlu1 %1518  ;;  %v1644_v0 = vpop.permute.xlu0 %1643 }
 0x6c9   : > { %2552 = vmatmul.mubr.msk.bf16.vlgmr.msra.gmra.mrb[4].mxu1 %vm1262_vm8, %v3095_v53  ;;  %v1524_v60 = vsel %vm1262_vm8, %v1519_v59, 0 }
 0x6ca   : > { %2562 = vmatpush3.bf16.xpose.msra.mxu1 %v1397_v58  ;;  %2563 = vmatprep.mubr.msk.bf16.mxu1 %vm2847_vm6, %v2846_v29 }
 0x6cb   : > { %2573 = vmatprep.subr.bf16.mxu1 %v2846_v29 }
 0x6cc   : > { %v1646_v61 = vpop.permute.xlu1 %1645 }
 0x6cd   : > { %v1651_v63 = vsel %vm1262_vm8, %v1646_v61, 0 }
 0x6d1   : > { %2564 = vmatmul.mubr.msk.bf16.vlgmr.msra.gmra.mrb[8].mxu1 %vm1262_vm8, %v1390_v57 }
 0x6d2   : > { %2574 = vmatpush3.bf16.xpose.msra.mxu1 %v1524_v60  ;;  %2575 = vmatprep.mubr.msk.bf16.mxu1 %vm2847_vm6, %v2846_v29 }
 0x6d3   : > { %2585 = vmatprep.subr.bf16.mxu1 %v2846_v29 }
 0x6d9   : > { %2576 = vmatmul.mubr.msk.bf16.vlgmr.msra.gmra.mrb[12].mxu1 %vm1262_vm8, %v1517_v62 }
 0x6da   : > { %2586 = vmatpush3.bf16.xpose.msra.mxu1 %v1651_v63  ;;  %2587 = vmatprep.mubr.msk.bf16.mxu1 %vm2847_vm6, %v2846_v29 }
 0x6db   : > { %2597 = vmatprep.subr.bf16.mxu1 %v2846_v29 }
 0x6e1   : > { %2588 = vmatmul.mubr.msk.bf16.vlgmr.msra.gmra.mrb[16].mxu1 %vm1262_vm8, %v1644_v0 }
 0x6e2   : > { %2599 = vmatprep.mubr.msk.bf16.mxu1 %vm2847_vm6, %v2846_v29 }
 0x79c   : > { %v1303_v1 = vpop.f32.mrb[4].mxu1 }
 0x79d   : > { %v1310_v3 = vmul.f32 0.5, %v1303_v1  ;;  %v2553_v4 = vpop.f32.mrb[5].mxu1 }
 0x79e   : > { %v1306_v5 = vpop.f32.mrb[6].mxu1 }
 0x79f   : > { %v1311_v7 = vmul.f32 0.5, %v1306_v5  ;;  %v2554_v8 = vpop.f32.mrb[7].mxu1  ;;  %v1312_v9 = vadd.f32 %v1310_v3, %v1256_v2 }
 0x7a1   : > { %v1315_v10 = vsel %vm1314_vm9, %v1312_v9, -inf  ;;  %v1313_v12 = vadd.f32 %v1311_v7, %v1257_v6 }
 0x7a2   : > { %1316 = vmax.xlane.f32.xlu1 %v1315_v10 }
 0x7a3   : > { %v1319_v16 = vsel %vm1318_vm10, %v1313_v12, -inf }
 0x7a4   : > { %1320 = vmax.xlane.f32.xlu0 %v1319_v16  ;;  %v1433_v17 = vpop.f32.mrb[8].mxu1 }
 0x7a5   : > { %v1440_v18 = vmul.f32 0.5, %v1433_v17  ;;  %v2565_v19 = vpop.f32.mrb[9].mxu1 }
 0x7a6   : > { %v1436_v20 = vpop.f32.mrb[10].mxu1 }
 0x7a7   : > { %v1441_v21 = vmul.f32 0.5, %v1436_v20  ;;  %v2566_v14 = vpop.f32.mrb[11].mxu1  ;;  %v1442_v22 = vadd.f32 %v1440_v18, %v1256_v2 }
 0x7a9   : > { %v1444_v23 = vsel %vm1314_vm9, %v1442_v22, -inf  ;;  %v1443_v15 = vadd.f32 %v1441_v21, %v1257_v6 }
 0x7aa   : > { %1445 = vmax.xlane.f32.xlu0 %v1444_v23 }
 0x7ab   : > { %v1447_v27 = vsel %vm1318_vm10, %v1443_v15, -inf }
 0x7ac   : > { %v1560_v24 = vpop.f32.mrb[12].mxu1 }
 0x7ad   : > { %v1567_v25 = vmul.f32 0.5, %v1560_v24  ;;  %v2577_v26 = vpop.f32.mrb[13].mxu1 }
 0x7ae   : > { %1448 = vmax.xlane.f32.xlu0 %v1447_v27  ;;  %v1563_v30 = vpop.f32.mrb[14].mxu1 }
 0x7af   : > { %v1568_v31 = vmul.f32 0.5, %v1563_v30  ;;  %v2578_v32 = vpop.f32.mrb[15].mxu1  ;;  %v1569_v33 = vadd.f32 %v1567_v25, %v1256_v2 }
 0x7b1   : > { %v1571_v34 = vsel %vm1314_vm9, %v1569_v33, -inf  ;;  %v1570_v35 = vadd.f32 %v1568_v31, %v1257_v6 }
 0x7b2   : > { %1572 = vmax.xlane.f32.xlu1 %v1571_v34 }
 0x7b3   : > { %v1574_v36 = vsel %vm1318_vm10, %v1570_v35, -inf }
 0x7b4   : > { %1575 = vmax.xlane.f32.xlu0 %v1574_v36  ;;  %v1687_v37 = vpop.f32.mrb[16].mxu1 }
 0x7b5   : > { %v1694_v38 = vmul.f32 0.5, %v1687_v37  ;;  %v2589_v39 = vpop.f32.mrb[17].mxu1 }
 0x7b6   : > { %v1690_v40 = vpop.f32.mrb[18].mxu1 }
 0x7b7   : > { %v1695_v41 = vmul.f32 0.5, %v1690_v40  ;;  %v2590_v42 = vpop.f32.mrb[19].mxu1  ;;  %v1696_v43 = vadd.f32 %v1694_v38, %v1256_v2 }
 0x7b9   : > { %v1698_v44 = vsel %vm1314_vm9, %v1696_v43, -inf  ;;  %v1697_v45 = vadd.f32 %v1695_v41, %v1257_v6 }
 0x7ba   : > { %1699 = vmax.xlane.f32.xlu1 %v1698_v44 }
 0x7bb   : > { %v1701_v46 = vsel %vm1318_vm10, %v1697_v45, -inf }
 0x7bc   : > { %1702 = vmax.xlane.f32.xlu0 %v1701_v46 }
 0x7cb   : > { %1339 = vrot.lane.b32.xlu1 %v3095_v53, %s2855_s26  ;;  %s3278_s26 = sld [smem:[#allocation5_spill]] }
 0x82f   : > { %v1317_v47 = vpop.xlane.xlu1 %1316 }
 0x830   : > { %v1322_v48 = vsub.f32 %v1312_v9, %v1317_v47 }
 0x831   : > { %v1321_v49 = vpop.xlane.xlu0 %1320 }
 0x832   : > { %v1324_v50 = vmul.f32 1.442695, %v1322_v48  ;;  %v1323_v51 = vsub.f32 %v1313_v12, %v1321_v49 }
 0x834   : > { %2733 = vpow2.f32 %v1324_v50  ;;  %v1326_v52 = vmul.f32 1.442695, %v1323_v51 }
 0x836   : > { %2735 = vpow2.f32 %v1326_v52 }
 0x837   : > { %v1446_v54 = vpop.xlane.xlu0 %1445 }
 0x838   : > { %v1450_v55 = vsub.f32 %v1442_v22, %v1446_v54 }
 0x83a   : > { %v1452_v56 = vmul.f32 1.442695, %v1450_v55 }
 0x83b   : > { %v1449_v57 = vpop.xlane.xlu0 %1448 }
 0x83c   : > { %2737 = vpow2.f32 %v1452_v56  ;;  %v1451_v58 = vsub.f32 %v1443_v15, %v1449_v57 }
 0x83e   : > { %v2734_v59 = vpop.eup %2733  ;;  %v1454_v60 = vmul.f32 1.442695, %v1451_v58 }
 0x83f   : > { %v1573_v61 = vpop.xlane.xlu1 %1572  ;;  %v1328_v62 = vsel %vm1314_vm9, %v2734_v59, 0.0 }
 0x840   : > { %v2736_v63 = vpop.eup %2735  ;;  %2739 = vpow2.f32 %v1454_v60  ;;  %v1577_v0 = vsub.f32 %v1569_v33, %v1573_v61  ;;  %1329 = vadd.xlane.f32.xlu1 %v1328_v62 }
 0x841   : > { %v1576_v1 = vpop.xlane.xlu0 %1575  ;;  %v1331_v2 = vsel %vm1318_vm10, %v2736_v63, 0.0 }
 0x842   : > { %v1579_v3 = vmul.f32 1.442695, %v1577_v0  ;;  %v1578_v4 = vsub.f32 %v1570_v35, %v1576_v1  ;;  %1332 = vadd.xlane.f32.xlu0 %v1331_v2 }
 0x844   : > { %2741 = vpow2.f32 %v1579_v3  ;;  %v1581_v5 = vmul.f32 1.442695, %v1578_v4 }
 0x846   : > { %v3139_v6 = vpop.eup %2737  ;;  %2743 = vpow2.f32 %v1581_v5 }
 0x847   : > { %v1700_v7 = vpop.xlane.xlu1 %1699  ;;  %v1456_v8 = vsel %vm1314_vm9, %v3139_v6, 0.0 }
 0x848   : > { %v1704_v9 = vsub.f32 %v1696_v43, %v1700_v7  ;;  %1457 = vadd.xlane.f32.xlu1 %v1456_v8 }
 0x849   : > { %v1703_v10 = vpop.xlane.xlu0 %1702 }
 0x84a   : > { %v2740_v12 = vpop.eup %2739  ;;  %v1706_v16 = vmul.f32 1.442695, %v1704_v9  ;;  %v1705_v17 = vsub.f32 %v1697_v45, %v1703_v10 }
 0x84b   : > { %v1340_v18 = vpop.permute.xlu1 %1339  ;;  %v1459_v19 = vsel %vm1318_vm10, %v2740_v12, 0.0 }
 0x84c   : > { %2745 = vpow2.f32 %v1706_v16  ;;  %v1708_v20 = vmul.f32 1.442695, %v1705_v17  ;;  %v1346_v21 = vsel %vm1344_vm11, %v1340_v18, 0  ;;  %1460 = vadd.xlane.f32.xlu0 %v1459_v19 }
 0x84d   : > { %2556 = vmatpush3.bf16.msra.mxu0 %v1346_v21 }
 0x84e   : > { %v2742_v14 = vpop.eup %2741  ;;  %2747 = vpow2.f32 %v1708_v20  ;;  %2567 = vmatprep.subr.bf16.mxu0 %v2846_v29 }
 0x84f   : > { %v1583_v22 = vsel %vm1314_vm9, %v2742_v14, 0.0 }
 0x850   : > { %v2744_v23 = vpop.eup %2743  ;;  %1584 = vadd.xlane.f32.xlu1 %v1583_v22 }
 0x851   : > { %v1586_v15 = vsel %vm1318_vm10, %v2744_v23, 0.0 }
 0x852   : > { %1587 = vadd.xlane.f32.xlu0 %v1586_v15 }
 0x856   : > { %v3148_v24 = vpop.eup %2745 }
 0x857   : > { %v1710_v25 = vsel %vm1314_vm9, %v3148_v24, 0.0 }
 0x858   : > { %v2748_v26 = vpop.eup %2747  ;;  %1711 = vadd.xlane.f32.xlu1 %v1710_v25 }
 0x859   : > { %v1713_v27 = vsel %vm1318_vm10, %v2748_v26, 0.0 }
 0x85a   : > { %1714 = vadd.xlane.f32.xlu0 %v1713_v27 }
 0x869   : > { %1594 = vrot.lane.b32.xlu1 %v3095_v53, %s2856_s28  ;;  %s3279_s28 = sld [smem:[#allocation7_spill]] }
 0x86d   : > { %1721 = vrot.lane.b32.xlu1 %v3095_v53, %s2857_s1  ;;  %s3280_s1 = sld [smem:[#allocation12_spill]] }
 0x870   : > { %1467 = vrot.lane.b32.xlu0 %v3095_v53, %s2858_s2  ;;  %s3281_s2 = sld [smem:[#allocation8_spill]] }
 0x8cd   : > { %v1330_v30 = vpop.xlane.xlu1 %1329 }
 0x8ce   : > { %2749 = vrcp.f32 %v1330_v30 }
 0x8cf   : > { %v1333_v31 = vpop.xlane.xlu0 %1332 }
 0x8d0   : > { %2751 = vrcp.f32 %v1333_v31 }
 0x8d5   : > { %v1458_v37 = vpop.xlane.xlu1 %1457 }
 0x8d8   : > { %v2750_v32 = vpop.eup %2749 }
 0x8d9   : > { %v1461_v34 = vpop.xlane.xlu0 %1460  ;;  %v1336_v35 = vmul.f32 %v2750_v32, %v2734_v59 }
 0x8da   : > { %v2752_v33 = vpop.eup %2751  ;;  %2753 = vrcp.f32 %v1461_v34 }
 0x8db   : > { %v1337_v36 = vmul.f32 %v2752_v33, %v2736_v63  ;;  %2755 = vrcp.f32 %v1458_v37 }
 0x8dd   : > { %v1338_v38 = vpack.c.bf16 %v1337_v36, %v1336_v35  ;;  %v1585_v53 = vpop.xlane.xlu1 %1584 }
 0x8df   : > { %2558 = vmatmul.mubr.msk.bf16.vlgmr.msra.gmra.mrb[8].mxu0 %vm1314_vm9, %v1338_v38  ;;  %v1588_v39 = vpop.xlane.xlu0 %1587 }
 0x8e0   : > { %2569 = vmatprep.mubr.msk.bf16.mxu0 %vm2847_vm6, %v2846_v29  ;;  %2757 = vrcp.f32 %v1588_v39 }
 0x8e1   : > { %2759 = vrcp.f32 %v1585_v53  ;;  %v2454_v53 = vld [vmem:[%s3275_s18] ss:$0 sm:$0xff]  ;;  %s3286_s18 = sld [smem:[#allocation14_spill]] }
 0x8e4   : > { %v2754_v40 = vpop.eup %2753 }
 0x8e5   : > { %v1712_v41 = vpop.xlane.xlu1 %1711  ;;  %v2756_v43 = vpop.eup %2755  ;;  %v1465_v44 = vmul.f32 %v2754_v40, %v2740_v12  ;;  %v2714_v12 = vld [vmem:[%s2938_s6] sm:$0xff]  }
 0x8e6   : > { %v1464_v46 = vmul.f32 %v2756_v43, %v3139_v6  ;;  %2598 = vmatpush3.bf16.msra.mxu1 %v2714_v12 }
 0x8e7   : > { %v1715_v42 = vpop.xlane.xlu0 %1714  ;;  %2609 = vmatprep.subr.bf16.mxu1 %v2846_v29 }
 0x8e8   : > { %2761 = vrcp.f32 %v1715_v42  ;;  %v1466_v49 = vpack.c.bf16 %v1465_v44, %v1464_v46 }
 0x8e9   : > { %v1595_v48 = vpop.permute.xlu1 %1594  ;;  %2763 = vrcp.f32 %v1712_v41 }
 0x8ea   : > { %v2758_v50 = vpop.eup %2757  ;;  %v1600_v51 = vsel %vm1344_vm11, %v1595_v48, 0 }
 0x8eb   : > { %v1468_v45 = vpop.permute.xlu0 %1467  ;;  %v2760_v52 = vpop.eup %2759  ;;  %v1592_v54 = vmul.f32 %v2758_v50, %v2744_v23 }
 0x8ec   : > { %v1473_v47 = vsel %vm1344_vm11, %v1468_v45, 0  ;;  %v1591_v55 = vmul.f32 %v2760_v52, %v2742_v14 }
 0x8ed   : > { %2568 = vmatpush3.bf16.msra.mxu0 %v1473_v47  ;;  %v1722_v56 = vpop.permute.xlu1 %1721 }
 0x8ee   : > { %2579 = vmatprep.subr.bf16.mxu0 %v2846_v29  ;;  %v1593_v57 = vpack.c.bf16 %v1592_v54, %v1591_v55  ;;  %v1727_v59 = vsel %vm1344_vm11, %v1722_v56, 0 }
 0x8f0   : > { %2570 = vmatmul.mubr.msk.bf16.vlgmr.msra.gmra.mrb[12].mxu0 %vm1314_vm9, %v1466_v49 }
 0x8f1   : > { %2580 = vmatpush3.bf16.msra.mxu0 %v1600_v51  ;;  %2581 = vmatprep.mubr.msk.bf16.mxu0 %vm2847_vm6, %v2846_v29 }
 0x8f2   : > { %2591 = vmatprep.subr.bf16.mxu0 %v2846_v29  ;;  %v2762_v58 = vpop.eup %2761 }
 0x8f3   : > { %v2764_v60 = vpop.eup %2763  ;;  %v1719_v61 = vmul.f32 %v2762_v58, %v2748_v26 }
 0x8f4   : > { %v1718_v62 = vmul.f32 %v2764_v60, %v3148_v24  ;;  %v2002_v60 = vld [vmem:[%s3013_s27 + $0x8] sm:$0x3f] }
 0x8f6   : > { %v1720_v63 = vpack.c.bf16 %v1719_v61, %v1718_v62  ;;  %v2862_v61 = vmov 1  }
 0x8f7   : > { %2706 = vset.pattern.permute.xlu1 %v2862_v61  ;;  %2705 = vset.pattern.permute.xlu0 %v2862_v61 }
 0x8f8   : > { %2582 = vmatmul.mubr.msk.bf16.vlgmr.msra.gmra.mrb[16].mxu0 %vm1314_vm9, %v1593_v57 }
 0x8f9   : > { %2592 = vmatpush3.bf16.msra.mxu0 %v1727_v59  ;;  %2593 = vmatprep.mubr.msk.bf16.mxu0 %vm2847_vm6, %v2846_v29  ;;  %v2715_v59 = vld [vmem:[%s3276_s22] sm:$0xff]  }
 0x8fa   : > { %2603 = vmatprep.subr.bf16.mxu0 %v2846_v29 }
 0x900   : > { %2594 = vmatmul.mubr.msk.bf16.vlgmr.msra.gmra.mrb[20].mxu0 %vm1314_vm9, %v1720_v63 }
 0x901   : > { %2605 = vmatprep.mubr.msk.bf16.mxu0 %vm2847_vm6, %v2846_v29  ;;  %2604 = vmatpush3.bf16.msra.mxu0 %v2715_v59 }
 0x902   : > { %2615 = vmatprep.subr.bf16.mxu0 %v2846_v29 }
 0x9b2   : > { %v1382_v0 = vpop.f32.mrb[8].mxu0 }
 0x9b3   : > { %v2559_v1 = vpop.f32.mrb[9].mxu0 }
 0x9b4   : > { %v1385_v2 = vpop.f32.mrb[10].mxu0 }
 0x9b5   : > { %v2560_v3 = vpop.f32.mrb[11].mxu0 }
 0x9c3   : > { %v1509_v4 = vpop.f32.mrb[12].mxu0 }
 0x9c4   : > { %v2571_v5 = vpop.f32.mrb[13].mxu0 }
 0x9c5   : > { %v1512_v6 = vpop.f32.mrb[14].mxu0 }
 0x9c6   : > { %v2690_v7 = vpack.i.bf16 %v1512_v6, %v1509_v4  ;;  %v2572_v8 = vpop.f32.mrb[15].mxu0  ;;  %v2457_v6 = vld [vmem:[%s3277_s23] ss:$0 sm:$0xff] }
 0x9c8   : > { %2691 = vrot.lane.b32.xlu1 %v2690_v7, %s2859_s0  ;;  %s3283_s0 = sld [smem:[#allocation10_spill]] }
 0x9cb   : > { %v1636_v9 = vpop.f32.mrb[16].mxu0 }
 0x9cc   : > { %v2583_v10 = vpop.f32.mrb[17].mxu0 }
 0x9cd   : > { %v1639_v16 = vpop.f32.mrb[18].mxu0  ;;  %v2458_v10 = vld [vmem:[%s3278_s26] ss:$0 sm:$0xff] }
 0x9ce   : > { %v2695_v17 = vpack.i.bf16 %v1639_v16, %v1636_v9  ;;  %v2584_v18 = vpop.f32.mrb[19].mxu0 }
 0x9d0   : > { %2696 = vrot.lane.b32.xlu0 %v2695_v17, %s2860_s15  ;;  %s3284_s15 = sld [smem:[#allocation11_spill]] }
 0x9d3   : > { %v1763_v19 = vpop.f32.mrb[20].mxu0 }
 0x9d4   : > { %v2595_v20 = vpop.f32.mrb[21].mxu0 }
 0x9d5   : > { %v1766_v21 = vpop.f32.mrb[22].mxu0  ;;  %v2001_v20 = vld [vmem:[%s3013_s27] sm:$0xff] }
 0x9d6   : > { %v2700_v14 = vpack.i.bf16 %v1766_v21, %v1763_v19  ;;  %v2596_v22 = vpop.f32.mrb[23].mxu0  ;;  %v2863_v19 = vmov 2   ;;  %v2864_v21 = vmov 0  }
 0x9d8   : > { %2701 = vrot.lane.b32.xlu1 %v2700_v14, %s2861_s16  ;;  %v2459_v14 = vld [vmem:[%s3279_s28] ss:$0 sm:$0xff]  ;;  %s3285_s16 = sld [smem:[#allocation13_spill]] }
 0xa3a   : > { %v2692_v23 = vpop.permute.xlu1 %2691 }
 0xa3b   : > { %v2694_v24 = vunpack.i.h.bf16 %v2692_v23  ;;  %v2693_v25 = vunpack.i.l.bf16 %v2692_v23 }
 0xa3d   : > { %v1795_v31 = vsel %vm1262_vm8, %v1385_v2, %v2694_v24  ;;  %v1794_v32 = vsel %vm1262_vm8, %v1382_v0, %v2693_v25 }
 0xa42   : > { %v2697_v15 = vpop.permute.xlu0 %2696 }
 0xa43   : > { %v2699_v26 = vunpack.i.h.bf16 %v2697_v15  ;;  %v2698_v27 = vunpack.i.l.bf16 %v2697_v15 }
 0xa45   : > { %v1798_v35 = vsel %vm1796_vm12, %v1795_v31, %v2699_v26  ;;  %v1797_v36 = vsel %vm1796_vm12, %v1794_v32, %v2698_v27 }
 0xa4a   : > { %v2702_v30 = vpop.permute.xlu1 %2701 }
 0xa4b   : > { %v2704_v33 = vunpack.i.h.bf16 %v2702_v30  ;;  %v2703_v34 = vunpack.i.l.bf16 %v2702_v30 }
 0xa4d   : > { %v1801_v37 = vsel %vm1799_vm13, %v1798_v35, %v2704_v33  ;;  %v1800_v38 = vsel %vm1799_vm13, %v1797_v36, %v2703_v34  ;;  %v2716_v36 = vld [vmem:[%s3280_s1] sm:$0xff]  }
 0xa4e   : > { %v1802_v39 = vpack.c.bf16 %v1801_v37, %v1800_v38 }
 0xa50   : > { %2600 = vmatmul.mubr.msk.bf16.vlgmr.msra.gmra.mrb[20].mxu1 %vm958_vm4, %v1802_v39 }
 0xa51   : > { %2611 = vmatprep.mubr.msk.bf16.mxu1 %vm2847_vm6, %v2846_v29  ;;  %2610 = vmatpush3.bf16.msra.mxu1 %v2716_v36 }
 0xa52   : > { %2621 = vmatprep.subr.bf16.mxu1 %v2846_v29 }
 0xb23   : > { %v1855_v40 = vpop.f32.mrb[20].mxu1 }
 0xb24   : > { %v1856_v41 = vadd.f32 %v2454_v53, %v1855_v40  ;;  %v2601_v42 = vpop.f32.mrb[21].mxu1  ;;  %v2015_v40 = vlaneseq }
 0xb25   : > { %v1858_v43 = vpop.f32.mrb[22].mxu1 }
 0xb26   : > { %v3185_v44 = vadd.f32 %v1856_v41, %v3074_v11  ;;  %v1859_v45 = vadd.f32 %v2454_v53, %v1858_v43  ;;  %v2602_v46 = vpop.f32.mrb[23].mxu1  ;;  %v2016_v41 = vshrl.u32 %v2015_v40, 7 }
 0xb28   : > { %v3188_v47 = vadd.f32 %v1859_v45, %v3077_v13  ;;  %v1864_v48 = vsel %vm958_vm4, %v3185_v44, 0.0 }
 0xb29   : > { %1865 = vadd.xlane.f32.xlu0 %v1864_v48  ;;  %v2038_v48 = vsub.s32 1, %v2016_v41 }
 0xb2a   : > { %v1867_v49 = vsel %vm962_vm5, %v3188_v47, 0.0 }
 0xb2b   : > { %1868 = vadd.xlane.f32.xlu1 %v1867_v49 }
 0xb3c   : > { %2027 = vperm.xlu1 %2706, %v2002_v60  }
 0xb40   : > { %2707 = vset.pattern.permute.xlu1 %v2863_v19 }
 0xb41   : > { %2052 = vperm.xlu1 %2707, %v2001_v20  }
 0xb45   : > { %2055 = vperm.xlu1 %2707, %v2002_v60  }
 0xb49   : > { %2708 = vset.pattern.permute.xlu1 %v2864_v21 }
 0xb4a   : > { %2005 = vperm.xlu1 %2708, %v2001_v20  }
 0xbb6   : > { %v1866_v50 = vpop.xlane.xlu0 %1865 }
 0xbb7   : > { %v1870_v51 = vmul.f32 0.0625, %v1866_v50  ;;  %v2000_v50 = vld [vmem:[%s3281_s2] sm:$0x7] }
 0xbb8   : > { %v1869_v52 = vpop.xlane.xlu1 %1868  ;;  %v2039_v59 = vrot.slane %v2000_v50, %v2038_v48 }
 0xbb9   : > { %v1872_v11 = vsub.f32 %v3185_v44, %v1870_v51  ;;  %v1871_v54 = vmul.f32 0.0625, %v1869_v52 }
 0xbbb   : > { %v1873_v55 = vsub.f32 %v3188_v47, %v1871_v54  ;;  %v1874_v13 = vmul.f32 %v1872_v11, %v1872_v11  ;;  %v2067_v54 = vsub.s32 2, %v2016_v41 }
 0xbbc   : > { %v2028_v37 = vpop.permute.xlu1 %2027 }
 0xbbd   : > { %v1876_v56 = vsel %vm958_vm4, %v1874_v13, 0.0  ;;  %v1875_v57 = vmul.f32 %v1873_v55, %v1873_v55 }
 0xbbe   : > { %1877 = vadd.xlane.f32.xlu0 %v1876_v56 }
 0xbbf   : > { %v1879_v58 = vsel %vm962_vm5, %v1875_v57, 0.0 }
 0xbc0   : > { %v2053_v38 = vpop.permute.xlu1 %2052 }
 0xbc1   : > { %v2058_v13 = vrot.slane %v2053_v38, 6 }
 0xbc2   : > { %1880 = vadd.xlane.f32.xlu0 %v1879_v58 }
 0xbc4   : > { %v2056_v39 = vpop.permute.xlu1 %2055 }
 0xbc5   : > { %v2059_v56 = vrot.slane %v2056_v39, 6 }
 0xbc9   : > { %v2006_v53 = vpop.permute.xlu1 %2005 }
 0xbd8   : > { %2024 = vperm.xlu0 %2705, %v2001_v20  }
 0xbdc   : > { %2709 = vset.pattern.permute.xlu0 %v2863_v19 }
 0xc4b   : > { %v1878_v62 = vpop.xlane.xlu0 %1877 }
 0xc4c   : > { %v1882_v63 = vmul.f32 0.0625, %v1878_v62 }
 0xc4e   : > { %v1884_v0 = vadd.f32 1e-05, %v1882_v63  ;;  %v2068_v63 = vrot.slane %v2000_v50, %v2067_v54 }
 0xc4f   : > { %v1881_v1 = vpop.xlane.xlu0 %1880 }
 0xc50   : > { %2765 = vrsqrt.f32 %v1884_v0  ;;  %v1883_v2 = vmul.f32 0.0625, %v1881_v1  ;;  %v2060_v0 = vsel %vm2057_vm15, %v2058_v13, %v2059_v56 }
 0xc52   : > { %v1885_v3 = vadd.f32 1e-05, %v1883_v2 }
 0xc54   : > { %2767 = vrsqrt.f32 %v1885_v3 }
 0xc57   : > { %v2025_v45 = vpop.permute.xlu0 %2024 }
 0xc58   : > { %v2029_v51 = vrot.slane %v2025_v45, 7 }
 0xc5a   : > { %v2766_v4 = vpop.eup %2765 }
 0xc5b   : > { %v1888_v5 = vmul.f32 %v2766_v4, %v1872_v11 }
 0xc5d   : > { %v1897_v8 = vmul.f32 %v2457_v6, %v1888_v5 }
 0xc5e   : > { %v2768_v7 = vpop.eup %2767 }
 0xc5f   : > { %v1889_v9 = vmul.f32 %v2768_v7, %v1873_v55  ;;  %v1906_v16 = vadd.f32 %v2458_v10, %v1897_v8  ;;  %v2030_v55 = vrot.slane %v2028_v37, 7 }
 0xc61   : > { %v1898_v12 = vmul.f32 %v2457_v6, %v1889_v9  ;;  %v2031_v1 = vsel %vm1992_vm14, %v2029_v51, %v2030_v55 }
 0xc63   : > { %v1907_v17 = vadd.f32 %v2458_v10, %v1898_v12 }
 0xc65   : > { %v1908_v18 = vpack.c.bf16 %v1907_v17, %v1906_v16 }
 0xc67   : > { %2606 = vmatmul.mubr.msk.bf16.vlgmr.msra.gmra.mrb[24].mxu0 %vm958_vm4, %v1908_v18 }
 0xc68   : > { %2616 = vmatpush3.bf16.msra.mxu0 %v3049_v28  ;;  %2617 = vmatprep.mubr.msk.bf16.mxu0 %vm2847_vm6, %v2846_v29 }
 0xd3a   : > { %v1961_v22 = vpop.f32.mrb[24].mxu0 }
 0xd3b   : > { %v1962_v23 = vadd.f32 %v2459_v14, %v1961_v22  ;;  %v2607_v15 = vpop.f32.mrb[25].mxu0 }
 0xd3c   : > { %v1964_v24 = vpop.f32.mrb[26].mxu0  ;;  %v2465_v15 = vld [vmem:[%s3283_s0] ss:$0 sm:$0xff] }
 0xd3d   : > { %v2462_v25 = vmul.f32 -1.442695, %v1962_v23  ;;  %v1965_v28 = vadd.f32 %v2459_v14, %v1964_v24  ;;  %v2608_v26 = vpop.f32.mrb[27].mxu0 }
 0xd3e   : > { %v2466_v26 = vld [vmem:[%s3284_s15] ss:$0 sm:$0xff] }
 0xd3f   : > { %2769 = vpow2.f32 %v2462_v25  ;;  %v2463_v27 = vmul.f32 -1.442695, %v1965_v28 }
 0xd41   : > { %2771 = vpow2.f32 %v2463_v27 }
 0xd49   : > { %v2770_v30 = vpop.eup %2769 }
 0xd4a   : > { %v1974_v31 = vadd.f32 1.0, %v2770_v30 }
 0xd4b   : > { %v2772_v32 = vpop.eup %2771 }
 0xd4c   : > { %2773 = vrcp.f32 %v1974_v31  ;;  %v1975_v33 = vadd.f32 1.0, %v2772_v32 }
 0xd4e   : > { %2775 = vrcp.f32 %v1975_v33 }
 0xd56   : > { %v2774_v34 = vpop.eup %2773 }
 0xd57   : > { %1982 = vrot.lane.b32.xlu1 %v2774_v34, %s2849_s11 }
 0xd58   : > { %v2776_v35 = vpop.eup %2775 }
 0xd5b   : > { %1984 = vrot.lane.b32.xlu1 %v2776_v35, %s2849_s11  ;;  %s3282_s11 = sld [smem:[#allocation9_spill]] }
 0xd5f   : > { %2010 = vperm.xlu1 %2708, %v2002_v60   ;;  %v2017_v60 = vsub.s32 0, %v2016_v41 }
 0xd61   : > { %v2018_v7 = vrot.slane %v2000_v50, %v2017_v60  ;;  %v2464_v22 = vld [vmem:[%s3282_s11] ss:$0 sm:$0xff]  ;;  %v2802_v50 = vld [vmem:[%s2908_s3 + $0x8] sm:$0xff]  }
 0xdc9   : > { %v1983_v42 = vpop.permute.xlu1 %1982 }
 0xdca   : > { %v1988_v43 = vmul.f32 %v1983_v42, %v1962_v23 }
 0xdcc   : > { %v1993_v46 = vrot.slane %v1988_v43, 7 }
 0xdcd   : > { %v1985_v49 = vpop.permute.xlu1 %1984 }
 0xdce   : > { %v1998_v52 = vsel %vm1992_vm14, 0.0, %v1993_v46  ;;  %v1989_v11 = vmul.f32 %v1985_v49, %v1965_v28  ;;  %v2801_v49 = vld [vmem:[%s2908_s3] sm:$0xff]  }
 0xdcf   : > { %v2034_v57 = vmul.f32 %v2029_v51, %v1998_v52  ;;  %v2063_v61 = vmul.f32 %v2058_v13, %v1998_v52  ;;  %v2013_v6 = vmul.f32 %v2006_v53, %v1998_v52  ;;  %v2469_v51 = vld [vmem:[%s3285_s16] ss:$0 sm:$0xff] }
 0xdd0   : > { %v1994_v58 = vrot.slane %v1989_v11, 7 }
 0xdd1   : > { %v2040_v4 = vmul.f32 %v2039_v59, %v2034_v57  ;;  %v2069_v9 = vmul.f32 %v2068_v63, %v2063_v61  ;;  %v2019_v18 = vmul.f32 %v2018_v7, %v2013_v6 }
 0xdd2   : > { %v1995_v62 = vsel %vm1992_vm14, %v1993_v46, %v1994_v58 }
 0xdd3   : > { %v1999_v2 = vsel %vm1344_vm11, %v1995_v62, 0.0  ;;  %v2044_v12 = vrot.slane %v2040_v4, 1  ;;  %v2074_v20 = vrot.slane %v2069_v9, 2 }
 0xdd4   : > { %v2035_v3 = vmul.f32 %v2031_v1, %v1999_v2  ;;  %v2064_v5 = vmul.f32 %v2060_v0, %v1999_v2 }
 0xdd6   : > { %v2041_v8 = vmul.f32 %v2039_v59, %v2035_v3  ;;  %v2070_v10 = vmul.f32 %v2068_v63, %v2064_v5 }
 0xdd8   : > { %v2045_v16 = vrot.slane %v2041_v8, 1  ;;  %v2075_v17 = vrot.slane %v2070_v10, 2 }
 0xdda   : > { %v2046_v19 = vsel %vm1344_vm11, %v2044_v12, %v2045_v16  ;;  %v2076_v14 = vsel %vm2073_vm0, %v2074_v20, %v2075_v17 }
 0xddb   : > { %v2049_v21 = vadd.f32 %v2046_v19, %v2019_v18 }
 0xddd   : > { %v2079_v23 = vadd.f32 %v2076_v14, %v2049_v21  ;;  %v2803_v21 = vld [vmem:[%s2888_s17] ss:$0 sm:$0xff] }
 0xdde   : > { %v2011_v24 = vpop.permute.xlu1 %2010 }
 0xddf   : > { %v2088_v25 = vadd.f32 %v2464_v22, %v2079_v23  ;;  %v2014_v28 = vmul.f32 %v2011_v24, %v1999_v2 }
 0xde1   : > { %v2097_v27 = vmul.f32 %v2465_v15, %v2088_v25  ;;  %v2020_v30 = vmul.f32 %v2018_v7, %v2014_v28 }
 0xde3   : > { %v2106_v31 = vadd.f32 %v2466_v26, %v2097_v27  ;;  %v2050_v32 = vadd.f32 %v2045_v16, %v2020_v30  ;;  %v2805_v27 = vld [vmem:[%s2903_s29] ss:$0 sm:$0xff] }
 0xde5   : > { %v2467_v33 = vmul.f32 -1.442695, %v2106_v31  ;;  %v2080_v34 = vadd.f32 %v2075_v17, %v2050_v32 }
 0xde7   : > { %v2089_v35 = vadd.f32 %v2464_v22, %v2080_v34  ;;  %2777 = vpow2.f32 %v2467_v33 }
 0xde9   : > { %v2098_v36 = vmul.f32 %v2465_v15, %v2089_v35  ;;  %v2804_v15 = vld [vmem:[%s2893_s21] ss:$0 sm:$0xff] }
 0xdeb   : > { %v2107_v37 = vadd.f32 %v2466_v26, %v2098_v36 }
 0xded   : > { %v2468_v38 = vmul.f32 -1.442695, %v2107_v37 }
 0xdef   : > { %2779 = vpow2.f32 %v2468_v38 }
 0xdf1   : > { %v2778_v39 = vpop.eup %2777 }
 0xdf2   : > { %v2114_v53 = vadd.f32 1.0, %v2778_v39 }
 0xdf4   : > { %2781 = vrcp.f32 %v2114_v53 }
 0xdf9   : > { %v2780_v40 = vpop.eup %2779 }
 0xdfa   : > { %v2115_v41 = vadd.f32 1.0, %v2780_v40 }
 0xdfc   : > { %2783 = vrcp.f32 %v2115_v41 }
 0xdfe   : > { %v2782_v42 = vpop.eup %2781 }
 0xdff   : > { %v2120_v45 = vmul.f32 %v2782_v42, %v2106_v31 }
 0xe06   : > { %v2784_v43 = vpop.eup %2783 }
 0xe07   : > { %v2121_v46 = vmul.f32 %v2784_v43, %v2107_v37 }
 0xe09   : > { %v2122_v48 = vpack.c.bf16 %v2121_v46, %v2120_v45 }
 0xe0b   : > { %2612 = vmatmul.mubr.msk.bf16.vlgmr.msra.gmra.mrb[24].mxu1 %vm958_vm4, %v2122_v48  ;;  %v2806_v48 = vld [vmem:[%s2913_s8] ss:$0 sm:$0xff] }
 0xe0c   : > { %2622 = vmatpush3.bf16.msra.mxu1 %v2801_v49  ;;  %2625 = vmatprep.mubr.msk.bf16.mxu1 %vm2847_vm6, %v2846_v29 }
 0xe0d   : > { %2623 = vmatprep.subr.bf16.mxu1 %v2846_v29 }
 0xe10   : > { %2624 = vmatpush3.bf16.msra.mxu1 %v2802_v50 }
 0xede   : > { %v2175_v52 = vpop.f32.mrb[24].mxu1 }
 0xedf   : > { %v2176_v11 = vadd.f32 %v2469_v51, %v2175_v52  ;;  %v2613_v54 = vpop.f32.mrb[25].mxu1 }
 0xee0   : > { %v2178_v55 = vpop.f32.mrb[26].mxu1 }
 0xee1   : > { %v2182_v13 = vadd.f32 %v2176_v11, %v3185_v44  ;;  %v2179_v56 = vadd.f32 %v2469_v51, %v2178_v55  ;;  %v2614_v57 = vpop.f32.mrb[27].mxu1 }
 0xee3   : > { %v2183_v58 = vadd.f32 %v2179_v56, %v3188_v47  ;;  %v2184_v59 = vadd.f32 %v2182_v13, %v3185_v44 }
 0xee5   : > { %v2186_v60 = vsel %vm958_vm4, %v2184_v59, 0.0  ;;  %v2185_v61 = vadd.f32 %v2183_v58, %v3188_v47 }
 0xee6   : > { %2187 = vadd.xlane.f32.xlu1 %v2186_v60 }
 0xee7   : > { %v2189_v29 = vsel %vm962_vm5, %v2185_v61, 0.0 }
 0xee8   : > { %2190 = vadd.xlane.f32.xlu0 %v2189_v29 }
 0xf73   : > { %v2188_v62 = vpop.xlane.xlu1 %2187 }
 0xf74   : > { %v2192_v63 = vmul.f32 0.0625, %v2188_v62 }
 0xf75   : > { %v2191_v0 = vpop.xlane.xlu0 %2190 }
 0xf76   : > { %v2194_v1 = vsub.f32 %v2184_v59, %v2192_v63  ;;  %v2193_v2 = vmul.f32 0.0625, %v2191_v0 }
 0xf78   : > { %v2195_v3 = vsub.f32 %v2185_v61, %v2193_v2  ;;  %v2196_v4 = vmul.f32 %v2194_v1, %v2194_v1 }
 0xf7a   : > { %v2198_v5 = vsel %vm958_vm4, %v2196_v4, 0.0  ;;  %v2197_v6 = vmul.f32 %v2195_v3, %v2195_v3 }
 0xf7b   : > { %2199 = vadd.xlane.f32.xlu0 %v2198_v5 }
 0xf7c   : > { %v2201_v7 = vsel %vm962_vm5, %v2197_v6, 0.0 }
 0xf7d   : > { %2202 = vadd.xlane.f32.xlu1 %v2201_v7 }
0x1008   : > { %v2200_v8 = vpop.xlane.xlu0 %2199 }
0x1009   : > { %v2204_v9 = vmul.f32 0.0625, %v2200_v8 }
0x100a   : > { %v2203_v10 = vpop.xlane.xlu1 %2202 }
0x100b   : > { %v2206_v12 = vadd.f32 1e-05, %v2204_v9  ;;  %v2205_v16 = vmul.f32 0.0625, %v2203_v10  ;;  %v2476_v9 = vld [vmem:[%s3286_s18] ss:$0 sm:$0xff] }
0x100d   : > { %2785 = vrsqrt.f32 %v2206_v12  ;;  %v2207_v17 = vadd.f32 1e-05, %v2205_v16  ;;  %v2477_v16 = vld [vmem:[%s3003_s12] ss:$0 sm:$0xff] }
0x100f   : > { %2787 = vrsqrt.f32 %v2207_v17 }
0x1017   : > { %v2786_v18 = vpop.eup %2785 }
0x1018   : > { %v2210_v19 = vmul.f32 %v2786_v18, %v2194_v1 }
0x1019   : > { %v2788_v20 = vpop.eup %2787 }
0x101a   : > { %v2212_v14 = vmul.f32 %v2803_v21, %v2210_v19  ;;  %v2211_v22 = vmul.f32 %v2788_v20, %v2195_v3 }
0x101c   : > { %v2213_v23 = vmul.f32 %v2803_v21, %v2211_v22  ;;  %v2214_v24 = vadd.f32 %v2804_v15, %v2212_v14 }
0x101e   : > { %v2215_v25 = vadd.f32 %v2804_v15, %v2213_v23 }
0x1020   : > { %v2216_v28 = vpack.c.bf16 %v2215_v25, %v2214_v24 }
0x1022   : > { %2618 = vmatmul.mubr.msk.bf16.vlgmr.msra.gmra.mrb[28].mxu0 %vm958_vm4, %v2216_v28 }
0x10f5   : > { %v2254_v26 = vpop.f32.mrb[28].mxu0 }
0x10f6   : > { %v2255_v30 = vadd.f32 %v2805_v27, %v2254_v26  ;;  %v2619_v31 = vpop.f32.mrb[29].mxu0 }
0x10f7   : > { %v2257_v32 = vpop.f32.mrb[30].mxu0 }
0x10f8   : > { %v2473_v33 = vmul.f32 -1.442695, %v2255_v30  ;;  %v2258_v34 = vadd.f32 %v2805_v27, %v2257_v32  ;;  %v2620_v35 = vpop.f32.mrb[31].mxu0 }
0x10fa   : > { %2789 = vpow2.f32 %v2473_v33  ;;  %v2474_v36 = vmul.f32 -1.442695, %v2258_v34 }
0x10fc   : > { %2791 = vpow2.f32 %v2474_v36 }
0x1104   : > { %v2790_v37 = vpop.eup %2789 }
0x1105   : > { %v2267_v38 = vadd.f32 1.0, %v2790_v37 }
0x1106   : > { %v2792_v39 = vpop.eup %2791 }
0x1107   : > { %2793 = vrcp.f32 %v2267_v38  ;;  %v2268_v53 = vadd.f32 1.0, %v2792_v39 }
0x1109   : > { %2795 = vrcp.f32 %v2268_v53 }
0x1111   : > { %v2794_v40 = vpop.eup %2793 }
0x1112   : > { %v2273_v42 = vmul.f32 %v2794_v40, %v2255_v30 }
0x1113   : > { %v2796_v41 = vpop.eup %2795 }
0x1114   : > { %v2274_v43 = vmul.f32 %v2796_v41, %v2258_v34 }
0x1116   : > { %v2275_v45 = vpack.c.bf16 %v2274_v43, %v2273_v42 }
0x1118   : > { %2626 = vmatmul.mubr.msk.bf16.vlgmr.msra.gmra.mrb[28].mxu1 %vm1103_vm7, %v2275_v45 }
0x11eb   : > { %v2313_v46 = vpop.f32.mrb[28].mxu1 }
0x11ec   : > { %v2314_v49 = vadd.f32 %v2806_v48, %v2313_v46  ;;  %v2627_v50 = vpop.f32.mrb[29].mxu1 }
0x11ed   : > { %v2316_v51 = vpop.f32.mrb[30].mxu1 }
0x11ee   : > { %v2320_v52 = vmul.f32 2.0, %v2314_v49  ;;  %v2317_v11 = vadd.f32 %v2806_v48, %v2316_v51  ;;  %v2628_v54 = vpop.f32.mrb[31].mxu1 }
0x11f0   : > { %v2321_v55 = vmul.f32 2.0, %v2317_v11  ;;  %v2322_v13 = vadd.f32 %v2320_v52, %v3185_v44 }
0x11f2   : > { %v2324_v56 = vsel %vm958_vm4, %v2322_v13, 0.0  ;;  %v2323_v57 = vadd.f32 %v2321_v55, %v3188_v47 }
0x11f3   : > { %2325 = vadd.xlane.f32.xlu0 %v2324_v56 }
0x11f4   : > { %v2327_v58 = vsel %vm962_vm5, %v2323_v57, 0.0 }
0x11f5   : > { %2328 = vadd.xlane.f32.xlu1 %v2327_v58 }
0x1280   : > { %v2326_v59 = vpop.xlane.xlu0 %2325 }
0x1281   : > { %v2330_v60 = vmul.f32 0.0625, %v2326_v59 }
0x1282   : > { %v2329_v61 = vpop.xlane.xlu1 %2328 }
0x1283   : > { %v2332_v29 = vsub.f32 %v2322_v13, %v2330_v60  ;;  %v2331_v62 = vmul.f32 0.0625, %v2329_v61 }
0x1285   : > { %v2333_v63 = vsub.f32 %v2323_v57, %v2331_v62  ;;  %v2334_v0 = vmul.f32 %v2332_v29, %v2332_v29 }
0x1287   : > { %v2336_v1 = vsel %vm958_vm4, %v2334_v0, 0.0  ;;  %v2335_v2 = vmul.f32 %v2333_v63, %v2333_v63 }
0x1288   : > { %2337 = vadd.xlane.f32.xlu0 %v2336_v1 }
0x1289   : > { %v2339_v44 = vsel %vm962_vm5, %v2335_v2, 0.0 }
0x128a   : > { %2340 = vadd.xlane.f32.xlu1 %v2339_v44 }
0x1315   : > { %v2338_v47 = vpop.xlane.xlu0 %2337 }
0x1316   : > { %v2342_v3 = vmul.f32 0.0625, %v2338_v47 }
0x1317   : > { %v2341_v4 = vpop.xlane.xlu1 %2340 }
0x1318   : > { %v2344_v5 = vadd.f32 1e-05, %v2342_v3  ;;  %v2343_v6 = vmul.f32 0.0625, %v2341_v4 }
0x131a   : > { %2797 = vrsqrt.f32 %v2344_v5  ;;  %v2345_v7 = vadd.f32 1e-05, %v2343_v6 }
0x131c   : > { %2799 = vrsqrt.f32 %v2345_v7 }
0x1324   : > { %v2798_v8 = vpop.eup %2797 }
0x1325   : > { %v2348_v10 = vmul.f32 %v2798_v8, %v2332_v29 }
0x1326   : > { %v2800_v12 = vpop.eup %2799 }
0x1327   : > { %v2357_v17 = vmul.f32 %v2476_v9, %v2348_v10  ;;  %v2349_v18 = vmul.f32 %v2800_v12, %v2333_v63  ;;  %2373 = sbr.rel (%p2478_p4) target bundleno = 4910 (0x132e), region = 144 }
0x1329   : > { %v2366_v19 = vadd.f32 %v2477_v16, %v2357_v17  ;;  %v2358_v20 = vmul.f32 %v2476_v9, %v2349_v18 }
0x132b   : > { %2368 = vst.msk [vmem:[#allocation2] sm:$0xff] %vm958_vm4, %v2366_v19  ;;  %v2367_v21 = vadd.f32 %v2477_v16, %v2358_v20  ;;  %2374 = vst.msk [vmem:[%s3018_s4] sm:$0xff] (!%p2478_p4), %vm958_vm4, %v2366_v19 }
0x132d   : > { %2369 = vst.msk [vmem:[#allocation2 + $0x8] sm:$0x3f] %vm962_vm5, %v2367_v21  ;;  %2375 = vst.msk [vmem:[%s3018_s4 + $0x8] sm:$0x3f] (!%p2478_p4), %vm962_vm5, %v2367_v21 }
0x132e PF: > { %s69_s7 = sadd.s32 1, %s2813_s7  }
0x132f   : > { %p66_p5 = scmp.ge.s32.totalorder %s69_s7, 4  }
0x1331   :  { %68 = sbr.rel (!%p66_p5) target bundleno = 49 (0x31), region = 196 }

</bundles_post_ra>
